<compile_context>
chip_gen: v5e
topology: v5e:2x2
jax: 0.10.0
libtpu: 0.0.40
codegen_flags: <defaults>
</compile_context>

<pallas_src>
import functools

import jax
import jax.numpy as jnp
from jax import lax
from jax.experimental import pallas as pl
from jax.experimental.pallas import tpu as pltpu


# ------------------------------ small helpers --------------------------------

def _round_up(n, m):
    return ((n + m - 1) // m) * m


def _lane_tile(n, target):
    """Tile for a lane (last) dim of size n: <= max(target, 128), a multiple of
    128 that divides n, otherwise the full dim."""
    if n <= target:
        return n
    t = max(128, (target // 128) * 128)
    while t >= 128:
        if n % t == 0:
            return t
        t -= 128
    return n


def _block_tile(n, target):
    """Largest divisor of n that is <= target (for non-lane block dims)."""
    t = min(n, target)
    while n % t != 0:
        t -= 1
    return t


def _default_vmem_limit_bytes():
    """Scoped-VMEM budget above the small per-generation defaults (16/32 MiB)
    but comfortably below physical capacity everywhere (v5e/v6e 128 MiB,
    v7x 64 MiB per TensorCore)."""
    cap = 64 * 1024 * 1024
    try:
        cap = int(pltpu.get_tpu_info().vmem_capacity_bytes)
    except Exception:
        pass
    return int(min(96 * 1024 * 1024, (cap * 3) // 4))


# ----------------------- pointwise (1x1x1) conv kernels ----------------------

def _pointwise_conv_kernel(x_ref, w_ref, o_ref):
    # x: (Cin, TN), w: (Cout, Cin) -> o: (Cout, TN); f32 accumulation.
    o_ref[...] = jnp.dot(w_ref[...], x_ref[...],
                         preferred_element_type=jnp.float32).astype(o_ref.dtype)


def _pointwise_conv_bias_kernel(x_ref, w_ref, b_ref, o_ref):
    # x: (Cin, TN), w: (Cout, Cin), b: (Cout, 1) f32 -> o: (Cout, TN)
    acc = jnp.dot(w_ref[...], x_ref[...], preferred_element_type=jnp.float32)
    o_ref[...] = (acc + b_ref[...]).astype(o_ref.dtype)


def pointwise_conv3d(x_bcn, w, b=None, *, tile_n=2048, out_dtype=None):
    """1x1x1 Conv3d on channel-first data: (B, Cin, N) -> (B, Cout, N).

    Per-batch (Cout, Cin) @ (Cin, TILE_N) matmuls; the weight block stays
    VMEM-resident across the spatially tiled, double-buffered grid.
    """
    B, Cin, N = x_bcn.shape
    Cout = w.shape[0]
    if out_dtype is None:
        out_dtype = x_bcn.dtype

    # Keep both matmul operands in the activation dtype (bf16 streaming keeps
    # the MXU on the single-pass path); accumulation is f32 in the kernel.
    w = w.astype(x_bcn.dtype)

    # Pad awkward N so lane tiles stay 128-aligned and bounded.
    if N > tile_n and N % 128 != 0:
        n_pad = _round_up(N, 128)
        x_bcn = jnp.pad(x_bcn, ((0, 0), (0, 0), (0, n_pad - N)))
    else:
        n_pad = N
    tn = _lane_tile(n_pad, tile_n)
    grid = (B, n_pad // tn)

    x_spec = pl.BlockSpec((None, Cin, tn), lambda bi, j: (bi, 0, j))
    w_spec = pl.BlockSpec((Cout, Cin), lambda bi, j: (0, 0))
    o_spec = pl.BlockSpec((None, Cout, tn), lambda bi, j: (bi, 0, j))
    cparams = pltpu.CompilerParams(dimension_semantics=("parallel", "parallel"))
    out_shape = jax.ShapeDtypeStruct((B, Cout, n_pad), out_dtype)

    if b is None:
        out = pl.pallas_call(
            _pointwise_conv_kernel, out_shape=out_shape, grid=grid,
            in_specs=[x_spec, w_spec], out_specs=o_spec,
            compiler_params=cparams,
        )(x_bcn, w)
    else:
        b_spec = pl.BlockSpec((Cout, 1), lambda bi, j: (0, 0))
        out = pl.pallas_call(
            _pointwise_conv_bias_kernel, out_shape=out_shape, grid=grid,
            in_specs=[x_spec, w_spec, b_spec], out_specs=o_spec,
            compiler_params=cparams,
        )(x_bcn, w, b.astype(jnp.float32).reshape(Cout, 1))

    return out[:, :, :N] if n_pad != N else out


# --------------------- flash-style axial attention kernel --------------------

def _axial_flash_kernel(q_ref, k_ref, v_ref, o_ref,
                        m_ref, l_ref, acc_ref, vsum_ref, *, eps, k_valid):
    # q: (CB, A, LQ), k/v: (CB, A, LK).  Per channel c the attention sequence
    # is the lane axis L; the contraction dim is the tiny axial length A;
    # softmax over keys is computed online.  The softmax scale is already
    # folded into q (via the to_qkv weight), so no per-step score scaling.
    ki = pl.program_id(3)

    @pl.when(ki == 0)
    def _init():
        m_ref[...] = jnp.full(m_ref.shape, -jnp.inf, m_ref.dtype)
        l_ref[...] = jnp.zeros(l_ref.shape, l_ref.dtype)
        acc_ref[...] = jnp.zeros(acc_ref.shape, acc_ref.dtype)
        vsum_ref[...] = jnp.zeros(vsum_ref.shape, vsum_ref.dtype)

    q = q_ref[...]                         # (CB, A, LQ)  kept in stream dtype
    k = k_ref[...]                         # (CB, A, LK)
    v = v_ref[...]                         # (CB, A, LK)

    # s[c, l, m] = sum_a q[c, a, l] * k[c, a, m]   (no transpose materialized)
    s = lax.dot_general(q, k, (((1,), (1,)), ((0,), (0,))),
                        preferred_element_type=jnp.float32)   # (CB, LQ, LK) f32

    if k_valid is not None:
        # L was zero-padded up to a multiple of 128: mask padded keys.
        lk = k.shape[-1]
        key_idx = ki * lk + lax.broadcasted_iota(jnp.int32, (1, 1, lk), 2)
        s = jnp.where(key_idx < k_valid, s, -jnp.inf)

    m_prev = m_ref[...]                                       # (CB, LQ)
    m_new = jnp.maximum(m_prev, jnp.max(s, axis=-1))          # (CB, LQ)
    alpha = jnp.exp(m_prev - m_new)                           # (CB, LQ)
    # NOTE: exp kept in f32 for cross-generation safety (v5e EUP has no bf16).
    p = jnp.exp(s - m_new[:, :, None])                        # (CB, LQ, LK) f32

    l_ref[...] = alpha * l_ref[...] + jnp.sum(p, axis=-1)
    # pv[c, a, l] = sum_m v[c, a, m] * p[c, l, m]
    pv = lax.dot_general(v, p.astype(v.dtype), (((2,), (2,)), ((0,), (0,))),
                         preferred_element_type=jnp.float32)  # (CB, A, LQ) f32
    acc_ref[...] = alpha[:, None, :] * acc_ref[...] + pv
    # Running sum_m v for the "+ eps" term.  It is re-accumulated per q-block
    # (redundant across qi) because that stays correct under megacore splits
    # of the parallel qi axis; the cost is only (CB, A, LK) per step.
    vsum_ref[...] += jnp.sum(v.astype(jnp.float32), axis=-1)  # (CB, A)
    m_ref[...] = m_new

    @pl.when(ki == pl.num_programs(3) - 1)
    def _finalize():
        inv_l = pl.reciprocal(l_ref[...], approx=True)        # (CB, LQ)
        # (softmax + eps) @ v == softmax @ v + eps * sum_m v[..., m]
        out = acc_ref[...] * inv_l[:, None, :] + eps * vsum_ref[...][:, :, None]
        o_ref[...] = out.astype(o_ref.dtype)


def axial_flash_attention(qkv_std, n_ch, eps, *, q_tile=256, k_tile=512,
                          c_tile=8, vmem_limit_bytes=None):
    """qkv_std: (B, 3C, A, L) with q = [:, :C] (already scaled), k = [:, C:2C],
    v = [:, 2C:].  Returns o: (B, C, A, L) with
      o[b, c, a, l] = sum_m (softmax_m(q.k) + eps)[l, m] * v[b, c, a, m].
    """
    B, C3, A, L = qkv_std.shape
    assert C3 == 3 * n_ch

    # Pad L to a multiple of 128 when it must be split into lane tiles, so
    # blocks stay lane-dense and bounded on every generation.  Padded keys are
    # masked to -inf in the kernel; padded query columns are sliced off below.
    if L % 128 != 0 and (L > q_tile or L > k_tile):
        l_pad = _round_up(L, 128)
        qkv_std = jnp.pad(qkv_std, ((0, 0), (0, 0), (0, 0), (0, l_pad - L)))
        k_valid = L
    else:
        l_pad = L
        k_valid = None

    lq = _lane_tile(l_pad, q_tile)
    lk = _lane_tile(l_pad, k_tile)
    cb = _block_tile(n_ch, c_tile)
    n_cb = n_ch // cb
    # Parallel extents B * n_cb * (l_pad // lq) feed megacore (v7x: keep >= 2).
    grid = (B, n_cb, l_pad // lq, l_pad // lk)

    q_spec = pl.BlockSpec((None, cb, A, lq), lambda b, c, qi, ki: (b, c, 0, qi))
    k_spec = pl.BlockSpec((None, cb, A, lk),
                          lambda b, c, qi, ki: (b, n_cb + c, 0, ki))
    v_spec = pl.BlockSpec((None, cb, A, lk),
                          lambda b, c, qi, ki: (b, 2 * n_cb + c, 0, ki))
    o_spec = pl.BlockSpec((None, cb, A, lq), lambda b, c, qi, ki: (b, c, 0, qi))

    if vmem_limit_bytes is None:
        vmem_limit_bytes = _default_vmem_limit_bytes()

    kern = functools.partial(_axial_flash_kernel, eps=eps, k_valid=k_valid)
    out = pl.pallas_call(
        kern,
        out_shape=jax.ShapeDtypeStruct((B, n_ch, A, l_pad), qkv_std.dtype),
        grid=grid,
        in_specs=[q_spec, k_spec, v_spec],
        out_specs=o_spec,
        scratch_shapes=[
            pltpu.VMEM((cb, lq), jnp.float32),      # running max
            pltpu.VMEM((cb, lq), jnp.float32),      # running softmax denom
            pltpu.VMEM((cb, A, lq), jnp.float32),   # output accumulator
            pltpu.VMEM((cb, A), jnp.float32),       # running sum_m v (+eps term)
        ],
        compiler_params=pltpu.CompilerParams(
            dimension_semantics=("parallel", "parallel", "parallel", "arbitrary"),
            vmem_limit_bytes=vmem_limit_bytes),
    )(qkv_std, qkv_std, qkv_std)

    return out[:, :, :, :L] if l_pad != L else out


# ------------------------------- forward pass --------------------------------

def single_axial_attention(x, params, heads=4, axis=0, eps=1e-6,
                           q_tile=256, k_tile=512, c_tile=8, conv_tile=2048,
                           stream_dtype=jnp.bfloat16):
    B, C, D, H, W = x.shape
    dk = C // heads
    scale = dk ** (-0.5)
    w_qkv, w_proj, b_proj = params["w_qkv"], params["w_proj"], params["b_proj"]

    # Fold the softmax scale into the q rows of the qkv weight: one tiny
    # (3C, C) op instead of scaling the (lq, lk) score tile every k-step.
    w_qkv_eff = jnp.concatenate([w_qkv[:C] * scale, w_qkv[C:]], axis=0)

    N = D * H * W
    x_bcn = x.reshape(B, C, N)                                   # free reshape

    # to_qkv: pointwise Conv3d (no bias).  Emit the result (and therefore the
    # k/v tiles the flash loop re-streams L/lq times) in the stream dtype.
    qkv = pointwise_conv3d(x_bcn, w_qkv_eff, None, tile_n=conv_tile,
                           out_dtype=stream_dtype)               # (B, 3C, N)

    # Lay q/k/v out as (B, 3C, A, L): per channel an (A, L) matrix whose lane
    # axis L is the attention sequence and A is the contraction dim.
    if axis == 0:
        A, L = D, H * W
        qkv_std = qkv.reshape(B, 3 * C, D, H * W)                # free reshape
    elif axis == 1:
        A, L = H, D * W
        qkv_std = jnp.transpose(qkv.reshape(B, 3 * C, D, H, W),
                                (0, 1, 3, 2, 4)).reshape(B, 3 * C, H, D * W)
    else:
        A, L = W, D * H
        qkv_std = jnp.transpose(qkv.reshape(B, 3 * C, D, H, W),
                                (0, 1, 4, 2, 3)).reshape(B, 3 * C, W, D * H)

    o = axial_flash_attention(qkv_std, C, eps,
                              q_tile=q_tile, k_tile=k_tile, c_tile=c_tile)

    # Mirror the module's  (attn @ v).transpose(2, 3).reshape(B, C, D, H, W):
    # o[b, h*dk + c, a, l] == attn_out[b, h, c, l, a].
    # TODO(synk): this channel/spatial index mix is non-rectangular, so it
    # cannot be folded into the proj conv's BlockSpec index_map; it stays as
    # the single XLA permute (now moving bf16, i.e. half the HBM traffic).
    o = o.reshape(B, heads, dk, A, L)
    o = jnp.transpose(o, (0, 1, 4, 2, 3)).reshape(B, C, N)

    # proj: pointwise Conv3d with bias; bf16 inputs, f32 accumulate, f32 out.
    y = pointwise_conv3d(o, w_proj, b_proj, tile_n=conv_tile, out_dtype=x.dtype)
    return y.reshape(B, C, D, H, W)


# -------------------------- pure-JAX reference check -------------------------

def _prep_qkv_ref(t, B, C, D, H, W, heads, axis):
    if axis == 0:
        return jnp.transpose(t, (0, 1, 3, 4, 2)).reshape(B, heads, C // heads, H * W, D)
    elif axis == 1:
        return jnp.transpose(t, (0, 1, 2, 4, 3)).reshape(B, heads, C // heads, D * W, H)
    else:
        return t.reshape(B, heads, C // heads, D * H, W)


def single_axial_attention_ref(x, params, heads=4, axis=0, eps=1e-6):
    B, C, D, H, W = x.shape
    scale = (C // heads) ** (-0.5)
    w_qkv, w_proj, b_proj = params["w_qkv"], params["w_proj"], params["b_proj"]

    qkv = jnp.einsum("oc,bcdhw->bodhw", w_qkv, x)
    q_, k_, v_ = jnp.split(qkv, 3, axis=1)
    q = _prep_qkv_ref(q_, B, C, D, H, W, heads, axis)
    k = _prep_qkv_ref(k_, B, C, D, H, W, heads, axis)
    v = _prep_qkv_ref(v_, B, C, D, H, W, heads, axis)

    attn = jnp.einsum("bhcla,bhcma->bhclm", q, k) * scale
    attn = jax.nn.softmax(attn, axis=-1) + eps
    o = jnp.einsum("bhclm,bhcma->bhcla", attn, v)
    o = jnp.swapaxes(o, 2, 3).reshape(B, C, D, H, W)
    y = jnp.einsum("oc,bcdhw->bodhw", w_proj, o) + b_proj[None, :, None, None, None]
    return y


# ----------------------------------- main ------------------------------------

if __name__ == "__main__":
    heads = 4

    def make_params(C, k1, k2, k3):
        return {
            # Conv3d(C, 3C, 1, bias=False).weight -> (3C, C, 1,1,1); use (3C, C)
            "w_qkv": 0.1 * jax.random.normal(k1, (3 * C, C), jnp.float32),
            # Conv3d(C, C, 1).weight/bias -> (C, C), (C,)
            "w_proj": 0.1 * jax.random.normal(k2, (C, C), jnp.float32),
            "b_proj": 0.1 * jax.random.normal(k3, (C,), jnp.float32),
        }

    key = jax.random.PRNGKey(0)
    kx, kq, kp, kb = jax.random.split(key, 4)

    # --- Config 1: bf16 streaming path, multi-block flash loop exercised -----
    B, C, D, H, W = 2, 8, 8, 16, 16            # axis=0 -> A=8, L=256, N=2048
    axis = 0
    x = jax.random.normal(kx, (B, C, D, H, W), jnp.float32)
    params = make_params(C, kq, kp, kb)

    fwd = jax.jit(functools.partial(
        single_axial_attention, heads=heads, axis=axis,
        q_tile=128, k_tile=128, c_tile=4, conv_tile=1024,
        stream_dtype=jnp.bfloat16))
    y = jax.block_until_ready(fwd(x, params))
    y_ref = single_axial_attention_ref(x, params, heads=heads, axis=axis)
    assert y.shape == (B, C, D, H, W)
    err = float(jnp.max(jnp.abs(y - y_ref)))
    assert jnp.allclose(y, y_ref, atol=1e-2, rtol=1e-2), \
        f"bf16-stream output mismatch vs reference (max abs err {err})"

    # --- Config 2: f32 path with non-128-divisible L (key masking + axis=2) --
    B2, C2, D2, H2, W2 = 2, 8, 12, 12, 8       # axis=2 -> A=8, L=144, N=1152
    axis2 = 2
    x2 = jax.random.normal(jax.random.PRNGKey(1), (B2, C2, D2, H2, W2), jnp.float32)
    k1, k2, k3 = jax.random.split(jax.random.PRNGKey(2), 3)
    params2 = make_params(C2, k1, k2, k3)

    fwd2 = jax.jit(functools.partial(
        single_axial_attention, heads=heads, axis=axis2,
        q_tile=128, k_tile=128, c_tile=8, conv_tile=1024,
        stream_dtype=jnp.float32))
    y2 = jax.block_until_ready(fwd2(x2, params2))
    y2_ref = single_axial_attention_ref(x2, params2, heads=heads, axis=axis2)
    assert y2.shape == (B2, C2, D2, H2, W2)
    err2 = float(jnp.max(jnp.abs(y2 - y2_ref)))
    assert jnp.allclose(y2, y2_ref, atol=2e-3, rtol=2e-3), \
        f"f32 (padded-L) output mismatch vs reference (max abs err {err2})"

    print("KERNEL_OK")
</pallas_src>

<mosaic_0001>
module attributes {stable_mosaic.version = 11 : i64} {
  func.func @_pointwise_conv_kernel(%arg0: i32, %arg1: i32, %arg2: memref<1x8x1024xf32, #tpu.memory_space<vmem>>, %arg3: memref<24x8xf32, #tpu.memory_space<vmem>>, %arg4: memref<1x24x1024xbf16, #tpu.memory_space<vmem>>) attributes {dimension_semantics = [#tpu.dimension_semantics<parallel>, #tpu.dimension_semantics<parallel>], iteration_bounds = array<i64: 2, 2>, scalar_prefetch = 0 : i64, scratch_operands = 0 : i64, tpu.core_type = #tpu.core_type<tc>, window_params = [{transform_indices = @transform_0, window_bounds = array<i64: 1, 8, 1024>}, {pipeline_mode = #tpu.pipeline_mode<synchronous>, transform_indices = @transform_1, window_bounds = array<i64: 24, 8>}, {transform_indices = @transform_2, window_bounds = array<i64: 1, 24, 1024>}]} {
    %c0 = arith.constant 0 : index
    %c0_0 = arith.constant 0 : index
    %0 = vector.load %arg3[%c0, %c0_0] : memref<24x8xf32, #tpu.memory_space<vmem>>, vector<24x8xf32>
    %c0_1 = arith.constant 0 : index
    %c0_2 = arith.constant 0 : index
    %c0_3 = arith.constant 0 : index
    %1 = vector.load %arg2[%c0_1, %c0_2, %c0_3] : memref<1x8x1024xf32, #tpu.memory_space<vmem>>, vector<1x8x1024xf32>
    %2 = vector.shape_cast %1 : vector<1x8x1024xf32> to vector<8x1024xf32>
    %cst = arith.constant dense<0.000000e+00> : vector<24x1024xf32>
    %3 = tpu.matmul %0, %2, %cst {dimension_numbers = #tpu.dot_dimension_numbers<[1], [0], [0], [1], [0, 0, 1, 1], [], []>} : vector<24x8xf32>, vector<8x1024xf32>, vector<24x1024xf32> -> vector<24x1024xf32>
    %4 = arith.truncf %3 : vector<24x1024xf32> to vector<24x1024xbf16>
    %c0_4 = arith.constant 0 : index
    %c0_5 = arith.constant 0 : index
    %c0_6 = arith.constant 0 : index
    %5 = vector.load %arg4[%c0_4, %c0_5, %c0_6] : memref<1x24x1024xbf16, #tpu.memory_space<vmem>>, vector<1x24x1024xbf16>
    %6 = vector.shape_cast %5 : vector<1x24x1024xbf16> to vector<24x1024xbf16>
    %7 = vector.shape_cast %4 : vector<24x1024xbf16> to vector<1x24x1024xbf16>
    tpu.vector_store %arg4[%c0_4, %c0_5, %c0_6], %7 {strides = array<i32>} : memref<1x24x1024xbf16, #tpu.memory_space<vmem>>, vector<1x24x1024xbf16>,
    return
  }
  func.func @transform_0(%arg0: i32, %arg1: i32) -> (i32, i32, i32) {
    %c0_i32 = arith.constant 0 : i32
    %c0_i32_0 = arith.constant 0 : i32
    return %arg0, %c0_i32, %arg1 : i32, i32, i32
  }
  func.func @transform_1(%arg0: i32, %arg1: i32) -> (i32, i32) {
    %c0_i32 = arith.constant 0 : i32
    %c0_i32_0 = arith.constant 0 : i32
    %c0_i32_1 = arith.constant 0 : i32
    return %c0_i32, %c0_i32_0 : i32, i32
  }
  func.func @transform_2(%arg0: i32, %arg1: i32) -> (i32, i32, i32) {
    %c0_i32 = arith.constant 0 : i32
    %c0_i32_0 = arith.constant 0 : i32
    return %arg0, %c0_i32, %arg1 : i32, i32, i32
  }
}

module attributes {stable_mosaic.version = 11 : i64} {
  func.func @_axial_flash_kernel(%arg0: i32, %arg1: i32, %arg2: i32, %arg3: i32, %arg4: memref<1x4x8x128xbf16, #tpu.memory_space<vmem>>, %arg5: memref<1x4x8x128xbf16, #tpu.memory_space<vmem>>, %arg6: memref<1x4x8x128xbf16, #tpu.memory_space<vmem>>, %arg7: memref<1x4x8x128xbf16, #tpu.memory_space<vmem>>, %arg8: memref<4x128xf32, #tpu.memory_space<vmem>>, %arg9: memref<4x128xf32, #tpu.memory_space<vmem>>, %arg10: memref<4x8x128xf32, #tpu.memory_space<vmem>>, %arg11: memref<4x8xf32, #tpu.memory_space<vmem>>) attributes {dimension_semantics = [#tpu.dimension_semantics<parallel>, #tpu.dimension_semantics<parallel>, #tpu.dimension_semantics<parallel>, #tpu.dimension_semantics<arbitrary>], iteration_bounds = array<i64: 2, 2, 2, 2>, scalar_prefetch = 0 : i64, scratch_operands = 4 : i64, tpu.core_type = #tpu.core_type<tc>, window_params = [{transform_indices = @transform_0, window_bounds = array<i64: 1, 4, 8, 128>}, {transform_indices = @transform_1, window_bounds = array<i64: 1, 4, 8, 128>}, {transform_indices = @transform_2, window_bounds = array<i64: 1, 4, 8, 128>}, {transform_indices = @transform_3, window_bounds = array<i64: 1, 4, 8, 128>}]} {
    %c0_i32 = arith.constant 0 : i32
    %0 = arith.cmpi eq, %arg3, %c0_i32 : i32
    %1 = arith.extui %0 : i1 to i32
    %c0_i32_0 = arith.constant 0 : i32
    %2 = arith.cmpi ne, %1, %c0_i32_0 : i32
    scf.if %2 {
      %cst_35 = arith.constant 0xFF800000 : f32
      %41 = vector.broadcast %cst_35 : f32 to vector<4x128xf32>
      %c0_36 = arith.constant 0 : index
      %c0_37 = arith.constant 0 : index
      %42 = vector.load %arg8[%c0_36, %c0_37] : memref<4x128xf32, #tpu.memory_space<vmem>>, vector<4x128xf32>
      tpu.vector_store %arg8[%c0_36, %c0_37], %41 {strides = array<i32>} : memref<4x128xf32, #tpu.memory_space<vmem>>, vector<4x128xf32>,
      %cst_38 = arith.constant 0.000000e+00 : f32
      %43 = vector.broadcast %cst_38 : f32 to vector<4x128xf32>
      %c0_39 = arith.constant 0 : index
      %c0_40 = arith.constant 0 : index
      %44 = vector.load %arg9[%c0_39, %c0_40] : memref<4x128xf32, #tpu.memory_space<vmem>>, vector<4x128xf32>
      tpu.vector_store %arg9[%c0_39, %c0_40], %43 {strides = array<i32>} : memref<4x128xf32, #tpu.memory_space<vmem>>, vector<4x128xf32>,
      %cst_41 = arith.constant 0.000000e+00 : f32
      %45 = vector.broadcast %cst_41 : f32 to vector<4x8x128xf32>
      %c0_42 = arith.constant 0 : index
      %c0_43 = arith.constant 0 : index
      %c0_44 = arith.constant 0 : index
      %46 = vector.load %arg10[%c0_42, %c0_43, %c0_44] : memref<4x8x128xf32, #tpu.memory_space<vmem>>, vector<4x8x128xf32>
      tpu.vector_store %arg10[%c0_42, %c0_43, %c0_44], %45 {strides = array<i32>} : memref<4x8x128xf32, #tpu.memory_space<vmem>>, vector<4x8x128xf32>,
      %cst_45 = arith.constant 0.000000e+00 : f32
      %47 = vector.broadcast %cst_45 : f32 to vector<4x8xf32>
      %c0_46 = arith.constant 0 : index
      %c0_47 = arith.constant 0 : index
      %48 = vector.load %arg11[%c0_46, %c0_47] : memref<4x8xf32, #tpu.memory_space<vmem>>, vector<4x8xf32>
      tpu.vector_store %arg11[%c0_46, %c0_47], %47 {strides = array<i32>} : memref<4x8xf32, #tpu.memory_space<vmem>>, vector<4x8xf32>,
    } else {
    }
    %c0 = arith.constant 0 : index
    %c0_1 = arith.constant 0 : index
    %c0_2 = arith.constant 0 : index
    %c0_3 = arith.constant 0 : index
    %3 = vector.load %arg4[%c0, %c0_1, %c0_2, %c0_3] : memref<1x4x8x128xbf16, #tpu.memory_space<vmem>>, vector<1x4x8x128xbf16>
    %4 = vector.shape_cast %3 : vector<1x4x8x128xbf16> to vector<4x8x128xbf16>
    %c0_4 = arith.constant 0 : index
    %c0_5 = arith.constant 0 : index
    %c0_6 = arith.constant 0 : index
    %c0_7 = arith.constant 0 : index
    %5 = vector.load %arg5[%c0_4, %c0_5, %c0_6, %c0_7] : memref<1x4x8x128xbf16, #tpu.memory_space<vmem>>, vector<1x4x8x128xbf16>
    %6 = vector.shape_cast %5 : vector<1x4x8x128xbf16> to vector<4x8x128xbf16>
    %c0_8 = arith.constant 0 : index
    %c0_9 = arith.constant 0 : index
    %c0_10 = arith.constant 0 : index
    %c0_11 = arith.constant 0 : index
    %7 = vector.load %arg6[%c0_8, %c0_9, %c0_10, %c0_11] : memref<1x4x8x128xbf16, #tpu.memory_space<vmem>>, vector<1x4x8x128xbf16>
    %8 = vector.shape_cast %7 : vector<1x4x8x128xbf16> to vector<4x8x128xbf16>
    %cst = arith.constant dense<0.000000e+00> : vector<4x128x128xf32>
    %9 = tpu.matmul %4, %6, %cst {dimension_numbers = #tpu.dot_dimension_numbers<[1], [1], [2], [2], [0, 0, 0, 2, 1, 2], [0], [0]>} : vector<4x8x128xbf16>, vector<4x8x128xbf16>, vector<4x128x128xf32> -> vector<4x128x128xf32>
    %c0_12 = arith.constant 0 : index
    %c0_13 = arith.constant 0 : index
    %10 = vector.load %arg8[%c0_12, %c0_13] : memref<4x128xf32, #tpu.memory_space<vmem>>, vector<4x128xf32>
    %cst_14 = arith.constant dense<0xFF800000> : vector<4x128xf32>
    %11 = vector.multi_reduction <maximumf>, %9, %cst_14 [2] : vector<4x128x128xf32> to vector<4x128xf32>
    %12 = arith.maximumf %10, %11 : vector<4x128xf32>
    %13 = arith.subf %10, %12 : vector<4x128xf32>
    %14 = math.exp %13 : vector<4x128xf32>
    %15 = vector.shape_cast %12 : vector<4x128xf32> to vector<4x128x1xf32>
    %16 = vector.broadcast %15 : vector<4x128x1xf32> to vector<4x128x128xf32>
    %17 = arith.subf %9, %16 : vector<4x128x128xf32>
    %18 = math.exp %17 : vector<4x128x128xf32>
    %c0_15 = arith.constant 0 : index
    %c0_16 = arith.constant 0 : index
    %19 = vector.load %arg9[%c0_15, %c0_16] : memref<4x128xf32, #tpu.memory_space<vmem>>, vector<4x128xf32>
    %20 = arith.mulf %14, %19 : vector<4x128xf32>
    %cst_17 = arith.constant dense<0.000000e+00> : vector<4x128xf32>
    %21 = vector.multi_reduction <add>, %18, %cst_17 [2] : vector<4x128x128xf32> to vector<4x128xf32>
    %22 = arith.addf %20, %21 : vector<4x128xf32>
    %c0_18 = arith.constant 0 : index
    %c0_19 = arith.constant 0 : index
    %23 = vector.load %arg9[%c0_18, %c0_19] : memref<4x128xf32, #tpu.memory_space<vmem>>, vector<4x128xf32>
    tpu.vector_store %arg9[%c0_18, %c0_19], %22 {strides = array<i32>} : memref<4x128xf32, #tpu.memory_space<vmem>>, vector<4x128xf32>,
    %24 = arith.truncf %18 : vector<4x128x128xf32> to vector<4x128x128xbf16>
    %cst_20 = arith.constant dense<0.000000e+00> : vector<4x8x128xf32>
    %25 = tpu.matmul %8, %24, %cst_20 {dimension_numbers = #tpu.dot_dimension_numbers<[2], [2], [1], [1], [0, 0, 0, 1, 1, 1], [0], [0]>} : vector<4x8x128xbf16>, vector<4x128x128xbf16>, vector<4x8x128xf32> -> vector<4x8x128xf32>
    %26 = vector.shape_cast %14 : vector<4x128xf32> to vector<4x1x128xf32>
    %c0_21 = arith.constant 0 : index
    %c0_22 = arith.constant 0 : index
    %c0_23 = arith.constant 0 : index
    %27 = vector.load %arg10[%c0_21, %c0_22, %c0_23] : memref<4x8x128xf32, #tpu.memory_space<vmem>>, vector<4x8x128xf32>
    %28 = vector.broadcast %26 : vector<4x1x128xf32> to vector<4x8x128xf32>
    %29 = arith.mulf %28, %27 : vector<4x8x128xf32>
    %30 = arith.addf %29, %25 : vector<4x8x128xf32>
    %c0_24 = arith.constant 0 : index
    %c0_25 = arith.constant 0 : index
    %c0_26 = arith.constant 0 : index
    %31 = vector.load %arg10[%c0_24, %c0_25, %c0_26] : memref<4x8x128xf32, #tpu.memory_space<vmem>>, vector<4x8x128xf32>
    tpu.vector_store %arg10[%c0_24, %c0_25, %c0_26], %30 {strides = array<i32>} : memref<4x8x128xf32, #tpu.memory_space<vmem>>, vector<4x8x128xf32>,
    %c0_27 = arith.constant 0 : index
    %c0_28 = arith.constant 0 : index
    %32 = vector.load %arg11[%c0_27, %c0_28] : memref<4x8xf32, #tpu.memory_space<vmem>>, vector<4x8xf32>
    %33 = arith.extf %8 : vector<4x8x128xbf16> to vector<4x8x128xf32>
    %cst_29 = arith.constant dense<0.000000e+00> : vector<4x8xf32>
    %34 = vector.multi_reduction <add>, %33, %cst_29 [2] : vector<4x8x128xf32> to vector<4x8xf32>
    %35 = arith.addf %32, %34 : vector<4x8xf32>
    %c0_30 = arith.constant 0 : index
    %c0_31 = arith.constant 0 : index
    %36 = vector.load %arg11[%c0_30, %c0_31] : memref<4x8xf32, #tpu.memory_space<vmem>>, vector<4x8xf32>
    tpu.vector_store %arg11[%c0_30, %c0_31], %35 {strides = array<i32>} : memref<4x8xf32, #tpu.memory_space<vmem>>, vector<4x8xf32>,
    %c0_32 = arith.constant 0 : index
    %c0_33 = arith.constant 0 : index
    %37 = vector.load %arg8[%c0_32, %c0_33] : memref<4x128xf32, #tpu.memory_space<vmem>>, vector<4x128xf32>
    tpu.vector_store %arg8[%c0_32, %c0_33], %12 {strides = array<i32>} : memref<4x128xf32, #tpu.memory_space<vmem>>, vector<4x128xf32>,
    %c1_i32 = arith.constant 1 : i32
    %38 = arith.cmpi eq, %arg3, %c1_i32 : i32
    %39 = arith.extui %38 : i1 to i32
    %c0_i32_34 = arith.constant 0 : i32
    %40 = arith.cmpi ne, %39, %c0_i32_34 : i32
    scf.if %40 {
      %c0_35 = arith.constant 0 : index
      %c0_36 = arith.constant 0 : index
      %41 = vector.load %arg9[%c0_35, %c0_36] : memref<4x128xf32, #tpu.memory_space<vmem>>, vector<4x128xf32>
      %42 = tpu.reciprocal %41 {approx = true} : vector<4x128xf32> -> vector<4x128xf32>
      %c0_37 = arith.constant 0 : index
      %c0_38 = arith.constant 0 : index
      %c0_39 = arith.constant 0 : index
      %43 = vector.load %arg10[%c0_37, %c0_38, %c0_39] : memref<4x8x128xf32, #tpu.memory_space<vmem>>, vector<4x8x128xf32>
      %44 = vector.shape_cast %42 : vector<4x128xf32> to vector<4x1x128xf32>
      %45 = vector.broadcast %44 : vector<4x1x128xf32> to vector<4x8x128xf32>
      %46 = arith.mulf %43, %45 : vector<4x8x128xf32>
      %c0_40 = arith.constant 0 : index
      %c0_41 = arith.constant 0 : index
      %47 = vector.load %arg11[%c0_40, %c0_41] : memref<4x8xf32, #tpu.memory_space<vmem>>, vector<4x8xf32>
      %48 = vector.shape_cast %47 : vector<4x8xf32> to vector<4x8x1xf32>
      %cst_42 = arith.constant 9.99999997E-7 : f32
      %49 = vector.broadcast %cst_42 : f32 to vector<4x8x1xf32>
      %50 = arith.mulf %49, %48 : vector<4x8x1xf32>
      %51 = vector.broadcast %50 : vector<4x8x1xf32> to vector<4x8x128xf32>
      %52 = arith.addf %46, %51 : vector<4x8x128xf32>
      %53 = arith.truncf %52 : vector<4x8x128xf32> to vector<4x8x128xbf16>
      %c0_43 = arith.constant 0 : index
      %c0_44 = arith.constant 0 : index
      %c0_45 = arith.constant 0 : index
      %c0_46 = arith.constant 0 : index
      %54 = vector.load %arg7[%c0_43, %c0_44, %c0_45, %c0_46] : memref<1x4x8x128xbf16, #tpu.memory_space<vmem>>, vector<1x4x8x128xbf16>
      %55 = vector.shape_cast %54 : vector<1x4x8x128xbf16> to vector<4x8x128xbf16>
      %56 = vector.shape_cast %53 : vector<4x8x128xbf16> to vector<1x4x8x128xbf16>
      tpu.vector_store %arg7[%c0_43, %c0_44, %c0_45, %c0_46], %56 {strides = array<i32>} : memref<1x4x8x128xbf16, #tpu.memory_space<vmem>>, vector<1x4x8x128xbf16>,
    } else {
    }
    return
  }
  func.func @transform_0(%arg0: i32, %arg1: i32, %arg2: i32, %arg3: i32) -> (i32, i32, i32, i32) {
    %c0_i32 = arith.constant 0 : i32
    %c0_i32_0 = arith.constant 0 : i32
    return %arg0, %arg1, %c0_i32, %arg2 : i32, i32, i32, i32
  }
  func.func @transform_1(%arg0: i32, %arg1: i32, %arg2: i32, %arg3: i32) -> (i32, i32, i32, i32) {
    %c2_i32 = arith.constant 2 : i32
    %0 = arith.addi %c2_i32, %arg1 : i32
    %c0_i32 = arith.constant 0 : i32
    %c0_i32_0 = arith.constant 0 : i32
    return %arg0, %0, %c0_i32, %arg3 : i32, i32, i32, i32
  }
  func.func @transform_2(%arg0: i32, %arg1: i32, %arg2: i32, %arg3: i32) -> (i32, i32, i32, i32) {
    %c4_i32 = arith.constant 4 : i32
    %0 = arith.addi %c4_i32, %arg1 : i32
    %c0_i32 = arith.constant 0 : i32
    %c0_i32_0 = arith.constant 0 : i32
    return %arg0, %0, %c0_i32, %arg3 : i32, i32, i32, i32
  }
  func.func @transform_3(%arg0: i32, %arg1: i32, %arg2: i32, %arg3: i32) -> (i32, i32, i32, i32) {
    %c0_i32 = arith.constant 0 : i32
    %c0_i32_0 = arith.constant 0 : i32
    return %arg0, %arg1, %c0_i32, %arg2 : i32, i32, i32, i32
  }
}

module attributes {stable_mosaic.version = 11 : i64} {
  func.func @_pointwise_conv_bias_kernel(%arg0: i32, %arg1: i32, %arg2: memref<1x8x1024xbf16, #tpu.memory_space<vmem>>, %arg3: memref<8x8xbf16, #tpu.memory_space<vmem>>, %arg4: memref<8x1xf32, #tpu.memory_space<vmem>>, %arg5: memref<1x8x1024xf32, #tpu.memory_space<vmem>>) attributes {dimension_semantics = [#tpu.dimension_semantics<parallel>, #tpu.dimension_semantics<parallel>], iteration_bounds = array<i64: 2, 2>, scalar_prefetch = 0 : i64, scratch_operands = 0 : i64, tpu.core_type = #tpu.core_type<tc>, window_params = [{transform_indices = @transform_0, window_bounds = array<i64: 1, 8, 1024>}, {pipeline_mode = #tpu.pipeline_mode<synchronous>, transform_indices = @transform_1, window_bounds = array<i64: 8, 8>}, {pipeline_mode = #tpu.pipeline_mode<synchronous>, transform_indices = @transform_2, window_bounds = array<i64: 8, 1>}, {transform_indices = @transform_3, window_bounds = array<i64: 1, 8, 1024>}]} {
    %c0 = arith.constant 0 : index
    %c0_0 = arith.constant 0 : index
    %0 = vector.load %arg3[%c0, %c0_0] : memref<8x8xbf16, #tpu.memory_space<vmem>>, vector<8x8xbf16>
    %c0_1 = arith.constant 0 : index
    %c0_2 = arith.constant 0 : index
    %c0_3 = arith.constant 0 : index
    %1 = vector.load %arg2[%c0_1, %c0_2, %c0_3] : memref<1x8x1024xbf16, #tpu.memory_space<vmem>>, vector<1x8x1024xbf16>
    %2 = vector.shape_cast %1 : vector<1x8x1024xbf16> to vector<8x1024xbf16>
    %cst = arith.constant dense<0.000000e+00> : vector<8x1024xf32>
    %3 = tpu.matmul %0, %2, %cst {dimension_numbers = #tpu.dot_dimension_numbers<[1], [0], [0], [1], [0, 0, 1, 1], [], []>} : vector<8x8xbf16>, vector<8x1024xbf16>, vector<8x1024xf32> -> vector<8x1024xf32>
    %c0_4 = arith.constant 0 : index
    %c0_5 = arith.constant 0 : index
    %4 = vector.load %arg4[%c0_4, %c0_5] : memref<8x1xf32, #tpu.memory_space<vmem>>, vector<8x1xf32>
    %5 = vector.broadcast %4 : vector<8x1xf32> to vector<8x1024xf32>
    %6 = arith.addf %3, %5 : vector<8x1024xf32>
    %c0_6 = arith.constant 0 : index
    %c0_7 = arith.constant 0 : index
    %c0_8 = arith.constant 0 : index
    %7 = vector.load %arg5[%c0_6, %c0_7, %c0_8] : memref<1x8x1024xf32, #tpu.memory_space<vmem>>, vector<1x8x1024xf32>
    %8 = vector.shape_cast %7 : vector<1x8x1024xf32> to vector<8x1024xf32>
    %9 = vector.shape_cast %6 : vector<8x1024xf32> to vector<1x8x1024xf32>
    tpu.vector_store %arg5[%c0_6, %c0_7, %c0_8], %9 {strides = array<i32>} : memref<1x8x1024xf32, #tpu.memory_space<vmem>>, vector<1x8x1024xf32>,
    return
  }
  func.func @transform_0(%arg0: i32, %arg1: i32) -> (i32, i32, i32) {
    %c0_i32 = arith.constant 0 : i32
    %c0_i32_0 = arith.constant 0 : i32
    return %arg0, %c0_i32, %arg1 : i32, i32, i32
  }
  func.func @transform_1(%arg0: i32, %arg1: i32) -> (i32, i32) {
    %c0_i32 = arith.constant 0 : i32
    %c0_i32_0 = arith.constant 0 : i32
    %c0_i32_1 = arith.constant 0 : i32
    return %c0_i32, %c0_i32_0 : i32, i32
  }
  func.func @transform_2(%arg0: i32, %arg1: i32) -> (i32, i32) {
    %c0_i32 = arith.constant 0 : i32
    %c0_i32_0 = arith.constant 0 : i32
    %c0_i32_1 = arith.constant 0 : i32
    return %c0_i32, %c0_i32_0 : i32, i32
  }
  func.func @transform_3(%arg0: i32, %arg1: i32) -> (i32, i32, i32) {
    %c0_i32 = arith.constant 0 : i32
    %c0_i32_0 = arith.constant 0 : i32
    return %arg0, %c0_i32, %arg1 : i32, i32, i32
  }
}

</mosaic_0001>

<bundles_post_ra>
// kernel: single_axial_attention.3
= control target key start
LH: loop header
LB: loop body
LE: loop exit
PB: predicated region body
PF: predicated region fallthrough
CT: control target
= control target key end

     0   :  { %s709_s9 = smov 0   ;;  %s711_s10 = smov 0   ;;  %s863_s0 = inlined_call_operand.vmem [shape: f32[2,8,2048], index: 0, kind: input, shape index: {}]   ;;  %s864_s1 = inlined_call_operand.vmem [shape: f32[24,8], index: 1, kind: input, shape index: {}]   ;;  %s865_s2 = inlined_call_operand.vmem [shape: bf16[2,24,2048], index: 2, kind: output, shape index: {}]  }
   0x1   :  { %s713_s11 = smov 0   ;;  %s715_s12 = smov 0  }
   0x2   :  { %s717_s13 = smov 0   ;;  %s719_s14 = smov 0  }
   0x3   :  { %s721_s15 = smov 0  }
   0x4 LB: > { %s21_s16 = sadd.s32 1, %s684_s13  ;;  %s24_s17 = sadd.s32 1, %s688_s14  ;;  %s692_s15 = sphi %s721_s15, %s12_s15   ;;  %s688_s14 = sphi %s719_s14, %s872_s14   ;;  %s684_s13 = sphi %s717_s13, %s871_s13   ;;  %s680_s12 = sphi %s715_s12, %s870_s12   ;;  %s676_s11 = sphi %s713_s11, %s869_s11   ;;  %s672_s10 = sphi %s711_s10, %s868_s10   ;;  %s668_s9 = sphi %s709_s9, %s867_s9  }
   0x5   : > { %p22_p0 = scmp.ge.s32.totalorder %s21_s16, 2  ;;  %s544_s18 = sadd.s32 4294967295, %s692_s15  }
   0x6   : > { %p92_p1 = scmp.ne.s32.totalorder %s672_s10, %s668_s9  ;;  %p93_p2 = scmp.eq.s32.totalorder %s544_s18, 3 }
   0x7   : > { %s874_s16 = smov (%p22_p0, %s21_s16), 0  ;;  %s876_s17 = smov (!%p22_p0, %s24_s17), %s688_s14 }
   0x8   : > { %s78_s19 = ssub.s32 %s684_s13, %s874_s16  ;;  %p26_p3 = scmp.ge.s32.totalorder %s876_s17, 2 }
   0x9   : > { %p548_p4 = scmp.ge.s32.totalorder %s692_s15, 1  ;;  %p753_p5 = por %p93_p2, %p92_p1 }
   0xa   : > { %p133_p6 = scmp.lt.s32.totalorder %s692_s15, 5  ;;  %s878_s17 = smov (%p26_p3, %s876_s17), 0 }
   0xb   : > { %s77_s21 = ssub.s32 %s688_s14, %s878_s17  ;;  %s82_s23 = sadd.s32 1, %s672_s10 }
   0xc   : > { %p134_p7 = pnand %p548_p4, %p133_p6  ;;  %s79_s22 = sor.u32 %s78_s19, %s77_s21 }
   0xd   : > { %p80_p8 = scmp.eq.s32.totalorder %s79_s22, 0  ;;  %s766_s25 = sshll.u32 (!%p134_p7), %s676_s11, 3 }
   0xe   : > { %137 = sbr.rel (%p134_p7) target bundleno = 210 (0xd2), region = 28  ;;  %p159_p9 = scmp.lt.s32.totalorder (!%p134_p7), %s680_s12, 1 }
   0xf   : > { %s764_s24 = scalar_select %p80_p8, %s672_s10, %s82_s23  }
  0x10   : > { %p161_p10 = scmp.lt.s32.totalorder (!%p134_p7), %s766_s25, 15  ;;  %s155_s21 = sand.u32 (!%p134_p7), 1, %s668_s9  }
  0x11   : > { %s580_s22 = smul.u32 (!%p134_p7), 96, %s155_s21 }
  0x13   : > { %s160_s26 = scalar_select %p159_p9, %s680_s12, 1  ;;  %v169_v0 = vld [vmem:[%s864_s1] sm:$0xff]  ;;  %vm180_vm0 = vcmask 64512   ;;  %v170_v9 = vld [vmem:[%s864_s1 + $0x8] sm:$0xff]  ;;  %v171_v10 = vld [vmem:[%s864_s1 + $0x10] sm:$0xff] }
  0x14   : > { %s162_s27 = scalar_select %p161_p10, %s766_s25, 15 }
  0x15   : > { %s550_s28 = sshll.u32 %s160_s26, 4  ;;  %s809_s23 = scalar_lea.vmem [#allocation2], %s580_s22 }
  0x16   : > { %s164_s29 = sadd.s32 %s550_s28, %s162_s27  ;;  %s581_s9 = smul.u32 (%p753_p5), 48, %s680_s12 }
  0x17   : > { %s551_s30 = sshll.u32 %s164_s29, 3 }
  0x18   : > { %s166_s5 = scalar_lea.vmem %s863_s0, %s551_s30  ;;  %s431_s26 = sadd.s32 (%p753_p5), %s581_s9, %s766_s25 }
  0x19   : > { %v174_v1 = vld [vmem:[%s166_s5 + $0x10] sm:$0xff]  ;;  %v175_v2 = vld [vmem:[%s166_s5 + $0x18] sm:$0xff]  ;;  %v172_v5 = vld [vmem:[%s166_s5] sm:$0xff]  ;;  %s577_s27 = sshll.u32 (%p753_p5), %s431_s26, 2 }
  0x1a   : > { %v178_v3 = vld [vmem:[%s166_s5 + $0x30] sm:$0xff]  ;;  %257 = vmatpush.msra.mxu2 %v174_v1  ;;  %283 = vmatpush.msra.mxu3 %v175_v2  ;;  %v179_v4 = vld [vmem:[%s166_s5 + $0x38] sm:$0xff]  ;;  %v173_v6 = vld [vmem:[%s166_s5 + $0x8] sm:$0xff]  ;;  %s433_s20 = scalar_lea.vmem (%p753_p5), %s865_s2, %s577_s27 }
  0x1b   : > { %558 = vmatmul.msk.f32.vlgmr.msra.gmra.mxu2 %vm180_vm0, %v169_v0  ;;  %561 = vmatmul.msk.f32.vlgmr.msra.gmra.mxu3 %vm180_vm0, %v169_v0  ;;  %v176_v7 = vld [vmem:[%s166_s5 + $0x20] sm:$0xff]  ;;  %v177_v8 = vld [vmem:[%s166_s5 + $0x28] sm:$0xff] }
  0x1c   : > { %361 = vmatpush.msrb.mxu2 %v178_v3  ;;  %387 = vmatpush.msrb.mxu3 %v179_v4 }
  0x1d   : > { %205 = vmatpush.msra.mxu0 %v172_v5  ;;  %231 = vmatpush.msra.mxu1 %v173_v6 }
  0x1e   : > { %552 = vmatmul.msk.f32.vlgmr.msra.gmra.mxu0 %vm180_vm0, %v169_v0  ;;  %555 = vmatmul.msk.f32.vlgmr.msra.gmra.mxu1 %vm180_vm0, %v169_v0 }
  0x1f   : > { %309 = vmatpush.msrb.mxu0 %v176_v7  ;;  %335 = vmatpush.msrb.mxu1 %v177_v8 }
  0x23   : > { %559 = vmatmul.msk.f32.gmra.mxu2 %vm180_vm0, %v170_v9  ;;  %562 = vmatmul.msk.f32.gmra.mxu3 %vm180_vm0, %v170_v9 }
  0x26   : > { %553 = vmatmul.msk.f32.gmra.mxu0 %vm180_vm0, %v170_v9  ;;  %556 = vmatmul.msk.f32.gmra.mxu1 %vm180_vm0, %v170_v9 }
  0x2b   : > { %560 = vmatmul.msk.f32.gmra.mxu2 %vm180_vm0, %v171_v10  ;;  %563 = vmatmul.msk.f32.gmra.mxu3 %vm180_vm0, %v171_v10 }
  0x2e   : > { %554 = vmatmul.msk.f32.gmra.mxu0 %vm180_vm0, %v171_v10  ;;  %557 = vmatmul.msk.f32.gmra.mxu1 %vm180_vm0, %v171_v10 }
  0x33   : > { %570 = vmatmul.msk.f32.vlgmr.msrb.gmra.mxu2 %vm180_vm0, %v169_v0  ;;  %573 = vmatmul.msk.f32.vlgmr.msrb.gmra.mxu3 %vm180_vm0, %v169_v0 }
  0x36   : > { %564 = vmatmul.msk.f32.vlgmr.msrb.gmra.mxu0 %vm180_vm0, %v169_v0  ;;  %567 = vmatmul.msk.f32.vlgmr.msrb.gmra.mxu1 %vm180_vm0, %v169_v0 }
  0x3b   : > { %571 = vmatmul.msk.f32.gmra.mxu2 %vm180_vm0, %v170_v9  ;;  %574 = vmatmul.msk.f32.gmra.mxu3 %vm180_vm0, %v170_v9 }
  0x3e   : > { %565 = vmatmul.msk.f32.gmra.mxu0 %vm180_vm0, %v170_v9  ;;  %568 = vmatmul.msk.f32.gmra.mxu1 %vm180_vm0, %v170_v9 }
  0x43   : > { %572 = vmatmul.msk.f32.gmra.mxu2 %vm180_vm0, %v171_v10  ;;  %575 = vmatmul.msk.f32.gmra.mxu3 %vm180_vm0, %v171_v10 }
  0x46   : > { %566 = vmatmul.msk.f32.gmra.mxu0 %vm180_vm0, %v171_v10  ;;  %569 = vmatmul.msk.f32.gmra.mxu1 %vm180_vm0, %v171_v10 }
  0x9b   : > { %v207_v11 = vpop.f32.mrf.mxu0  ;;  %v233_v12 = vpop.f32.mrf.mxu1 }
  0x9c   : > { %v398_v13 = vpack.c.bf16 %v233_v12, %v207_v11 }
  0x9e   : > { %410 = vst [vmem:[%s809_s23] sm:$0xff] %v398_v13  ;;  %v259_v14 = vpop.f32.mrf.mxu2  ;;  %v285_v15 = vpop.f32.mrf.mxu3 }
  0x9f   : > { %v399_v16 = vpack.c.bf16 %v285_v15, %v259_v14 }
  0xa1   : > { %411 = vst [vmem:[%s809_s23 + $0x8] sm:$0xff] %v399_v16 }
  0xa3   : > { %v210_v17 = vpop.f32.mrf.mxu0  ;;  %v236_v18 = vpop.f32.mrf.mxu1 }
  0xa4   : > { %v402_v19 = vpack.c.bf16 %v236_v18, %v210_v17 }
  0xa5   : > { %v446_v47 = vld [vmem:[%s809_s23] sm:$0xff] (%p753_p5) }
  0xa6   : > { %414 = vst [vmem:[%s809_s23 + $0x20] sm:$0xff] %v402_v19  ;;  %v262_v20 = vpop.f32.mrf.mxu2  ;;  %v288_v21 = vpop.f32.mrf.mxu3 }
  0xa7   : > { %v403_v22 = vpack.c.bf16 %v288_v21, %v262_v20  ;;  %447 = vst [vmem:[%s433_s20] sm:$0xff] (%p753_p5), %v446_v47 }
  0xa8   : > { %v448_v48 = vld [vmem:[%s809_s23 + $0x8] sm:$0xff] (%p753_p5) }
  0xa9   : > { %415 = vst [vmem:[%s809_s23 + $0x28] sm:$0xff] %v403_v22 }
  0xaa   : > { %449 = vst [vmem:[%s433_s20 + $0x8] sm:$0xff] (%p753_p5), %v448_v48 }
  0xab   : > { %v213_v23 = vpop.f32.mrf.mxu0  ;;  %v239_v24 = vpop.f32.mrf.mxu1 }
  0xac   : > { %v406_v25 = vpack.c.bf16 %v239_v24, %v213_v23 }
  0xad   : > { %v454_v51 = vld [vmem:[%s809_s23 + $0x20] sm:$0xff] (%p753_p5) }
  0xae   : > { %418 = vst [vmem:[%s809_s23 + $0x40] sm:$0xff] %v406_v25  ;;  %v265_v26 = vpop.f32.mrf.mxu2  ;;  %v291_v27 = vpop.f32.mrf.mxu3 }
  0xaf   : > { %v407_v28 = vpack.c.bf16 %v291_v27, %v265_v26  ;;  %455 = vst [vmem:[%s433_s20 + $0x40] sm:$0xff] (%p753_p5), %v454_v51 }
  0xb0   : > { %v456_v52 = vld [vmem:[%s809_s23 + $0x28] sm:$0xff] (%p753_p5) }
  0xb1   : > { %419 = vst [vmem:[%s809_s23 + $0x48] sm:$0xff] %v407_v28 }
  0xb2   : > { %457 = vst [vmem:[%s433_s20 + $0x48] sm:$0xff] (%p753_p5), %v456_v52 }
  0xb3   : > { %v311_v29 = vpop.f32.mrf.mxu0  ;;  %v337_v30 = vpop.f32.mrf.mxu1 }
  0xb4   : > { %v400_v31 = vpack.c.bf16 %v337_v30, %v311_v29 }
  0xb5   : > { %v462_v55 = vld [vmem:[%s809_s23 + $0x40] sm:$0xff] (%p753_p5) }
  0xb6   : > { %412 = vst [vmem:[%s809_s23 + $0x10] sm:$0xff] %v400_v31  ;;  %v363_v32 = vpop.f32.mrf.mxu2  ;;  %v389_v33 = vpop.f32.mrf.mxu3 }
  0xb7   : > { %v401_v34 = vpack.c.bf16 %v389_v33, %v363_v32  ;;  %463 = vst [vmem:[%s433_s20 + $0x80] sm:$0xff] (%p753_p5), %v462_v55 }
  0xb8   : > { %v464_v56 = vld [vmem:[%s809_s23 + $0x48] sm:$0xff] (%p753_p5) }
  0xb9   : > { %413 = vst [vmem:[%s809_s23 + $0x18] sm:$0xff] %v401_v34 }
  0xba   : > { %465 = vst [vmem:[%s433_s20 + $0x88] sm:$0xff] (%p753_p5), %v464_v56 }
  0xbb   : > { %v314_v35 = vpop.f32.mrf.mxu0  ;;  %v340_v36 = vpop.f32.mrf.mxu1 }
  0xbc   : > { %v404_v37 = vpack.c.bf16 %v340_v36, %v314_v35 }
  0xbd   : > { %v450_v49 = vld [vmem:[%s809_s23 + $0x10] sm:$0xff] (%p753_p5) }
  0xbe   : > { %416 = vst [vmem:[%s809_s23 + $0x30] sm:$0xff] %v404_v37  ;;  %v366_v38 = vpop.f32.mrf.mxu2  ;;  %v392_v39 = vpop.f32.mrf.mxu3 }
  0xbf   : > { %v405_v40 = vpack.c.bf16 %v392_v39, %v366_v38  ;;  %451 = vst [vmem:[%s433_s20 + $0x10] sm:$0xff] (%p753_p5), %v450_v49 }
  0xc0   : > { %v452_v50 = vld [vmem:[%s809_s23 + $0x18] sm:$0xff] (%p753_p5) }
  0xc1   : > { %417 = vst [vmem:[%s809_s23 + $0x38] sm:$0xff] %v405_v40 }
  0xc2   : > { %453 = vst [vmem:[%s433_s20 + $0x18] sm:$0xff] (%p753_p5), %v452_v50 }
  0xc3   : > { %v317_v41 = vpop.f32.mrf.mxu0  ;;  %v343_v42 = vpop.f32.mrf.mxu1 }
  0xc4   : > { %v408_v43 = vpack.c.bf16 %v343_v42, %v317_v41 }
  0xc5   : > { %428 = sbr.rel (!%p753_p5) target bundleno = 210 (0xd2), region = 32  ;;  %v458_v53 = vld [vmem:[%s809_s23 + $0x30] sm:$0xff] (%p753_p5) }
  0xc6   : > { %420 = vst [vmem:[%s809_s23 + $0x50] sm:$0xff] %v408_v43  ;;  %v369_v44 = vpop.f32.mrf.mxu2  ;;  %v395_v45 = vpop.f32.mrf.mxu3 }
  0xc7   : > { %v409_v46 = vpack.c.bf16 %v395_v45, %v369_v44  ;;  %459 = vst [vmem:[%s433_s20 + $0x50] sm:$0xff] (%p753_p5), %v458_v53 }
  0xc8   : > { %v460_v54 = vld [vmem:[%s809_s23 + $0x38] sm:$0xff] (%p753_p5) }
  0xc9   : > { %421 = vst [vmem:[%s809_s23 + $0x58] sm:$0xff] %v409_v46 }
  0xca   : > { %461 = vst [vmem:[%s433_s20 + $0x58] sm:$0xff] %v460_v54 }
  0xcd   : > { %v466_v57 = vld [vmem:[%s809_s23 + $0x50] sm:$0xff] }
  0xce   : > { %467 = vst [vmem:[%s433_s20 + $0x90] sm:$0xff] %v466_v57 }
  0xd0   : > { %v468_v58 = vld [vmem:[%s809_s23 + $0x58] sm:$0xff] }
  0xd1   : > { %469 = vst [vmem:[%s433_s20 + $0x98] sm:$0xff] %v468_v58 }
  0xd2 PF: > { %s12_s15 = sadd.s32 1, %s692_s15   ;;  %s867_s9 = smov %s672_s10 }
  0xd3   : > { %p9_p11 = scmp.ge.s32.totalorder %s12_s15, 6   ;;  %s868_s10 = smov %s764_s24 }
  0xd4   : > { %s869_s11 = smov %s684_s13  ;;  %s870_s12 = smov %s688_s14 }
  0xd5   : > { %s871_s13 = smov %s874_s16  ;;  %s872_s14 = smov %s878_s17 }
  0xd6   :  { %11 = sbr.rel (!%p9_p11) target bundleno = 4 (0x4), region = 81 }

// kernel: single_axial_attention.4
= control target key start
LH: loop header
LB: loop body
LE: loop exit
PB: predicated region body
PF: predicated region fallthrough
CT: control target
= control target key end

     0   :  { %s4954_s0 = inlined_call_operand.vmem [shape: bf16[2,24,8,256], index: 0, kind: input, shape index: {}, may-alias: {0,1,2}]   ;;  %s4955_s1 = inlined_call_operand.vmem [shape: bf16[2,24,8,256], index: 1, kind: input, shape index: {}, may-alias: {0,1,2}]   ;;  %s4956_s2 = inlined_call_operand.vmem [shape: bf16[2,24,8,256], index: 2, kind: input, shape index: {}, may-alias: {0,1,2}]   ;;  %s4957_s3 = inlined_call_operand.vmem [shape: bf16[2,8,8,256], index: 3, kind: output, shape index: {}]  }
   0x1   :  { %5053 = sst [smem:[#allocation97_spill]] %s4955_s1 }
   0x2   :  { %5054 = sst [smem:[#allocation98_spill]] %s4956_s2 }
   0x3   :  { %5055 = sst [smem:[#allocation99_spill]] %s4957_s3 }
   0x4   :  { %s3315_s12 = smov 0   ;;  %s3317_s13 = smov 0  }
   0x5   :  { %s3319_s14 = smov 0   ;;  %s3321_s15 = smov 0  }
   0x6   :  { %s3323_s16 = smov 0   ;;  %s3325_s17 = smov 0  }
   0x7   :  { %s3327_s18 = smov 0   ;;  %s3329_s19 = smov 0  }
   0x8   :  { %s3331_s20 = smov 0   ;;  %s3333_s21 = smov 0  }
   0x9   :  { %s3335_s22 = smov 0   ;;  %s3337_s23 = smov 0  }
   0xa   :  { %s3339_s24 = smov 0   ;;  %s3341_s25 = smov 0  }
   0xb   :  { %s3343_s26 = smov 0  }
   0xc LB: > { %5056 = sst [smem:[#allocation10_spill]] %s3243_s14  ;;  %s28_s28 = sadd.s32 1, %s3275_s22  ;;  %s3291_s26 = sphi %s3343_s26, %s13_s26   ;;  %s3287_s25 = sphi %s3341_s25, %s5269_s25   ;;  %s3283_s24 = sphi %s3339_s24, %s5268_s24   ;;  %s3279_s23 = sphi %s3337_s23, %s5267_s23   ;;  %s3275_s22 = sphi %s3335_s22, %s5254_s22   ;;  %s3271_s21 = sphi %s3333_s21, %s5266_s21   ;;  %s3267_s20 = sphi %s3331_s20, %s5265_s20   ;;  %s3263_s19 = sphi %s3329_s19, %s5264_s19   ;;  %s3259_s18 = sphi %s3327_s18, %s5253_s18   ;;  %s3255_s17 = sphi %s3325_s17, %s5263_s17   ;;  %s3251_s16 = sphi %s3323_s16, %s5262_s16   ;;  %s3247_s15 = sphi %s3321_s15, %s5261_s15   ;;  %s3243_s14 = sphi %s3319_s14, %s5260_s14   ;;  %s3239_s13 = sphi %s3317_s13, %s5259_s13   ;;  %s3235_s12 = sphi %s3315_s12, %s5258_s12  }
   0xd   : > { %5057 = sst [smem:[#allocation11_spill]] %s3259_s18  ;;  %p29_p0 = scmp.ge.s32.totalorder %s28_s28, 2 }
   0xe   : > { %5058 = sst [smem:[#allocation12_spill]] %s3263_s19  ;;  %s31_s29 = sadd.s32 1, %s3279_s23 }
   0xf   : > { %5059 = sst [smem:[#allocation13_spill]] %s3267_s20  ;;  %s35_s30 = sadd.s32 1, %s3283_s24 }
  0x10   : > { %5060 = sst [smem:[#allocation14_spill]] %s3271_s21  ;;  %s39_s4 = sadd.s32 1, %s3287_s25 }
  0x11   : > { %5061 = sst [smem:[#allocation15_spill]] %s3275_s22  ;;  %s5271_s28 = smov (%p29_p0, %s28_s28), 0 }
  0x12   : > { %5062 = sst [smem:[#allocation16_spill]] %s5271_s28  ;;  %s5273_s29 = smov (!%p29_p0, %s31_s29), %s3279_s23 }
  0x13   : > { %p57_p1 = scmp.ne.s32.totalorder %s3255_s17, %s3251_s16  ;;  %p33_p2 = scmp.ge.s32.totalorder %s5273_s29, 2 }
  0x14   : > { %p58_p3 = scmp.eq.s32.totalorder %s3291_s26, 0  ;;  %s73_s6 = sadd.s32 2, %s3283_s24 }
  0x15   : > { %s3405_s7 = ssub.s32 %s3275_s22, %s5271_s28  ;;  %s5275_s29 = smov (%p33_p2, %s5273_s29), 0 }
  0x16   : > { %5063 = sst [smem:[#allocation17_spill]] %s5275_s29  ;;  %s5277_s30 = smov (!%p33_p2, %s35_s30), %s3283_s24 }
  0x17   : > { %s46_s8 = ssub.s32 %s3279_s23, %s5275_s29  ;;  %p3417_p4 = por %p58_p3, %p57_p1 }
  0x18   : > { %p37_p5 = scmp.ge.s32.totalorder %s5277_s30, 2  ;;  %s82_s10 = sadd.s32 1, %s3247_s15 }
  0x19   : > { %p89_p6 = scmp.ne.s32.totalorder %s3247_s15, %s3243_s14  ;;  %s105_s11 = sadd.s32 4, %s3283_s24 }
  0x1a   : > { %s5279_s30 = smov (%p37_p5, %s5277_s30), 0  ;;  %s5281_s4 = smov (!%p37_p5, %s39_s4), %s3287_s25 }
  0x1b   : > { %5065 = sst [smem:[#allocation18_spill]] %s5279_s30  ;;  %s44_s27 = ssub.s32 %s3283_s24, %s5279_s30 }
  0x1c   : > { %s74_s5 = sadd.s32 2, %s5279_s30  ;;  %p41_p7 = scmp.ge.s32.totalorder %s5281_s4, 2 }
  0x1d   : > { %s76_s29 = ssub.s32 %s73_s6, %s74_s5  ;;  %p3433_p8 = por %p89_p6, %p58_p3 }
  0x1e   : > { %s106_s3 = sadd.s32 4, %s5279_s30  ;;  %s5283_s4 = smov (%p41_p7, %s5281_s4), 0 }
  0x1f   : > { %5067 = sst [smem:[#allocation19_spill]] %s5283_s4  ;;  %s108_s19 = ssub.s32 %s105_s11, %s106_s3 }
  0x20   : > { %s114_s21 = sadd.s32 1, %s3239_s13  ;;  %s43_s20 = ssub.s32 %s3287_s25, %s5283_s4 }
  0x21   : > { %p121_p9 = scmp.ne.s32.totalorder %s3239_s13, %s3235_s12  ;;  %s45_s5 = sor.u32 %s44_s27, %s43_s20 }
  0x22   : > { %s77_s6 = sor.u32 %s76_s29, %s43_s20  ;;  %s47_s18 = sor.u32 %s46_s8, %s45_s5 }
  0x23   : > { %s79_s14 = sor.u32 %s3405_s7, %s77_s6  ;;  %p48_p10 = scmp.eq.s32.totalorder %s47_s18, 0 }
  0x24   : > { %p80_p11 = scmp.eq.s32.totalorder %s79_s14, 0  ;;  %s109_s2 = sor.u32 %s108_s19, %s43_s20 }
  0x25   : > { %p3448_p12 = por %p121_p9, %p58_p3  ;;  %s5069_s1 = sadd.s32 1, %s3255_s17 }
  0x26   : > { %s3455_s3 = scalar_select %p48_p10, %s3255_s17, %s5069_s1  }
  0x27   : > { %s3458_s11 = scalar_select %p80_p11, %s3247_s15, %s82_s10  }
  0x28   : > { %s111_s4 = sor.u32 %s109_s2, %s3405_s7  ;;  %s5070_s22 = sadd.s32 4294967295, %s3291_s26  }
  0x29   : > { %p155_p13 = scmp.eq.s32.totalorder %s5070_s22, 15  ;;  %p112_p0 = scmp.eq.s32.totalorder %s111_s4, 0 }
  0x2a   : > { %p2738_p3 = scmp.ge.s32.totalorder %s3291_s26, 16 }
  0x2b   : > { %p3466_p2 = por %p155_p13, %p57_p1 }
  0x2c   : > { %s3471_s14 = scalar_select %p112_p0, %s3239_s13, %s114_s21  }
  0x2d   : > { %177 = sbr.rel (%p2738_p3) target bundleno = 92 (0x5c), region = 16 }
  0x32   : > { %180 = sbr.rel (!%p3417_p4) target bundleno = 62 (0x3e), region = 20  ;;  %s182_s1 = sand.u32 (%p3417_p4), 1, %s3255_s17  }
  0x33   : > { %s2803_s2 = sshll.u32 (%p3417_p4), %s3283_s24, 3  ;;  %s2739_s19 = sshll.u32 (%p3417_p4), %s182_s1, 4 }
  0x34   : > { %s187_s18 = sadd.s32 (%p3417_p4), %s3279_s23, %s2803_s2  ;;  %s2816_s20 = smul.u32 (%p3417_p4), 48, %s3287_s25 }
  0x35   : > { %s184_s8 = scalar_lea.vmem (%p3417_p4), [#allocation6], %s2739_s19 }
  0x36   : > { %s189_s22 = sadd.s32 (%p3417_p4), %s2816_s20, %s187_s18 }
  0x37   : > { %s2742_s29 = sshll.u32 %s189_s22, 2 }
  0x38   : > { %s191_s7 = scalar_lea.vmem %s4954_s0, %s2742_s29 }
  0x39   : > { %v208_v0 = vld [vmem:[%s191_s7] sm:$0xf]  ;;  %v210_v1 = vld [vmem:[%s191_s7 + $0x8] sm:$0xf]  ;;  %v212_v2 = vld [vmem:[%s191_s7 + $0x10] sm:$0xf] }
  0x3a   : > { %209 = vst [vmem:[%s184_s8] sm:$0xf] %v208_v0  ;;  %v214_v3 = vld [vmem:[%s191_s7 + $0x18] sm:$0xf] }
  0x3b   : > { %211 = vst [vmem:[%s184_s8 + $0x4] sm:$0xf] %v210_v1 }
  0x3c   : > { %213 = vst [vmem:[%s184_s8 + $0x8] sm:$0xf] %v212_v2 }
  0x3d   : > { %215 = vst [vmem:[%s184_s8 + $0xc] sm:$0xf] %v214_v3 }
  0x3e PF: > { %247 = sbr.rel (!%p3433_p8) target bundleno = 77 (0x4d), region = 61  ;;  %s5072_s9 = sld [smem:[#allocation15_spill]] (%p3433_p8) }
  0x3f   : > { %s249_s10 = sand.u32 (%p3433_p8), 1, %s3247_s15   ;;  %s2744_s5 = sshll.u32 (%p3433_p8), %s3283_s24, 3 }
  0x40   : > { %s2743_s1 = sshll.u32 (%p3433_p8), %s249_s10, 4  ;;  %s2625_s2 = smul.u32 (%p3433_p8), 48, %s3287_s25 }
  0x41   : > { %s5073_s29 = sld [smem:[#allocation97_spill]] (%p3433_p8)  ;;  %s251_s28 = scalar_lea.vmem (%p3433_p8), [#allocation7], %s2743_s1 }
  0x44   : > { %s2624_s6 = sadd.s32 %s5072_s9, %s2744_s5 }
  0x45   : > { %s2626_s18 = sadd.s32 %s2625_s2, %s2624_s6 }
  0x46   : > { %s2745_s19 = sshll.u32 %s2626_s18, 2 }
  0x47   : > { %s2628_s4 = scalar_lea.vmem %s5073_s29, %s2745_s19 }
  0x48   : > { %v2746_v4 = vld [vmem:[%s2628_s4 + $0x40] sm:$0xf]  ;;  %v2747_v5 = vld [vmem:[%s2628_s4 + $0x48] sm:$0xf]  ;;  %v2748_v6 = vld [vmem:[%s2628_s4 + $0x50] sm:$0xf] }
  0x49   : > { %277 = vst [vmem:[%s251_s28] sm:$0xf] %v2746_v4  ;;  %v2749_v7 = vld [vmem:[%s2628_s4 + $0x58] sm:$0xf] }
  0x4a   : > { %279 = vst [vmem:[%s251_s28 + $0x4] sm:$0xf] %v2747_v5 }
  0x4b   : > { %281 = vst [vmem:[%s251_s28 + $0x8] sm:$0xf] %v2748_v6 }
  0x4c   : > { %283 = vst [vmem:[%s251_s28 + $0xc] sm:$0xf] %v2749_v7 }
  0x4d PF: > { %315 = sbr.rel (!%p3448_p12) target bundleno = 92 (0x5c), region = 102  ;;  %s5074_s21 = sld [smem:[#allocation15_spill]] (%p3448_p12) }
  0x4e   : > { %s317_s7 = sand.u32 (%p3448_p12), 1, %s3239_s13   ;;  %s2751_s8 = sshll.u32 (%p3448_p12), %s3283_s24, 3 }
  0x4f   : > { %s2750_s10 = sshll.u32 (%p3448_p12), %s317_s7, 4  ;;  %s2634_s5 = smul.u32 (%p3448_p12), 48, %s3287_s25 }
  0x50   : > { %s5075_s19 = sld [smem:[#allocation98_spill]] (%p3448_p12)  ;;  %s319_s30 = scalar_lea.vmem (%p3448_p12), [#allocation8], %s2750_s10 }
  0x53   : > { %s2633_s9 = sadd.s32 %s5074_s21, %s2751_s8 }
  0x54   : > { %s2635_s6 = sadd.s32 %s2634_s5, %s2633_s9 }
  0x55   : > { %s2752_s1 = sshll.u32 %s2635_s6, 2 }
  0x56   : > { %s2637_s20 = scalar_lea.vmem %s5075_s19, %s2752_s1 }
  0x57   : > { %v2753_v8 = vld [vmem:[%s2637_s20 + $0x80] sm:$0xf]  ;;  %v2754_v9 = vld [vmem:[%s2637_s20 + $0x88] sm:$0xf]  ;;  %v2755_v10 = vld [vmem:[%s2637_s20 + $0x90] sm:$0xf] }
  0x58   : > { %345 = vst [vmem:[%s319_s30] sm:$0xf] %v2753_v8  ;;  %v2756_v11 = vld [vmem:[%s2637_s20 + $0x98] sm:$0xf] }
  0x59   : > { %347 = vst [vmem:[%s319_s30 + $0x4] sm:$0xf] %v2754_v9 }
  0x5a   : > { %349 = vst [vmem:[%s319_s30 + $0x8] sm:$0xf] %v2755_v10 }
  0x5b   : > { %351 = vst [vmem:[%s319_s30 + $0xc] sm:$0xf] %v2756_v11 }
  0x5c PF: > { %p2757_p1 = scmp.ge.s32.totalorder %s3291_s26, 1  ;;  %p382_p4 = scmp.lt.s32.totalorder %s3291_s26, 17 }
  0x5e   : > { %p383_p5 = pnand %p2757_p1, %p382_p4 }
  0x60   : > { %386 = sbr.rel (%p383_p5) target bundleno = 1871 (0x74f), region = 143 }
  0x65   : > { %s5076_s22 = sld [smem:[#allocation10_spill]]  ;;  %s389_s29 = sand.u32 1, %s3251_s16  }
  0x66   : > { %s2758_s28 = sshll.u32 %s389_s29, 4  ;;  %s403_s7 = sand.u32 1, %s3235_s12  }
  0x67   : > { %s2760_s8 = sshll.u32 %s403_s7, 4  ;;  %s391_s9 = scalar_lea.vmem [#allocation6], %s2758_s28 }
  0x68   : > { %s3508_s5 = scalar_lea.vmem [#allocation8], %s2760_s8  ;;  %s3510_s6 = scalar_lea.vmem [#allocation9], %s2758_s28 }
  0x69   : > { %s5077_s1 = sld [smem:[#allocation11_spill]] }
  0x6b   : > { %s396_s4 = sand.u32 1, %s5076_s22  }
  0x6c   : > { %s2759_s21 = sshll.u32 %s396_s4, 4 }
  0x6d   : > { %s3506_s10 = scalar_lea.vmem [#allocation7], %s2759_s21 }
  0x6f   : > { %p2762_p6 = scmp.ne.s32.totalorder %s5077_s1, 0 }
  0x71   : > { %443 = sbr.rel (%p2762_p6) target bundleno = 126 (0x7e), region = 159 }
  0x76   : > { %v3293_v12 = vmov -inf   ;;  %v3294_v13 = vmov 0.0   ;;  %vm450_vm0 = vcmask 60416  }
  0x77   : > { %444 = vst [vmem:[#allocation2] sm:$0xf] %v3293_v12 }
  0x78   : > { %445 = vst [vmem:[#allocation3] sm:$0xf] %v3294_v13 }
  0x79   : > { %446 = vst [vmem:[#allocation4 + $0x10] sm:$0xff] %v3294_v13 }
  0x7a   : > { %447 = vst [vmem:[#allocation4] sm:$0xff] %v3294_v13 }
  0x7b   : > { %448 = vst [vmem:[#allocation4 + $0x18] sm:$0xff] %v3294_v13 }
  0x7c   : > { %449 = vst [vmem:[#allocation4 + $0x8] sm:$0xff] %v3294_v13 }
  0x7d   : > { %451 = vst.msk [vmem:[#allocation5] sm:$0xf] %vm450_vm0, %v3294_v13 }
  0x7e PF: > { %v452_v14 = vld [vmem:[%s391_s9] sm:$0xf]  ;;  %v453_v15 = vld [vmem:[%s391_s9 + $0x4] sm:$0xf]  ;;  %vm505_vm1 = vcmask 1043456   ;;  %vm480_vm2 = vcmask 64512  }
  0x7f   : > { %2940 = vxpose.binary.xlu0.c.b16.start.end [1/2] (short) %v453_v15, %v452_v14, 128  ;;  %v456_v16 = vld [vmem:[%s3506_s10] sm:$0xf]  ;;  %v454_v18 = vld [vmem:[%s391_s9 + $0x8] sm:$0xf]  ;;  %v455_v19 = vld [vmem:[%s391_s9 + $0xc] sm:$0xf] }
  0x80   : > { %v507_v17 = vsel %vm505_vm1, %v456_v16, 0  ;;  %v457_v20 = vld [vmem:[%s3506_s10 + $0x4] sm:$0xf]  ;;  %v458_v34 = vld [vmem:[%s3506_s10 + $0x8] sm:$0xf]  ;;  %vm1032_vm3 = vcmask 130112  }
  0x81   : > { %516 = vmatpush.bf16.msra.mxu0 %v507_v17  ;;  %v599_v21 = vsel %vm505_vm1, %v457_v20, 0  ;;  %v691_v35 = vsel %vm505_vm1, %v458_v34, 0  ;;  %v459_v37 = vld [vmem:[%s3506_s10 + $0xc] sm:$0xf]  ;;  %vm1036_vm4 = vcmask 195712   ;;  %vm1040_vm5 = vcmask 261312  }
  0x82   : > { %608 = vmatpush.bf16.msra.mxu1 %v599_v21  ;;  %700 = vmatpush.bf16.msra.mxu2 %v691_v35  ;;  %v783_v38 = vsel %vm505_vm1, %v459_v37, 0  ;;  %vm1044_vm6 = vcmask 326912   ;;  %vm1048_vm7 = vcmask 392512   ;;  %vm1052_vm8 = vcmask 458112   ;;  %s5246_s12 = sld [smem:[#allocation11_spill]] }
  0x83   : > { %792 = vmatpush.bf16.msra.mxu3 %v783_v38  ;;  %vm1056_vm9 = vcmask 523712   ;;  %vm1060_vm10 = vcmask 589312   ;;  %vm1064_vm11 = vcmask 654912   ;;  %vm1068_vm12 = vcmask 720512  }
  0x84   : > { %vm5031_vm13 = vcmask 786112   ;;  %vm5030_vm14 = vcmask 851712   ;;  %vm1080_vm15 = vcmask 917312   ;;  %vm1084_vm0 = vcmask 982912  }
  0x85   : > { %vm1088_vm1 = vcmask 1048512  }
  0x88   : > { %p2795_p7 = scmp.ne.s32.totalorder %s5246_s12, 1 }
  0xff   : > { %2957 = vxpose.binary.xlu0.c.b16.start.end [1/2] (short) %v455_v19, %v454_v18, 128 }
 0x12b   : > { %v2941_v22 = vpop.trf.xlu0 }
 0x12c   : > { %2763 = vmatmul.msk.bf16.vlgmr.msra.gmra.mxu0 %vm480_vm2, %v2941_v22 }
 0x133   : > { %v2942_v23 = vpop.trf.xlu0 }
 0x134   : > { %2771 = vmatmul.msk.bf16.vlgmr.msra.gmra.mxu1 %vm480_vm2, %v2942_v23 }
 0x13b   : > { %v2943_v24 = vpop.trf.xlu0 }
 0x13c   : > { %2764 = vmatmul.msk.bf16.gmra.mxu0 %vm480_vm2, %v2943_v24 }
 0x143   : > { %v2944_v25 = vpop.trf.xlu0 }
 0x144   : > { %2772 = vmatmul.msk.bf16.gmra.mxu1 %vm480_vm2, %v2944_v25 }
 0x14b   : > { %v2945_v26 = vpop.trf.xlu0 }
 0x14c   : > { %2765 = vmatmul.msk.bf16.gmra.mxu0 %vm480_vm2, %v2945_v26 }
 0x153   : > { %v2946_v27 = vpop.trf.xlu0 }
 0x154   : > { %2773 = vmatmul.msk.bf16.gmra.mxu1 %vm480_vm2, %v2946_v27 }
 0x15b   : > { %v2947_v28 = vpop.trf.xlu0 }
 0x15c   : > { %2766 = vmatmul.msk.bf16.gmra.mxu0 %vm480_vm2, %v2947_v28 }
 0x163   : > { %v2948_v29 = vpop.trf.xlu0 }
 0x164   : > { %2774 = vmatmul.msk.bf16.gmra.mxu1 %vm480_vm2, %v2948_v29 }
 0x16b   : > { %v2949_v30 = vpop.trf.xlu0 }
 0x16c   : > { %2767 = vmatmul.msk.bf16.gmra.mxu0 %vm480_vm2, %v2949_v30 }
 0x173   : > { %v2950_v31 = vpop.trf.xlu0 }
 0x174   : > { %2775 = vmatmul.msk.bf16.gmra.mxu1 %vm480_vm2, %v2950_v31 }
 0x17b   : > { %v2951_v32 = vpop.trf.xlu0 }
 0x17c   : > { %2768 = vmatmul.msk.bf16.gmra.mxu0 %vm480_vm2, %v2951_v32 }
 0x183   : > { %v2952_v33 = vpop.trf.xlu0 }
 0x184   : > { %2776 = vmatmul.msk.bf16.gmra.mxu1 %vm480_vm2, %v2952_v33 }
 0x18b   : > { %v2953_v36 = vpop.trf.xlu0 }
 0x18c   : > { %2769 = vmatmul.msk.bf16.gmra.mxu0 %vm480_vm2, %v2953_v36 }
 0x193   : > { %v2954_v39 = vpop.trf.xlu0 }
 0x194   : > { %2777 = vmatmul.msk.bf16.gmra.mxu1 %vm480_vm2, %v2954_v39 }
 0x19b   : > { %v2955_v40 = vpop.trf.xlu0 }
 0x19c   : > { %2770 = vmatmul.msk.bf16.gmra.mxu0 %vm480_vm2, %v2955_v40 }
 0x1a3   : > { %v2956_v41 = vpop.trf.xlu0 }
 0x1a4   : > { %2778 = vmatmul.msk.bf16.gmra.mxu1 %vm480_vm2, %v2956_v41 }
 0x1a9   : > { %v3537_v42 = vpop.f32.mrf.mxu0 }
 0x1aa   : > { %5078 = vst [vmem:[#allocation20_spill] sm:$0xff] %v3537_v42  ;;  %835 = vmax.xlane.f32.xlu1 %v3537_v42 }
 0x1ab   : > { %v2958_v43 = vpop.trf.xlu0 }
 0x1ac   : > { %2779 = vmatmul.msk.bf16.vlgmr.msra.gmra.mxu2 %vm480_vm2, %v2958_v43 }
 0x1b1   : > { %v3541_v44 = vpop.f32.mrf.mxu1  ;;  %v3561_v58 = vpop.f32.mrf.mxu0 }
 0x1b2   : > { %5079 = vst [vmem:[#allocation21_spill] sm:$0xff] %v3541_v44  ;;  %867 = vmax.xlane.f32.xlu1 %v3541_v44 }
 0x1b3   : > { %v2959_v45 = vpop.trf.xlu0  ;;  %5082 = vst [vmem:[#allocation24_spill] sm:$0xff] %v3561_v58 }
 0x1b4   : > { %2787 = vmatmul.msk.bf16.vlgmr.msra.gmra.mxu3 %vm480_vm2, %v2959_v45 }
 0x1b9   : > { %v3545_v46 = vpop.f32.mrf.mxu1  ;;  %v3570_v62 = vpop.f32.mrf.mxu0 }
 0x1ba   : > { %5080 = vst [vmem:[#allocation22_spill] sm:$0xff] %v3545_v46  ;;  %869 = vmax.xlane.f32.xlu2 %v3545_v46 }
 0x1bb   : > { %v2960_v47 = vpop.trf.xlu0  ;;  %5085 = vst [vmem:[#allocation27_spill] sm:$0xff] %v3570_v62 }
 0x1bc   : > { %2780 = vmatmul.msk.bf16.gmra.mxu2 %vm480_vm2, %v2960_v47 }
 0x1c1   : > { %v3572_v63 = vpop.f32.mrf.mxu1  ;;  %v3590_v5 = vpop.f32.mrf.mxu0 }
 0x1c2   : > { %5086 = vst [vmem:[#allocation28_spill] sm:$0xff] %v3572_v63 }
 0x1c3   : > { %v2961_v48 = vpop.trf.xlu0  ;;  %5091 = vst [vmem:[#allocation33_spill] sm:$0xff] %v3590_v5 }
 0x1c4   : > { %2788 = vmatmul.msk.bf16.gmra.mxu3 %vm480_vm2, %v2961_v48 }
 0x1c9   : > { %v3597_v8 = vpop.f32.mrf.mxu1  ;;  %v3599_v9 = vpop.f32.mrf.mxu0 }
 0x1ca   : > { %5093 = vst [vmem:[#allocation35_spill] sm:$0xff] %v3597_v8 }
 0x1cb   : > { %v2962_v49 = vpop.trf.xlu0  ;;  %5094 = vst [vmem:[#allocation36_spill] sm:$0xff] %v3599_v9 }
 0x1cc   : > { %2781 = vmatmul.msk.bf16.gmra.mxu2 %vm480_vm2, %v2962_v49 }
 0x1d1   : > { %v3606_v12 = vpop.f32.mrf.mxu1  ;;  %v3616_v15 = vpop.f32.mrf.mxu0 }
 0x1d2   : > { %5096 = vst [vmem:[#allocation38_spill] sm:$0xff] %v3606_v12 }
 0x1d3   : > { %v2963_v50 = vpop.trf.xlu0  ;;  %5099 = vst [vmem:[#allocation41_spill] sm:$0xff] %v3616_v15 }
 0x1d4   : > { %2789 = vmatmul.msk.bf16.gmra.mxu3 %vm480_vm2, %v2963_v50 }
 0x1d9   : > { %v3622_v17 = vpop.f32.mrf.mxu1  ;;  %v3624_v18 = vpop.f32.mrf.mxu0 }
 0x1da   : > { %5101 = vst [vmem:[#allocation43_spill] sm:$0xff] %v3622_v17 }
 0x1db   : > { %v2964_v51 = vpop.trf.xlu0  ;;  %5102 = vst [vmem:[#allocation44_spill] sm:$0xff] %v3624_v18 }
 0x1dc   : > { %2782 = vmatmul.msk.bf16.gmra.mxu2 %vm480_vm2, %v2964_v51 }
 0x1e1   : > { %v3630_v20 = vpop.f32.mrf.mxu1  ;;  %v3642_v24 = vpop.f32.mrf.mxu0 }
 0x1e2   : > { %5104 = vst [vmem:[#allocation46_spill] sm:$0xff] %v3630_v20 }
 0x1e3   : > { %v2965_v52 = vpop.trf.xlu0  ;;  %5107 = vst [vmem:[#allocation49_spill] sm:$0xff] %v3642_v24 }
 0x1e4   : > { %2790 = vmatmul.msk.bf16.gmra.mxu3 %vm480_vm2, %v2965_v52 }
 0x1e9   : > { %v3650_v27 = vpop.f32.mrf.mxu1  ;;  %v3652_v28 = vpop.f32.mrf.mxu0 }
 0x1ea   : > { %5109 = vst [vmem:[#allocation51_spill] sm:$0xff] %v3650_v27 }
 0x1eb   : > { %v2966_v53 = vpop.trf.xlu0  ;;  %5110 = vst [vmem:[#allocation52_spill] sm:$0xff] %v3652_v28 }
 0x1ec   : > { %2783 = vmatmul.msk.bf16.gmra.mxu2 %vm480_vm2, %v2966_v53 }
 0x1f1   : > { %v3662_v32 = vpop.f32.mrf.mxu1  ;;  %v3680_v39 = vpop.f32.mrf.mxu0 }
 0x1f2   : > { %5112 = vst [vmem:[#allocation54_spill] sm:$0xff] %v3662_v32 }
 0x1f3   : > { %v2967_v54 = vpop.trf.xlu0  ;;  %5115 = vst [vmem:[#allocation57_spill] sm:$0xff] %v3680_v39 }
 0x1f4   : > { %2791 = vmatmul.msk.bf16.gmra.mxu3 %vm480_vm2, %v2967_v54 }
 0x1f9   : > { %v3690_v45 = vpop.f32.mrf.mxu1  ;;  %v3692_v47 = vpop.f32.mrf.mxu0 }
 0x1fa   : > { %5117 = vst [vmem:[#allocation59_spill] sm:$0xff] %v3690_v45 }
 0x1fb   : > { %v2968_v55 = vpop.trf.xlu0  ;;  %5118 = vst [vmem:[#allocation60_spill] sm:$0xff] %v3692_v47 }
 0x1fc   : > { %2784 = vmatmul.msk.bf16.gmra.mxu2 %vm480_vm2, %v2968_v55 }
 0x201   : > { %v3702_v51 = vpop.f32.mrf.mxu1 }
 0x202   : > { %5120 = vst [vmem:[#allocation62_spill] sm:$0xff] %v3702_v51 }
 0x203   : > { %v2969_v56 = vpop.trf.xlu0 }
 0x204   : > { %2792 = vmatmul.msk.bf16.gmra.mxu3 %vm480_vm2, %v2969_v56 }
 0x20b   : > { %v2970_v60 = vpop.trf.xlu0 }
 0x20c   : > { %2785 = vmatmul.msk.bf16.gmra.mxu2 %vm480_vm2, %v2970_v60 }
 0x213   : > { %v2971_v1 = vpop.trf.xlu0 }
 0x214   : > { %2793 = vmatmul.msk.bf16.gmra.mxu3 %vm480_vm2, %v2971_v1  ;;  %v3720_v1 = vpop.f32.mrf.mxu0 }
 0x215   : > { %5123 = vst [vmem:[#allocation65_spill] sm:$0xff] %v3720_v1 }
 0x21b   : > { %v2972_v7 = vpop.trf.xlu0 }
 0x21c   : > { %2786 = vmatmul.msk.bf16.gmra.mxu2 %vm480_vm2, %v2972_v7 }
 0x21d   : > { %v3640_v23 = vpop.xlane.xlu1 %835 }
 0x223   : > { %v2973_v10 = vpop.trf.xlu0 }
 0x224   : > { %2794 = vmatmul.msk.bf16.gmra.mxu3 %vm480_vm2, %v2973_v10  ;;  %vm1183_vm2 = vcmask 1041409  }
 0x225   : > { %v3648_v26 = vpop.xlane.xlu1 %867 }
 0x22d   : > { %v3656_v29 = vpop.xlane.xlu2 %869 }
 0x22f   : > { %v3558_v57 = vpop.f32.mrf.mxu2 }
 0x230   : > { %5081 = vst [vmem:[#allocation23_spill] sm:$0xff] %v3558_v57  ;;  %899 = vmax.xlane.f32.xlu1 %v3558_v57 }
 0x237   : > { %v3563_v59 = vpop.f32.mrf.mxu2  ;;  %v3567_v61 = vpop.f32.mrf.mxu3 }
 0x238   : > { %5083 = vst [vmem:[#allocation25_spill] sm:$0xff] %v3563_v59  ;;  %837 = vmax.xlane.f32.xlu1 %v3561_v58  ;;  %901 = vmax.xlane.f32.xlu2 %v3563_v59 }
 0x239   : > { %5084 = vst [vmem:[#allocation26_spill] sm:$0xff] %v3567_v61 }
 0x23f   : > { %v3574_v0 = vpop.f32.mrf.mxu2  ;;  %v3580_v2 = vpop.f32.mrf.mxu3 }
 0x240   : > { %5087 = vst [vmem:[#allocation29_spill] sm:$0xff] %v3574_v0  ;;  %871 = vmax.xlane.f32.xlu1 %v3572_v63  ;;  %839 = vmax.xlane.f32.xlu2 %v3570_v62 }
 0x241   : > { %903 = vmax.xlane.f32.xlu0 %v3574_v0  ;;  %5088 = vst [vmem:[#allocation30_spill] sm:$0xff] %v3580_v2 }
 0x247   : > { %v3584_v3 = vpop.f32.mrf.mxu3  ;;  %v3586_v4 = vpop.f32.mrf.mxu2 }
 0x248   : > { %931 = vmax.xlane.f32.xlu2 %v3567_v61  ;;  %933 = vmax.xlane.f32.xlu1 %v3580_v2  ;;  %5089 = vst [vmem:[#allocation31_spill] sm:$0xff] %v3584_v3 }
 0x249   : > { %5090 = vst [vmem:[#allocation32_spill] sm:$0xff] %v3586_v4 }
 0x24f   : > { %v3592_v6 = vpop.f32.mrf.mxu3  ;;  %v3604_v11 = vpop.f32.mrf.mxu2 }
 0x250   : > { %905 = vmax.xlane.f32.xlu1 %v3586_v4  ;;  %935 = vmax.xlane.f32.xlu2 %v3584_v3  ;;  %5092 = vst [vmem:[#allocation34_spill] sm:$0xff] %v3592_v6 }
 0x251   : > { %5095 = vst [vmem:[#allocation37_spill] sm:$0xff] %v3604_v11 }
 0x257   : > { %v3610_v13 = vpop.f32.mrf.mxu3  ;;  %v3612_v14 = vpop.f32.mrf.mxu2 }
 0x258   : > { %841 = vmax.xlane.f32.xlu2 %v3590_v5  ;;  %937 = vmax.xlane.f32.xlu1 %v3592_v6  ;;  %5097 = vst [vmem:[#allocation39_spill] sm:$0xff] %v3610_v13 }
 0x259   : > { %5098 = vst [vmem:[#allocation40_spill] sm:$0xff] %v3612_v14 }
 0x25f   : > { %v3618_v16 = vpop.f32.mrf.mxu3  ;;  %v3628_v19 = vpop.f32.mrf.mxu2 }
 0x260   : > { %873 = vmax.xlane.f32.xlu2 %v3597_v8  ;;  %843 = vmax.xlane.f32.xlu1 %v3599_v9  ;;  %5100 = vst [vmem:[#allocation42_spill] sm:$0xff] %v3618_v16 }
 0x261   : > { %5103 = vst [vmem:[#allocation45_spill] sm:$0xff] %v3628_v19 }
 0x267   : > { %v3634_v21 = vpop.f32.mrf.mxu3  ;;  %v3636_v22 = vpop.f32.mrf.mxu2 }
 0x268   : > { %875 = vmax.xlane.f32.xlu1 %v3606_v12  ;;  %907 = vmax.xlane.f32.xlu2 %v3604_v11  ;;  %5105 = vst [vmem:[#allocation47_spill] sm:$0xff] %v3634_v21 }
 0x269   : > { %5106 = vst [vmem:[#allocation48_spill] sm:$0xff] %v3636_v22 }
 0x26f   : > { %v3644_v25 = vpop.f32.mrf.mxu3  ;;  %v3660_v31 = vpop.f32.mrf.mxu2 }
 0x270   : > { %909 = vmax.xlane.f32.xlu1 %v3612_v14  ;;  %939 = vmax.xlane.f32.xlu2 %v3610_v13  ;;  %5108 = vst [vmem:[#allocation50_spill] sm:$0xff] %v3644_v25 }
 0x271   : > { %5111 = vst [vmem:[#allocation53_spill] sm:$0xff] %v3660_v31 }
 0x277   : > { %v3670_v35 = vpop.f32.mrf.mxu3  ;;  %v3672_v36 = vpop.f32.mrf.mxu2 }
 0x278   : > { %845 = vmax.xlane.f32.xlu2 %v3616_v15  ;;  %941 = vmax.xlane.f32.xlu1 %v3618_v16  ;;  %5113 = vst [vmem:[#allocation55_spill] sm:$0xff] %v3670_v35  ;;  %v1027_v15 = vlaneseq }
 0x279   : > { %5114 = vst [vmem:[#allocation56_spill] sm:$0xff] %v3672_v36 }
 0x27f   : > { %v3682_v40 = vpop.f32.mrf.mxu3  ;;  %v3700_v50 = vpop.f32.mrf.mxu2 }
 0x280   : > { %877 = vmax.xlane.f32.xlu2 %v3622_v17  ;;  %847 = vmax.xlane.f32.xlu1 %v3624_v18  ;;  %5116 = vst [vmem:[#allocation58_spill] sm:$0xff] %v3682_v40 }
 0x281   : > { %5119 = vst [vmem:[#allocation61_spill] sm:$0xff] %v3700_v50 }
 0x287   : > { %v3710_v54 = vpop.f32.mrf.mxu3  ;;  %v3712_v55 = vpop.f32.mrf.mxu2 }
 0x288   : > { %879 = vmax.xlane.f32.xlu1 %v3630_v20  ;;  %911 = vmax.xlane.f32.xlu2 %v3628_v19  ;;  %5121 = vst [vmem:[#allocation63_spill] sm:$0xff] %v3710_v54 }
 0x289   : > { %5122 = vst [vmem:[#allocation64_spill] sm:$0xff] %v3712_v55 }
 0x28f   : > { %v3722_v7 = vpop.f32.mrf.mxu3  ;;  %v3740_v59 = vpop.f32.mrf.mxu2 }
 0x290   : > { %913 = vmax.xlane.f32.xlu1 %v3636_v22  ;;  %943 = vmax.xlane.f32.xlu2 %v3634_v21  ;;  %5124 = vst [vmem:[#allocation66_spill] sm:$0xff] %v3722_v7  ;;  %v3730_v21 = vpop.f32.mrf.mxu1 }
 0x291   : > { %5125 = vst [vmem:[#allocation67_spill] sm:$0xff] %v3730_v21 }
 0x292   : > { %5127 = vst [vmem:[#allocation69_spill] sm:$0xff] %v3740_v59 }
 0x297   : > { %v3750_v13 = vpop.f32.mrf.mxu3  ;;  %v3752_v11 = vpop.f32.mrf.mxu2 }
 0x298   : > { %849 = vmax.xlane.f32.xlu2 %v3642_v24  ;;  %945 = vmax.xlane.f32.xlu1 %v3644_v25  ;;  %v3742_v16 = vpop.f32.mrf.mxu1  ;;  %5129 = vst [vmem:[#allocation71_spill] sm:$0xff] %v3750_v13 }
 0x299   : > { %5128 = vst [vmem:[#allocation70_spill] sm:$0xff] %v3742_v16 }
 0x29a   : > { %5130 = vst [vmem:[#allocation72_spill] sm:$0xff] %v3752_v11 }
 0x29f   : > { %v3762_v2 = vpop.f32.mrf.mxu3 }
 0x2a0   : > { %881 = vmax.xlane.f32.xlu2 %v3650_v27  ;;  %851 = vmax.xlane.f32.xlu1 %v3652_v28  ;;  %5132 = vst [vmem:[#allocation74_spill] sm:$0xff] %v3762_v2  ;;  %v3770_v61 = vpop.f32.mrf.mxu1 }
 0x2a1   : > { %5133 = vst [vmem:[#allocation75_spill] sm:$0xff] %v3770_v61 }
 0x2a3   : > { %v3658_v30 = vpop.xlane.xlu1 %899 }
 0x2a8   : > { %883 = vmax.xlane.f32.xlu1 %v3662_v32  ;;  %915 = vmax.xlane.f32.xlu2 %v3660_v31  ;;  %v3790_v31 = vpop.f32.mrf.mxu3 }
 0x2a9   : > { %5137 = vst [vmem:[#allocation79_spill] sm:$0xff] %v3790_v31 }
 0x2ab   : > { %v3666_v33 = vpop.xlane.xlu1 %837  ;;  %v3668_v34 = vpop.xlane.xlu2 %901 }
 0x2b0   : > { %917 = vmax.xlane.f32.xlu1 %v3672_v36  ;;  %947 = vmax.xlane.f32.xlu2 %v3670_v35  ;;  %v3732_v35 = vpop.f32.mrf.mxu0  ;;  %v3802_v0 = vpop.f32.mrf.mxu3 }
 0x2b1   : > { %5126 = vst [vmem:[#allocation68_spill] sm:$0xff] %v3732_v35 }
 0x2b2   : > { %5140 = vst [vmem:[#allocation82_spill] sm:$0xff] %v3802_v0 }
 0x2b3   : > { %v3676_v37 = vpop.xlane.xlu1 %871  ;;  %v3678_v38 = vpop.xlane.xlu2 %839 }
 0x2b8   : > { %853 = vmax.xlane.f32.xlu2 %v3680_v39  ;;  %949 = vmax.xlane.f32.xlu1 %v3682_v40  ;;  %v3760_v22 = vpop.f32.mrf.mxu0  ;;  %v3849_v39 = vand.u32 127, %v1027_v15 }
 0x2b9   : > { %5131 = vst [vmem:[#allocation73_spill] sm:$0xff] %v3760_v22 }
 0x2ba   : > { %v3852_v44 = vadd.s32 4294967288, %v3849_v39  ;;  %v1029_v24 = vperm.slane %v3640_v23, %v3849_v39 }
 0x2bb   : > { %v3686_v41 = vpop.xlane.xlu2 %931  ;;  %v3688_v43 = vpop.xlane.xlu1 %933 }
 0x2bc   : > { %v1122_v58 = vperm.slane %v3668_v34, %v3852_v44 }
 0x2c0   : > { %885 = vmax.xlane.f32.xlu2 %v3690_v45  ;;  %855 = vmax.xlane.f32.xlu1 %v3692_v47  ;;  %v1031_v47 = vperm.slane %v3666_v33, %v3852_v44 }
 0x2c2   : > { %v1033_v33 = vsel %vm1032_vm3, %v1031_v47, %v1029_v24 }
 0x2c3   : > { %v3696_v48 = vpop.xlane.xlu1 %905  ;;  %v3698_v49 = vpop.xlane.xlu2 %935 }
 0x2c8   : > { %887 = vmax.xlane.f32.xlu1 %v3702_v51  ;;  %919 = vmax.xlane.f32.xlu2 %v3700_v50  ;;  %v3772_v50 = vpop.f32.mrf.mxu0 }
 0x2c9   : > { %5134 = vst [vmem:[#allocation76_spill] sm:$0xff] %v3772_v50 }
 0x2cb   : > { %v3706_v52 = vpop.xlane.xlu2 %841  ;;  %v3708_v53 = vpop.xlane.xlu1 %937 }
 0x2d0   : > { %921 = vmax.xlane.f32.xlu1 %v3712_v55  ;;  %951 = vmax.xlane.f32.xlu2 %v3710_v54  ;;  %v3782_v55 = vpop.f32.mrf.mxu1  ;;  %v3800_v17 = vpop.f32.mrf.mxu0 }
 0x2d1   : > { %5136 = vst [vmem:[#allocation78_spill] sm:$0xff] %v3782_v55 }
 0x2d2   : > { %5139 = vst [vmem:[#allocation81_spill] sm:$0xff] %v3800_v17 }
 0x2d3   : > { %v3716_v56 = vpop.xlane.xlu2 %873  ;;  %v3718_v60 = vpop.xlane.xlu1 %843 }
 0x2d8   : > { %857 = vmax.xlane.f32.xlu2 %v3720_v1  ;;  %953 = vmax.xlane.f32.xlu1 %v3722_v7  ;;  %v3810_v4 = vpop.f32.mrf.mxu1 }
 0x2d9   : > { %5141 = vst [vmem:[#allocation83_spill] sm:$0xff] %v3810_v4 }
 0x2db   : > { %v3726_v10 = vpop.xlane.xlu1 %875  ;;  %v3728_v40 = vpop.xlane.xlu2 %907 }
 0x2e0   : > { %889 = vmax.xlane.f32.xlu2 %v3730_v21  ;;  %859 = vmax.xlane.f32.xlu1 %v3732_v35  ;;  %v1091_v35 = vperm.slane %v3656_v29, %v3852_v44 }
 0x2e3   : > { %v3736_v54 = vpop.xlane.xlu1 %909  ;;  %v3738_v57 = vpop.xlane.xlu2 %939 }
 0x2e8   : > { %891 = vmax.xlane.f32.xlu1 %v3742_v16  ;;  %923 = vmax.xlane.f32.xlu2 %v3740_v59  ;;  %v3780_v59 = vpop.f32.mrf.mxu2 }
 0x2e9   : > { %5135 = vst [vmem:[#allocation77_spill] sm:$0xff] %v3780_v59 }
 0x2eb   : > { %v3746_v7 = vpop.xlane.xlu2 %845  ;;  %v3748_v25 = vpop.xlane.xlu1 %941 }
 0x2f0   : > { %925 = vmax.xlane.f32.xlu1 %v3752_v11  ;;  %955 = vmax.xlane.f32.xlu2 %v3750_v13  ;;  %v3792_v14 = vpop.f32.mrf.mxu2 }
 0x2f1   : > { %5138 = vst [vmem:[#allocation80_spill] sm:$0xff] %v3792_v14 }
 0x2f3   : > { %v3756_v19 = vpop.xlane.xlu2 %877  ;;  %v3758_v6 = vpop.xlane.xlu1 %847 }
 0x2f8   : > { %861 = vmax.xlane.f32.xlu2 %v3760_v22  ;;  %957 = vmax.xlane.f32.xlu1 %v3762_v2  ;;  %v1090_v22 = vperm.slane %v3648_v26, %v3849_v39  ;;  %v1121_v26 = vperm.slane %v3658_v30, %v3849_v39  ;;  %v3894_v30 = vadd.s32 4294967264, %v3849_v39 }
 0x2fa   : > { %v1092_v9 = vsel %vm1032_vm3, %v1091_v35, %v1090_v22  ;;  %v3886_v35 = vshrl.u32 %v1027_v15, 7  ;;  %v1123_v24 = vsel %vm1032_vm3, %v1122_v58, %v1121_v26 }
 0x2fb   : > { %v3766_v36 = vpop.xlane.xlu1 %879  ;;  %v3768_v3 = vpop.xlane.xlu2 %911 }
 0x2fc   : > { %5147 = vst [vmem:[#allocation89_spill] sm:$0xff] %v3886_v35  ;;  %2974 = vset.pattern.permute.xlu2 %v3886_v35  ;;  %v3901_v15 = vadd.s32 8, %v3886_v35 }
 0x2fe   : > { %2975 = vset.pattern.permute.xlu1 %v3901_v15 }
 0x300   : > { %893 = vmax.xlane.f32.xlu2 %v3770_v61  ;;  %863 = vmax.xlane.f32.xlu1 %v3772_v50  ;;  %v3861_v50 = vadd.s32 4294967280, %v3849_v39 }
 0x302   : > { %5146 = vst [vmem:[#allocation88_spill] sm:$0xff] %v3861_v50  ;;  %v1093_v29 = vperm.slane %v3676_v37, %v3861_v50  ;;  %v1035_v22 = vperm.slane %v3678_v38, %v3861_v50  ;;  %v1155_v38 = vperm.slane %v3698_v49, %v3861_v50 }
 0x303   : > { %v3776_v13 = vpop.xlane.xlu1 %913  ;;  %v3778_v11 = vpop.xlane.xlu2 %943 }
 0x304   : > { %v1037_v49 = vsel %vm1036_vm4, %v1035_v22, %v1033_v33  ;;  %v3931_v33 = vadd.s32 4294967248, %v3849_v39 }
 0x308   : > { %895 = vmax.xlane.f32.xlu1 %v3782_v55  ;;  %927 = vmax.xlane.f32.xlu2 %v3780_v59 }
 0x30b   : > { %v3786_v2 = vpop.xlane.xlu2 %849  ;;  %v3788_v46 = vpop.xlane.xlu1 %945 }
 0x310   : > { %929 = vmax.xlane.f32.xlu1 %v3792_v14  ;;  %959 = vmax.xlane.f32.xlu2 %v3790_v31 }
 0x313   : > { %v3796_v63 = vpop.xlane.xlu2 %881  ;;  %v3798_v12 = vpop.xlane.xlu1 %851 }
 0x318   : > { %865 = vmax.xlane.f32.xlu2 %v3800_v17  ;;  %961 = vmax.xlane.f32.xlu1 %v3802_v0 }
 0x31b   : > { %v3806_v59 = vpop.xlane.xlu1 %883  ;;  %v3808_v27 = vpop.xlane.xlu2 %915 }
 0x320   : > { %897 = vmax.xlane.f32.xlu2 %v3810_v4 }
 0x323   : > { %v3813_v31 = vpop.xlane.xlu1 %917  ;;  %v3815_v14 = vpop.xlane.xlu2 %947 }
 0x32b   : > { %v3817_v32 = vpop.xlane.xlu2 %853  ;;  %v3819_v51 = vpop.xlane.xlu1 %949 }
 0x333   : > { %v3821_v21 = vpop.xlane.xlu2 %885  ;;  %v3823_v61 = vpop.xlane.xlu1 %855 }
 0x33b   : > { %v3825_v0 = vpop.xlane.xlu1 %887  ;;  %v3827_v55 = vpop.xlane.xlu2 %919 }
 0x343   : > { %v3829_v16 = vpop.xlane.xlu1 %921  ;;  %v3831_v45 = vpop.xlane.xlu2 %951 }
 0x34b   : > { %v3833_v4 = vpop.xlane.xlu2 %857  ;;  %v3835_v20 = vpop.xlane.xlu1 %953 }
 0x353   : > { %v3837_v42 = vpop.xlane.xlu2 %889  ;;  %v3839_v62 = vpop.xlane.xlu1 %859 }
 0x35b   : > { %v3841_v5 = vpop.xlane.xlu1 %891  ;;  %v3843_v8 = vpop.xlane.xlu2 %923 }
 0x363   : > { %v3845_v18 = vpop.xlane.xlu1 %925  ;;  %v3847_v28 = vpop.xlane.xlu2 %955 }
 0x364   : > { %5142 = vst [vmem:[#allocation84_spill] sm:$0xff] %v3845_v18  ;;  %v1153_v18 = vperm.slane %v3688_v43, %v3852_v44 }
 0x365   : > { %5143 = vst [vmem:[#allocation85_spill] sm:$0xff] %v3847_v28  ;;  %v1152_v28 = vperm.slane %v3686_v41, %v3849_v39  ;;  %v1094_v41 = vsel %vm1036_vm4, %v1093_v29, %v1092_v9  ;;  %v1128_v29 = vperm.slane %v3728_v40, %v3894_v30 }
 0x36b   : > { %v3854_v1 = vpop.xlane.xlu2 %861  ;;  %v3856_v17 = vpop.xlane.xlu1 %957 }
 0x36c   : > { %5144 = vst [vmem:[#allocation86_spill] sm:$0xff] %v3854_v1  ;;  %v3875_v1 = vadd.s32 4294967272, %v3849_v39 }
 0x36d   : > { %5145 = vst [vmem:[#allocation87_spill] sm:$0xff] %v3856_v17  ;;  %v904_v17 = vpop.xlane.xlu0 %903 }
 0x36e   : > { %v1124_v37 = vperm.slane %v904_v17, %v3861_v50  ;;  %v3904_v17 = vadd.s32 64, %v3886_v35  ;;  %v1126_v43 = vperm.slane %v3696_v48, %v3875_v1  ;;  %v1039_v47 = vperm.slane %v3706_v52, %v3875_v1 }
 0x36f   : > { %v1157_v58 = vperm.slane %v3708_v53, %v3875_v1  ;;  %v1095_v26 = vperm.slane %v3716_v56, %v3875_v1  ;;  %v3917_v50 = vadd.s32 4294967256, %v3849_v39  ;;  %v1154_v48 = vsel %vm1032_vm3, %v1153_v18, %v1152_v28 }
 0x370   : > { %2998 = vset.pattern.permute.xlu0 %v3904_v17  ;;  %v1125_v9 = vsel %vm1036_vm4, %v1124_v37, %v1123_v24  ;;  %v1043_v52 = vperm.slane %v3718_v60, %v3894_v30  ;;  %v1156_v53 = vsel %vm1036_vm4, %v1155_v38, %v1154_v48  ;;  %v1097_v56 = vperm.slane %v3726_v10, %v3894_v30 }
 0x371   : > { %v1127_v22 = vsel %vm1040_vm5, %v1126_v43, %v1125_v9  ;;  %v1041_v37 = vsel %vm1040_vm5, %v1039_v47, %v1037_v49  ;;  %v1158_v18 = vsel %vm1040_vm5, %v1157_v58, %v1156_v53  ;;  %v1159_v28 = vperm.slane %v3738_v57, %v3894_v30 }
 0x372   : > { %v1096_v60 = vsel %vm1040_vm5, %v1095_v26, %v1094_v41  ;;  %v1130_v10 = vperm.slane %v3736_v54, %v3917_v50  ;;  %v1047_v40 = vperm.slane %v3746_v7, %v3917_v50  ;;  %v1161_v24 = vperm.slane %v3748_v25, %v3917_v50 }
 0x373   : > { %v3882_v23 = vpop.xlane.xlu2 %893  ;;  %v3884_v34 = vpop.xlane.xlu1 %863  ;;  %v1045_v43 = vsel %vm1044_vm6, %v1043_v52, %v1041_v37  ;;  %v1099_v47 = vperm.slane %v3756_v19, %v3917_v50  ;;  %v3951_v57 = vadd.s32 4294967240, %v3849_v39  ;;  %v1098_v41 = vsel %vm1044_vm6, %v1097_v56, %v1096_v60 }
 0x374   : > { %v1129_v54 = vsel %vm1044_vm6, %v1128_v29, %v1127_v22  ;;  %v1051_v7 = vperm.slane %v3758_v6, %v3931_v33  ;;  %v1160_v58 = vsel %vm1044_vm6, %v1159_v28, %v1158_v18  ;;  %v1101_v49 = vperm.slane %v3766_v36, %v3931_v33 }
 0x375   : > { %v1132_v19 = vperm.slane %v3768_v3, %v3931_v33  ;;  %v3965_v26 = vadd.s32 4294967232, %v3849_v39  ;;  %v1131_v9 = vsel %vm1048_vm7, %v1130_v10, %v1129_v54  ;;  %v1049_v48 = vsel %vm1048_vm7, %v1047_v40, %v1045_v43 }
 0x376   : > { %v1162_v6 = vsel %vm1048_vm7, %v1161_v24, %v1160_v58  ;;  %v1163_v52 = vperm.slane %v3778_v11, %v3931_v33  ;;  %v1100_v53 = vsel %vm1048_vm7, %v1099_v47, %v1098_v41  ;;  %v1134_v36 = vperm.slane %v3776_v13, %v3951_v57 }
 0x377   : > { %5148 = vst [vmem:[#allocation90_spill] sm:$0xff] %v3965_v26  ;;  %v1055_v3 = vperm.slane %v3786_v2, %v3951_v57  ;;  %v1165_v56 = vperm.slane %v3788_v46, %v3951_v57  ;;  %v1053_v29 = vsel %vm1052_vm8, %v1051_v7, %v1049_v48  ;;  %v1103_v22 = vperm.slane %v3796_v63, %v3951_v57 }
 0x378   : > { %v3983_v37 = vadd.s32 4294967224, %v3849_v39  ;;  %v1102_v11 = vsel %vm1052_vm8, %v1101_v49, %v1100_v53  ;;  %v1133_v18 = vsel %vm1052_vm8, %v1132_v19, %v1131_v9  ;;  %v1059_v13 = vperm.slane %v3798_v12, %v3965_v26 }
 0x379   : > { %v1105_v2 = vperm.slane %v3806_v59, %v3965_v26  ;;  %v1164_v46 = vsel %vm1052_vm8, %v1163_v52, %v1162_v6  ;;  %v1136_v28 = vperm.slane %v3808_v27, %v3965_v26  ;;  %v3995_v63 = vadd.s32 4294967216, %v3849_v39 }
 0x37a   : > { %5149 = vst [vmem:[#allocation91_spill] sm:$0xff] %v3983_v37  ;;  %v1135_v10 = vsel %vm1056_vm9, %v1134_v36, %v1133_v18  ;;  %v1057_v40 = vsel %vm1056_vm9, %v1055_v3, %v1053_v29  ;;  %v1166_v12 = vsel %vm1056_vm9, %v1165_v56, %v1164_v46  ;;  %v1167_v59 = vperm.slane %v3815_v14, %v3965_v26 }
 0x37b   : > { %v3945_v38 = vpop.xlane.xlu2 %927  ;;  %v3957_v25 = vpop.xlane.xlu1 %895  ;;  %5150 = vst [vmem:[#allocation92_spill] sm:$0xff] %v3995_v63  ;;  %v1104_v24 = vsel %vm1056_vm9, %v1103_v22, %v1102_v11  ;;  %v1138_v27 = vperm.slane %v3813_v31, %v3983_v37  ;;  %v1063_v43 = vperm.slane %v3817_v32, %v3983_v37  ;;  %v1169_v47 = vperm.slane %v3819_v51, %v3983_v37 }
 0x37c   : > { %v1061_v41 = vsel %vm1060_vm10, %v1059_v13, %v1057_v40  ;;  %v1106_v54 = vsel %vm1060_vm10, %v1105_v2, %v1104_v24  ;;  %v4014_v7 = vadd.s32 4294967208, %v3849_v39  ;;  %v1137_v14 = vsel %vm1060_vm10, %v1136_v28, %v1135_v10  ;;  %v5156_v28 = vld [vmem:[#allocation85_spill] sm:$0xff] }
 0x37d   : > { %v1107_v58 = vperm.slane %v3821_v21, %v3983_v37  ;;  %v1067_v31 = vperm.slane %v3823_v61, %v3995_v63  ;;  %v1168_v51 = vsel %vm1060_vm10, %v1167_v59, %v1166_v12  ;;  %v1109_v49 = vperm.slane %v3825_v0, %v3995_v63 }
 0x37e   : > { %5151 = vst [vmem:[#allocation93_spill] sm:$0xff] %v4014_v7  ;;  %v1140_v19 = vperm.slane %v3827_v55, %v3995_v63  ;;  %v4029_v9 = vadd.s32 4294967200, %v3849_v39  ;;  %v1139_v48 = vsel %vm1064_vm11, %v1138_v27, %v1137_v14  ;;  %v1065_v21 = vsel %vm1064_vm11, %v1063_v43, %v1061_v41 }
 0x37f   : > { %v1170_v61 = vsel %vm1064_vm11, %v1169_v47, %v1168_v51  ;;  %v1171_v6 = vperm.slane %v3831_v45, %v3995_v63  ;;  %v1142_v52 = vperm.slane %v3829_v16, %v4014_v7  ;;  %v1071_v0 = vperm.slane %v3833_v4, %v4014_v7  ;;  %v5159_v47 = vld [vmem:[#allocation87_spill] sm:$0xff] }
 0x380   : > { %5152 = vst [vmem:[#allocation94_spill] sm:$0xff] %v4029_v9  ;;  %v1173_v55 = vperm.slane %v3835_v20, %v4014_v7  ;;  %v4043_v53 = vadd.s32 4294967192, %v3849_v39  ;;  %v1108_v36 = vsel %vm1064_vm11, %v1107_v58, %v1106_v54  ;;  %v1069_v3 = vsel %vm1068_vm12, %v1067_v31, %v1065_v21 }
 0x381   : > { %v1111_v56 = vperm.slane %v3837_v42, %v4014_v7  ;;  %v1110_v16 = vsel %vm1068_vm12, %v1109_v49, %v1108_v36  ;;  %v1141_v29 = vsel %vm1068_vm12, %v1140_v19, %v1139_v48  ;;  %v1075_v4 = vperm.slane %v3839_v62, %v4029_v9  ;;  %v5155_v62 = vld [vmem:[#allocation84_spill] sm:$0xff] }
 0x382   : > { %5153 = vst [vmem:[#allocation95_spill] sm:$0xff] %v4043_v53  ;;  %v1113_v20 = vperm.slane %v3841_v5, %v4029_v9  ;;  %v1172_v22 = vsel %vm1068_vm12, %v1171_v6, %v1170_v61  ;;  %v1144_v11 = vperm.slane %v3843_v8, %v4029_v9  ;;  %v4059_v42 = vadd.s32 4294967184, %v3849_v39  ;;  %v5157_v8 = vld [vmem:[#allocation86_spill] sm:$0xff] }
 0x383   : > { %v3997_v60 = vpop.xlane.xlu2 %959  ;;  %v4021_v32 = vpop.xlane.xlu1 %929  ;;  %v1143_v18 = vsel %vm5031_vm13, %v1142_v52, %v1141_v29  ;;  %v1073_v13 = vsel %vm5031_vm13, %v1071_v0, %v1069_v3  ;;  %v1174_v2 = vsel %vm5031_vm13, %v1173_v55, %v1172_v22  ;;  %v1146_v46 = vperm.slane %v5155_v62, %v4043_v53 }
 0x384   : > { %5154 = vst [vmem:[#allocation96_spill] sm:$0xff] %v4059_v42  ;;  %v1112_v5 = vsel %vm5031_vm13, %v1111_v56, %v1110_v16  ;;  %v1175_v10 = vperm.slane %v5156_v28, %v4029_v9  ;;  %v1079_v40 = vperm.slane %v5157_v8, %v4043_v53  ;;  %v4072_v12 = vadd.s32 4294967176, %v3849_v39  ;;  %v4106_v56 = vld [vmem:[#allocation2] sm:$0xf] }
 0x385   : > { %v1077_v59 = vsel %vm5030_vm14, %v1075_v4, %v1073_v13  ;;  %v1114_v24 = vsel %vm5030_vm14, %v1113_v20, %v1112_v5  ;;  %v1115_v27 = vperm.slane %v3882_v23, %v4043_v53  ;;  %v1145_v43 = vsel %vm5030_vm14, %v1144_v11, %v1143_v18 }
 0x386   : > { %5158 = vst [vmem:[#allocation84_spill] sm:$0xff] %v4072_v12  ;;  %v1177_v41 = vperm.slane %v5159_v47, %v4043_v53  ;;  %v1083_v54 = vperm.slane %v3884_v34, %v4059_v42  ;;  %v1117_v14 = vperm.slane %v3957_v25, %v4059_v42  ;;  %v1147_v31 = vsel %vm1080_vm15, %v1146_v46, %v1145_v43 }
 0x387   : > { %v1148_v51 = vperm.slane %v3945_v38, %v4059_v42  ;;  %v1176_v49 = vsel %vm5030_vm14, %v1175_v10, %v1174_v2  ;;  %v1081_v19 = vsel %vm1080_vm15, %v1079_v40, %v1077_v59  ;;  %v1150_v48 = vperm.slane %v4021_v32, %v4072_v12 }
 0x388   : > { %v1179_v34 = vperm.slane %v3997_v60, %v4059_v42  ;;  %v1116_v21 = vsel %vm1080_vm15, %v1115_v27, %v1114_v24  ;;  %v1178_v6 = vsel %vm1080_vm15, %v1177_v41, %v1176_v49  ;;  %v1085_v52 = vsel %vm1084_vm0, %v1083_v54, %v1081_v19 }
 0x389   : > { %v1118_v0 = vsel %vm1084_vm0, %v1117_v14, %v1116_v21  ;;  %vm5052_vm14 = vcmask 1042434   ;;  %v1149_v32 = vsel %vm1084_vm0, %v1148_v51, %v1147_v31  ;;  %vm5051_vm13 = vcmask 1043459   ;;  %v5160_v14 = vld [vmem:[#allocation24_spill] sm:$0xff] }
 0x38a   : > { %v1151_v36 = vsel %vm1088_vm1, %v1150_v48, %v1149_v32  ;;  %v1180_v3 = vsel %vm1084_vm0, %v1179_v34, %v1178_v6  ;;  %v4128_v13 = vadd.s32 24, %v3886_v35  ;;  %v4131_v2 = vadd.s32 32, %v3886_v35  ;;  %v5161_v48 = vld [vmem:[#allocation36_spill] sm:$0xff] }
 0x38b   : > { %v866_v45 = vpop.xlane.xlu2 %865  ;;  %v962_v58 = vpop.xlane.xlu1 %961  ;;  %v4134_v62 = vadd.s32 16, %v3886_v35  ;;  %v4146_v5 = vadd.s32 48, %v3886_v35  ;;  %v4155_v28 = vadd.s32 40, %v3886_v35  ;;  %v4167_v8 = vadd.s32 56, %v3886_v35 }
 0x38c   : > { %v1087_v23 = vperm.slane %v866_v45, %v4072_v12  ;;  %v1181_v61 = vperm.slane %v962_v58, %v4072_v12  ;;  %v4170_v40 = vadd.s32 80, %v3886_v35  ;;  %v4179_v59 = vadd.s32 104, %v3886_v35 }
 0x38d   : > { %v4182_v24 = vadd.s32 96, %v3886_v35  ;;  %v4185_v27 = vadd.s32 72, %v3886_v35  ;;  %v4194_v43 = vadd.s32 112, %v3886_v35  ;;  %v4197_v47 = vadd.s32 88, %v3886_v35 }
 0x38e   : > { %v1089_v55 = vsel %vm1088_vm1, %v1087_v23, %v1085_v52  ;;  %v1182_v16 = vsel %vm1088_vm1, %v1181_v61, %v1180_v3  ;;  %v4203_v41 = vadd.s32 120, %v3886_v35  ;;  %v5162_v52 = vld [vmem:[#allocation49_spill] sm:$0xff] }
 0x393   : > { %v898_v25 = vpop.xlane.xlu2 %897 }
 0x394   : > { %v1119_v38 = vperm.slane %v898_v25, %v4072_v12 }
 0x396   : > { %v1120_v60 = vsel %vm1088_vm1, %v1119_v38, %v1118_v0 }
 0x397   : > { %v1184_v45 = vsel %vm1183_vm2, %v1120_v60, %v1089_v55 }
 0x398   : > { %v1186_v29 = vsel %vm5052_vm14, %v1151_v36, %v1184_v45  ;;  %v5163_v45 = vld [vmem:[#allocation60_spill] sm:$0xff]  ;;  %vm5238_vm14 = vcmask 851712  }
 0x399   : > { %v1188_v4 = vsel %vm5051_vm13, %v1182_v16, %v1186_v29  ;;  %vm5234_vm13 = vcmask 786112  }
 0x39a   : > { %v4113_v20 = vmax.f32 %v4106_v56, %v1188_v4 }
 0x39c   : > { %v4118_v11 = vperm.slane %v4113_v20, 0  ;;  %v4121_v18 = vperm.slane %v4113_v20, 1  ;;  %2462 = vst [vmem:[#allocation2] sm:$0xf] %v4113_v20  ;;  %v4140_v46 = vperm.slane %v4113_v20, 2  ;;  %v4161_v10 = vperm.slane %v4113_v20, 3 }
 0x39e   : > { %1344 = vperm.xlu0 %2998, %v4121_v18   ;;  %1205 = vperm.xlu1 %2975, %v4118_v11  }
 0x39f   : > { %1199 = vperm.xlu2 %2974, %v4118_v11  }
 0x3a6   : > { %3009 = vset.pattern.permute.xlu0 %v4128_v13  ;;  %2978 = vset.pattern.permute.xlu1 %v4131_v2 }
 0x3a7   : > { %2976 = vset.pattern.permute.xlu2 %v4134_v62 }
 0x3ae   : > { %1411 = vperm.xlu0 %3009, %v4140_v46   ;;  %1223 = vperm.xlu1 %2978, %v4118_v11  }
 0x3af   : > { %1211 = vperm.xlu2 %2976, %v4118_v11  }
 0x3b6   : > { %3014 = vset.pattern.permute.xlu0 %v3904_v17  ;;  %2980 = vset.pattern.permute.xlu1 %v4146_v5 }
 0x3b7   : > { %2977 = vset.pattern.permute.xlu2 %v4128_v13 }
 0x3be   : > { %1441 = vperm.xlu0 %3014, %v4140_v46   ;;  %1235 = vperm.xlu1 %2980, %v4118_v11  }
 0x3bf   : > { %1217 = vperm.xlu2 %2977, %v4118_v11  }
 0x3c6   : > { %3023 = vset.pattern.permute.xlu0 %v4134_v62  ;;  %2982 = vset.pattern.permute.xlu1 %v3904_v17 }
 0x3c7   : > { %2979 = vset.pattern.permute.xlu2 %v4155_v28 }
 0x3ce   : > { %1502 = vperm.xlu0 %3023, %v4161_v10   ;;  %1247 = vperm.xlu1 %2982, %v4118_v11  }
 0x3cf   : > { %1229 = vperm.xlu2 %2979, %v4118_v11  }
 0x3d6   : > { %3028 = vset.pattern.permute.xlu0 %v4167_v8  ;;  %2984 = vset.pattern.permute.xlu1 %v4170_v40 }
 0x3d7   : > { %2981 = vset.pattern.permute.xlu2 %v4167_v8 }
 0x3de   : > { %1532 = vperm.xlu0 %3028, %v4161_v10   ;;  %1259 = vperm.xlu1 %2984, %v4118_v11  }
 0x3df   : > { %1241 = vperm.xlu2 %2981, %v4118_v11  }
 0x3e6   : > { %3029 = vset.pattern.permute.xlu0 %v4179_v59  ;;  %2986 = vset.pattern.permute.xlu1 %v4182_v24 }
 0x3e7   : > { %2983 = vset.pattern.permute.xlu2 %v4185_v27 }
 0x3ee   : > { %1471 = vperm.xlu0 %3029, %v4140_v46   ;;  %1271 = vperm.xlu1 %2986, %v4118_v11  }
 0x3ef   : > { %1253 = vperm.xlu2 %2983, %v4118_v11  }
 0x3f6   : > { %1568 = vperm.xlu0 %3029, %v4161_v10   ;;  %2988 = vset.pattern.permute.xlu1 %v4194_v43 }
 0x3f7   : > { %2985 = vset.pattern.permute.xlu2 %v4197_v47 }
 0x3f9   : > { %v4215_v51 = vpop.permute.xlu2 %1199 }
 0x3fe   : > { %1283 = vperm.xlu1 %2988, %v4118_v11   ;;  %3037 = vset.pattern.permute.xlu0 %v4203_v41 }
 0x3ff   : > { %1265 = vperm.xlu2 %2985, %v4118_v11  }
 0x406   : > { %2990 = vset.pattern.permute.xlu1 %v3886_v35 }
 0x407   : > { %2987 = vset.pattern.permute.xlu2 %v4179_v59 }
 0x409   : > { %v4222_v19 = vpop.permute.xlu2 %1211 }
 0x40e   : > { %1296 = vperm.xlu1 %2990, %v4121_v18  }
 0x40f   : > { %1277 = vperm.xlu2 %2987, %v4118_v11  }
 0x410   : > { %v1206_v54 = vpop.permute.xlu1 %1205  ;;  %v1345_v9 = vpop.permute.xlu0 %1344 }
 0x411   : > { %v1583_v58 = vsub.f32 %v5160_v14, %v1206_v54 }
 0x413   : > { %v1648_v31 = vmul.f32 1.442695, %v1583_v58 }
 0x415   : > { %3038 = vpow2.f32 %v1648_v31  ;;  %v5164_v31 = vld [vmem:[#allocation73_spill] sm:$0xff] }
 0x416   : > { %2992 = vset.pattern.permute.xlu1 %v4134_v62 }
 0x417   : > { %2989 = vset.pattern.permute.xlu2 %v4203_v41 }
 0x419   : > { %v4227_v21 = vpop.permute.xlu2 %1217 }
 0x41b   : > { %v4218_v23 = vpop.eup %3038 }
 0x41e   : > { %1308 = vperm.xlu1 %2992, %v4121_v18  }
 0x41f   : > { %1289 = vperm.xlu2 %2989, %v4118_v11  }
 0x420   : > { %1778 = vadd.xlane.f32.xlu0 %v4218_v23  ;;  %v1224_v49 = vpop.permute.xlu1 %1223 }
 0x421   : > { %v1586_v34 = vsub.f32 %v5161_v48, %v1224_v49 }
 0x423   : > { %v1654_v25 = vmul.f32 1.442695, %v1586_v34 }
 0x425   : > { %3040 = vpow2.f32 %v1654_v25  ;;  %v5165_v25 = vld [vmem:[#allocation76_spill] sm:$0xff] }
 0x426   : > { %2994 = vset.pattern.permute.xlu1 %v4131_v2 }
 0x427   : > { %2991 = vset.pattern.permute.xlu2 %v3901_v15 }
 0x429   : > { %v4234_v38 = vpop.permute.xlu2 %1229 }
 0x42b   : > { %v4229_v61 = vpop.eup %3040 }
 0x42c   : > { %1784 = vadd.xlane.f32.xlu0 %v4229_v61 }
 0x42e   : > { %1320 = vperm.xlu1 %2994, %v4121_v18  }
 0x42f   : > { %1302 = vperm.xlu2 %2991, %v4121_v18  }
 0x430   : > { %v4241_v55 = vpop.permute.xlu1 %1235 }
 0x436   : > { %2996 = vset.pattern.permute.xlu1 %v4146_v5 }
 0x437   : > { %2993 = vset.pattern.permute.xlu2 %v4128_v13 }
 0x439   : > { %v1242_v6 = vpop.permute.xlu2 %1241 }
 0x43a   : > { %v1589_v0 = vsub.f32 %v5162_v52, %v1242_v6 }
 0x43c   : > { %v1660_v32 = vmul.f32 1.442695, %v1589_v0 }
 0x43e   : > { %3042 = vpow2.f32 %v1660_v32  ;;  %1332 = vperm.xlu1 %2996, %v4121_v18   ;;  %v5166_v32 = vld [vmem:[#allocation68_spill] sm:$0xff] }
 0x43f   : > { %1314 = vperm.xlu2 %2993, %v4121_v18  }
 0x440   : > { %v4248_v36 = vpop.permute.xlu1 %1247 }
 0x444   : > { %v4243_v60 = vpop.eup %3042 }
 0x445   : > { %1790 = vadd.xlane.f32.xlu0 %v4243_v60 }
 0x446   : > { %2999 = vset.pattern.permute.xlu1 %v4185_v27 }
 0x447   : > { %2995 = vset.pattern.permute.xlu2 %v4155_v28 }
 0x449   : > { %v1254_v4 = vpop.permute.xlu2 %1253 }
 0x44e   : > { %1350 = vperm.xlu1 %2999, %v4121_v18  }
 0x44f   : > { %1326 = vperm.xlu2 %2995, %v4121_v18  }
 0x450   : > { %v1260_v3 = vpop.permute.xlu1 %1259 }
 0x451   : > { %v1592_v16 = vsub.f32 %v5163_v45, %v1260_v3  ;;  %v5167_v45 = vld [vmem:[#allocation81_spill] sm:$0xff] }
 0x453   : > { %v1666_v29 = vmul.f32 1.442695, %v1592_v16 }
 0x455   : > { %3044 = vpow2.f32 %v1666_v29 }
 0x456   : > { %3001 = vset.pattern.permute.xlu1 %v4197_v47 }
 0x457   : > { %2997 = vset.pattern.permute.xlu2 %v4167_v8 }
 0x459   : > { %v1266_v54 = vpop.permute.xlu2 %1265 }
 0x45b   : > { %v4255_v11 = vpop.eup %3044 }
 0x45c   : > { %1796 = vadd.xlane.f32.xlu0 %v4255_v11 }
 0x45e   : > { %1362 = vperm.xlu1 %3001, %v4121_v18  }
 0x45f   : > { %1338 = vperm.xlu2 %2997, %v4121_v18  }
 0x460   : > { %v1272_v14 = vpop.permute.xlu1 %1271 }
 0x461   : > { %v1594_v3 = vsub.f32 %v5166_v32, %v1272_v14 }
 0x466   : > { %3003 = vset.pattern.permute.xlu1 %v4179_v59 }
 0x467   : > { %3000 = vset.pattern.permute.xlu2 %v4170_v40 }
 0x469   : > { %v1278_v58 = vpop.permute.xlu2 %1277 }
 0x46a   : > { %v1595_v49 = vsub.f32 %v5164_v31, %v1278_v58  ;;  %v1670_v58 = vmul.f32 1.442695, %v1594_v3 }
 0x46c   : > { %v1672_v48 = vmul.f32 1.442695, %v1595_v49  ;;  %v5168_v49 = vld [vmem:[#allocation65_spill] sm:$0xff] }
 0x46e   : > { %3046 = vpow2.f32 %v1672_v48  ;;  %1374 = vperm.xlu1 %3003, %v4121_v18   ;;  %v1593_v48 = vsub.f32 %v5168_v49, %v1266_v54 }
 0x46f   : > { %1356 = vperm.xlu2 %3000, %v4121_v18  }
 0x470   : > { %v1284_v34 = vpop.permute.xlu1 %1283 }
 0x471   : > { %v1596_v6 = vsub.f32 %v5165_v25, %v1284_v34  ;;  %v5169_v25 = vld [vmem:[#allocation21_spill] sm:$0xff] }
 0x473   : > { %v1674_v0 = vmul.f32 1.442695, %v1596_v6 }
 0x474   : > { %v3047_v52 = vpop.eup %3046 }
 0x475   : > { %1802 = vadd.xlane.f32.xlu0 %v3047_v52  ;;  %3048 = vpow2.f32 %v1674_v0  ;;  %v2111_v49 = vpack.c.bf16 %v3047_v52, %v3047_v52 }
 0x476   : > { %3005 = vset.pattern.permute.xlu1 %v4203_v41 }
 0x477   : > { %3002 = vset.pattern.permute.xlu2 %v4182_v24 }
 0x479   : > { %v1290_v59 = vpop.permute.xlu2 %1289 }
 0x47a   : > { %v1597_v16 = vsub.f32 %v5167_v45, %v1290_v59  ;;  %v1668_v59 = vmul.f32 1.442695, %v1593_v48 }
 0x47b   : > { %v4272_v31 = vpop.eup %3048 }
 0x47c   : > { %v1676_v29 = vmul.f32 1.442695, %v1597_v16  ;;  %v2112_v14 = vpack.c.bf16 %v4272_v31, %v4272_v31  ;;  %v5170_v16 = vld [vmem:[#allocation57_spill] sm:$0xff] }
 0x47e   : > { %3050 = vpow2.f32 %v1676_v29  ;;  %1386 = vperm.xlu1 %3005, %v4121_v18   ;;  %v2192_v54 = vunpack.c.l.b16 %v2112_v14  ;;  %v1591_v29 = vsub.f32 %v5170_v16, %v1254_v4  ;;  %v2191_v14 = vunpack.c.l.b16 %v2111_v49 }
 0x47f   : > { %1368 = vperm.xlu2 %3002, %v4121_v18   ;;  %3052 = vpow2.f32 %v1670_v58  ;;  %v2108_v16 = vpack.c.bf16 %v4255_v11, %v4255_v11  ;;  %v5174_v11 = vld [vmem:[#allocation35_spill] sm:$0xff] }
 0x480   : > { %v1297_v34 = vpop.permute.xlu1 %1296 }
 0x481   : > { %v1598_v6 = vsub.f32 %v5169_v25, %v1297_v34  ;;  %v5171_v34 = vld [vmem:[#allocation52_spill] sm:$0xff]  ;;  %v2188_v49 = vunpack.c.l.b16 %v2108_v16  ;;  %v5175_v16 = vld [vmem:[#allocation33_spill] sm:$0xff] }
 0x482   : > { %v1590_v48 = vsub.f32 %v5171_v34, %v4248_v36 }
 0x483   : > { %v1678_v22 = vmul.f32 1.442695, %v1598_v6  ;;  %v1664_v6 = vmul.f32 1.442695, %v1591_v29 }
 0x484   : > { %v4278_v0 = vpop.eup %3050  ;;  %v1662_v12 = vmul.f32 1.442695, %v1590_v48  ;;  %v5173_v48 = vld [vmem:[#allocation41_spill] sm:$0xff] }
 0x485   : > { %3054 = vpow2.f32 %v1678_v22  ;;  %v2113_v32 = vpack.c.bf16 %v4278_v0, %v4278_v0  ;;  %v4284_v45 = vpop.eup %3052 }
 0x486   : > { %3007 = vset.pattern.permute.xlu1 %v3901_v15  ;;  %3056 = vpow2.f32 %v1668_v59  ;;  %v2110_v25 = vpack.c.bf16 %v4284_v45, %v4284_v45 }
 0x487   : > { %3004 = vset.pattern.permute.xlu2 %v4194_v43  ;;  %v2193_v3 = vunpack.c.l.b16 %v2113_v32  ;;  %3058 = vpow2.f32 %v1664_v6 }
 0x488   : > { %v2190_v4 = vunpack.c.l.b16 %v2110_v25  ;;  %3060 = vpow2.f32 %v1662_v12  ;;  %v1587_v25 = vsub.f32 %v5173_v48, %v4234_v38  ;;  %v2105_v48 = vpack.c.bf16 %v4243_v60, %v4243_v60 }
 0x489   : > { %v2201_v58 = vpack.c.b16 %v2193_v3, %v2192_v54  ;;  %v4298_v36 = vpop.permute.xlu2 %1302  ;;  %v5172_v54 = vld [vmem:[#allocation44_spill] sm:$0xff] }
 0x48a   : > { %v2200_v52 = vpack.c.b16 %v2191_v14, %v2190_v4  ;;  %v1588_v3 = vsub.f32 %v5172_v54, %v4241_v55 }
 0x48b   : > { %v4289_v22 = vpop.eup %3054  ;;  %2210 = vmatpush.bf16.xpose.msrb.mxu0 %v2201_v58 }
 0x48c   : > { %1808 = vadd.xlane.f32.xlu0 %v4289_v22  ;;  %v4294_v32 = vpop.eup %3056 }
 0x48d   : > { %v2109_v59 = vpack.c.bf16 %v4294_v32, %v4294_v32  ;;  %v4306_v58 = vpop.eup %3058 }
 0x48e   : > { %1399 = vperm.xlu1 %3007, %v4140_v46   ;;  %v4310_v34 = vpop.eup %3060  ;;  %v2107_v6 = vpack.c.bf16 %v4306_v58, %v4306_v58 }
 0x48f   : > { %1380 = vperm.xlu2 %3004, %v4121_v18   ;;  %v2189_v29 = vunpack.c.l.b16 %v2109_v59  ;;  %v1658_v18 = vmul.f32 1.442695, %v1588_v3  ;;  %v2106_v4 = vpack.c.bf16 %v4310_v34, %v4310_v34 }
 0x490   : > { %v2187_v54 = vunpack.c.l.b16 %v2107_v6 }
 0x491   : > { %v2199_v12 = vpack.c.b16 %v2189_v29, %v2188_v49  ;;  %3062 = vpow2.f32 %v1658_v18  ;;  %v2186_v38 = vunpack.c.l.b16 %v2106_v4  ;;  %v1585_v29 = vsub.f32 %v5175_v16, %v4227_v21  ;;  %v4325_v18 = vpop.permute.xlu1 %1308 }
 0x492   : > { %v2185_v21 = vunpack.c.l.b16 %v2105_v48  ;;  %v2102_v16 = vpack.c.bf16 %v4229_v61, %v4229_v61 }
 0x493   : > { %2211 = vmatpush.bf16.xpose.msrb.mxu0 %v2200_v52  ;;  %v1656_v52 = vmul.f32 1.442695, %v1587_v25  ;;  %v2198_v49 = vpack.c.b16 %v2187_v54, %v2186_v38  ;;  %v5176_v25 = vld [vmem:[#allocation27_spill] sm:$0xff]  ;;  %v5177_v54 = vld [vmem:[#allocation20_spill] sm:$0xff] }
 0x494   : > { %v1582_v38 = vsub.f32 %v5177_v54, %v4215_v51  ;;  %v2182_v48 = vunpack.c.l.b16 %v2102_v16 }
 0x496   : > { %3010 = vset.pattern.permute.xlu1 %v4131_v2 }
 0x497   : > { %3006 = vset.pattern.permute.xlu2 %v3886_v35  ;;  %v4321_v3 = vpop.eup %3062 }
 0x499   : > { %v1315_v55 = vpop.permute.xlu2 %1314 }
 0x49a   : > { %v1601_v14 = vsub.f32 %v5174_v11, %v1315_v55  ;;  %v1584_v55 = vsub.f32 %v5176_v25, %v4222_v19  ;;  %v1652_v11 = vmul.f32 1.442695, %v1585_v29 }
 0x49b   : > { %2212 = vmatpush.bf16.xpose.msrb.mxu0 %v2199_v12  ;;  %v2104_v12 = vpack.c.bf16 %v4321_v3, %v4321_v3 }
 0x49c   : > { %v1684_v59 = vmul.f32 1.442695, %v1601_v14  ;;  %v1650_v4 = vmul.f32 1.442695, %v1584_v55 }
 0x49d   : > { %v2184_v60 = vunpack.c.l.b16 %v2104_v12  ;;  %v5178_v12 = vld [vmem:[#allocation46_spill] sm:$0xff] }
 0x49e   : > { %3064 = vpow2.f32 %v1684_v59  ;;  %1417 = vperm.xlu1 %3010, %v4140_v46  }
 0x49f   : > { %1393 = vperm.xlu2 %3006, %v4140_v46   ;;  %3066 = vpow2.f32 %v1656_v52  ;;  %v2197_v52 = vpack.c.b16 %v2185_v21, %v2184_v60 }
 0x4a0   : > { %3068 = vpow2.f32 %v1652_v11  ;;  %v4340_v19 = vpop.permute.xlu1 %1320 }
 0x4a1   : > { %3070 = vpow2.f32 %v1650_v4 }
 0x4a3   : > { %2213 = vmatpush.bf16.xpose.msrb.mxu0 %v2198_v49 }
 0x4a4   : > { %v4333_v6 = vpop.eup %3064 }
 0x4a5   : > { %1814 = vadd.xlane.f32.xlu0 %v4333_v6  ;;  %v4336_v14 = vpop.eup %3066 }
 0x4a6   : > { %3012 = vset.pattern.permute.xlu1 %v4146_v5  ;;  %v2103_v59 = vpack.c.bf16 %v4336_v14, %v4336_v14  ;;  %v4348_v49 = vpop.eup %3068 }
 0x4a7   : > { %3008 = vset.pattern.permute.xlu2 %v4134_v62  ;;  %v1646_v62 = vmul.f32 1.442695, %v1582_v38  ;;  %v4352_v25 = vpop.eup %3070  ;;  %v2101_v21 = vpack.c.bf16 %v4348_v49, %v4348_v49  ;;  %v2099_v38 = vpack.c.bf16 %v4218_v23, %v4218_v23 }
 0x4a8   : > { %v2183_v29 = vunpack.c.l.b16 %v2103_v59  ;;  %v2100_v4 = vpack.c.bf16 %v4352_v25, %v4352_v25 }
 0x4a9   : > { %3072 = vpow2.f32 %v1646_v62  ;;  %v2181_v60 = vunpack.c.l.b16 %v2101_v21  ;;  %v2179_v62 = vunpack.c.l.b16 %v2099_v38  ;;  %v5180_v38 = vld [vmem:[#allocation70_spill] sm:$0xff] }
 0x4aa   : > { %v2196_v51 = vpack.c.b16 %v2183_v29, %v2182_v48 }
 0x4ab   : > { %2214 = vmatpush.bf16.xpose.msrb.mxu0 %v2197_v52  ;;  %v2180_v52 = vunpack.c.l.b16 %v2100_v4 }
 0x4ad   : > { %v2195_v54 = vpack.c.b16 %v2181_v60, %v2180_v52 }
 0x4ae   : > { %1429 = vperm.xlu1 %3012, %v4140_v46  }
 0x4af   : > { %1405 = vperm.xlu2 %3008, %v4140_v46   ;;  %v4361_v59 = vpop.eup %3072 }
 0x4b0   : > { %v1333_v55 = vpop.permute.xlu1 %1332  ;;  %v2098_v29 = vpack.c.bf16 %v4361_v59, %v4361_v59 }
 0x4b1   : > { %v1604_v11 = vsub.f32 %v5178_v12, %v1333_v55  ;;  %v4372_v12 = vpop.permute.xlu2 %1326 }
 0x4b2   : > { %v2178_v48 = vunpack.c.l.b16 %v2098_v29 }
 0x4b3   : > { %v1690_v61 = vmul.f32 1.442695, %v1604_v11  ;;  %2215 = vmatpush.bf16.xpose.msrb.mxu0 %v2196_v51  ;;  %v5179_v11 = vld [vmem:[#allocation59_spill] sm:$0xff] }
 0x4b4   : > { %v2194_v51 = vpack.c.b16 %v2179_v62, %v2178_v48 }
 0x4b5   : > { %3074 = vpow2.f32 %v1690_v61  ;;  %v460_v61 = vld [vmem:[%s3508_s5] sm:$0xf] }
 0x4b6   : > { %3015 = vset.pattern.permute.xlu1 %v4185_v27 }
 0x4b7   : > { %3011 = vset.pattern.permute.xlu2 %v4155_v28 }
 0x4b9   : > { %v4378_v4 = vpop.permute.xlu2 %1338 }
 0x4bb   : > { %v4365_v16 = vpop.eup %3074  ;;  %2216 = vmatpush.bf16.xpose.msrb.mxu0 %v2195_v54 }
 0x4bc   : > { %1820 = vadd.xlane.f32.xlu0 %v4365_v16 }
 0x4be   : > { %1447 = vperm.xlu1 %3015, %v4140_v46  }
 0x4bf   : > { %1423 = vperm.xlu2 %3011, %v4140_v46  }
 0x4c0   : > { %v1351_v55 = vpop.permute.xlu1 %1350 }
 0x4c1   : > { %v1607_v23 = vsub.f32 %v5179_v11, %v1351_v55 }
 0x4c3   : > { %v1696_v21 = vmul.f32 1.442695, %v1607_v23  ;;  %2217 = vmatpush.bf16.xpose.msrb.mxu0 %v2194_v51  ;;  %v5181_v23 = vld [vmem:[#allocation78_spill] sm:$0xff] }
 0x4c5   : > { %3076 = vpow2.f32 %v1696_v21 }
 0x4c6   : > { %3017 = vset.pattern.permute.xlu1 %v4197_v47 }
 0x4c7   : > { %3013 = vset.pattern.permute.xlu2 %v4167_v8 }
 0x4c9   : > { %v1357_v52 = vpop.permute.xlu2 %1356 }
 0x4ca   : > { %2218 = vmatmul.bf16.vlgmr.msrb.gmra.mxu0 %v460_v61  ;;  %v5182_v61 = vld [vmem:[#allocation75_spill] sm:$0xff] }
 0x4cb   : > { %v4380_v60 = vpop.eup %3076 }
 0x4cc   : > { %1826 = vadd.xlane.f32.xlu0 %v4380_v60 }
 0x4ce   : > { %1459 = vperm.xlu1 %3017, %v4140_v46  }
 0x4cf   : > { %1435 = vperm.xlu2 %3013, %v4140_v46  }
 0x4d0   : > { %v1363_v62 = vpop.permute.xlu1 %1362 }
 0x4d6   : > { %3019 = vset.pattern.permute.xlu1 %v4194_v43 }
 0x4d7   : > { %3016 = vset.pattern.permute.xlu2 %v4170_v40 }
 0x4d9   : > { %v1369_v54 = vpop.permute.xlu2 %1368 }
 0x4da   : > { %v1610_v8 = vsub.f32 %v5180_v38, %v1369_v54 }
 0x4dc   : > { %v1702_v29 = vmul.f32 1.442695, %v1610_v8  ;;  %v5183_v8 = vld [vmem:[#allocation83_spill] sm:$0xff] }
 0x4de   : > { %3078 = vpow2.f32 %v1702_v29  ;;  %1477 = vperm.xlu1 %3019, %v4140_v46  }
 0x4df   : > { %1453 = vperm.xlu2 %3016, %v4140_v46  }
 0x4e0   : > { %v1375_v55 = vpop.permute.xlu1 %1374 }
 0x4e1   : > { %v1611_v54 = vsub.f32 %v5182_v61, %v1375_v55  ;;  %v5185_v55 = vld [vmem:[#allocation62_spill] sm:$0xff] }
 0x4e3   : > { %v1704_v42 = vmul.f32 1.442695, %v1611_v54 }
 0x4e4   : > { %v3079_v48 = vpop.eup %3078 }
 0x4e5   : > { %1832 = vadd.xlane.f32.xlu0 %v3079_v48 }
 0x4e6   : > { %3021 = vset.pattern.permute.xlu1 %v3886_v35 }
 0x4e7   : > { %3018 = vset.pattern.permute.xlu2 %v4182_v24 }
 0x4e9   : > { %v1381_v11 = vpop.permute.xlu2 %1380 }
 0x4ea   : > { %v1612_v51 = vsub.f32 %v5181_v23, %v1381_v11  ;;  %v5184_v11 = vld [vmem:[#allocation67_spill] sm:$0xff] }
 0x4eb   : > { %v1609_v23 = vsub.f32 %v5184_v11, %v1363_v62  ;;  %v1412_v62 = vpop.permute.xlu0 %1411  ;;  %v5186_v11 = vld [vmem:[#allocation54_spill] sm:$0xff] }
 0x4ec   : > { %v1706_v21 = vmul.f32 1.442695, %v1612_v51  ;;  %v1608_v51 = vsub.f32 %v5185_v55, %v1357_v52  ;;  %v1606_v55 = vsub.f32 %v5186_v11, %v1345_v9 }
 0x4ee   : > { %1490 = vperm.xlu1 %3021, %v4161_v10   ;;  %3080 = vpow2.f32 %v1706_v21 }
 0x4ef   : > { %1465 = vperm.xlu2 %3018, %v4140_v46  }
 0x4f0   : > { %v1387_v38 = vpop.permute.xlu1 %1386 }
 0x4f1   : > { %v1613_v29 = vsub.f32 %v5183_v8, %v1387_v38  ;;  %v1700_v38 = vmul.f32 1.442695, %v1609_v23 }
 0x4f3   : > { %v1708_v53 = vmul.f32 1.442695, %v1613_v29 }
 0x4f4   : > { %v4398_v35 = vpop.eup %3080 }
 0x4f5   : > { %3082 = vpow2.f32 %v1708_v53  ;;  %v2128_v21 = vpack.c.bf16 %v4398_v35, %v4398_v35 }
 0x4f6   : > { %3024 = vset.pattern.permute.xlu1 %v4128_v13  ;;  %3084 = vpow2.f32 %v1704_v42  ;;  %v1698_v13 = vmul.f32 1.442695, %v1608_v51  ;;  %v2126_v51 = vpack.c.bf16 %v3079_v48, %v3079_v48 }
 0x4f7   : > { %3020 = vset.pattern.permute.xlu2 %v4203_v41  ;;  %v2253_v8 = vunpack.c.l.b16 %v2128_v21  ;;  %3086 = vpow2.f32 %v1700_v38 }
 0x4f8   : > { %3088 = vpow2.f32 %v1698_v13 }
 0x4f9   : > { %v4412_v23 = vpop.permute.xlu2 %1393 }
 0x4fb   : > { %v3083_v61 = vpop.eup %3082 }
 0x4fc   : > { %1838 = vadd.xlane.f32.xlu0 %v3083_v61  ;;  %v2129_v54 = vpack.c.bf16 %v3083_v61, %v3083_v61  ;;  %v4405_v53 = vpop.eup %3084  ;;  %v5187_v61 = vld [vmem:[#allocation32_spill] sm:$0xff] }
 0x4fd   : > { %v2127_v52 = vpack.c.bf16 %v4405_v53, %v4405_v53  ;;  %v1617_v7 = vsub.f32 %v5187_v61, %v1412_v62  ;;  %v4415_v21 = vpop.eup %3086 }
 0x4fe   : > { %1508 = vperm.xlu1 %3024, %v4161_v10   ;;  %v2254_v29 = vunpack.c.l.b16 %v2129_v54  ;;  %v1694_v54 = vmul.f32 1.442695, %v1606_v55  ;;  %v2125_v62 = vpack.c.bf16 %v4415_v21, %v4415_v21 }
 0x4ff   : > { %1483 = vperm.xlu2 %3020, %v4140_v46   ;;  %v2252_v63 = vunpack.c.l.b16 %v2127_v52  ;;  %v1716_v38 = vmul.f32 1.442695, %v1617_v7  ;;  %v2251_v46 = vunpack.c.l.b16 %v2126_v51 }
 0x500   : > { %v2262_v42 = vpack.c.b16 %v2254_v29, %v2253_v8  ;;  %v4418_v8 = vpop.eup %3088  ;;  %v5188_v29 = vld [vmem:[#allocation51_spill] sm:$0xff]  ;;  %3090 = vpow2.f32 %v1694_v54  ;;  %v2250_v55 = vunpack.c.l.b16 %v2125_v62 }
 0x501   : > { %v1605_v9 = vsub.f32 %v5188_v29, %v4378_v4  ;;  %v2261_v13 = vpack.c.b16 %v2252_v63, %v2251_v46  ;;  %3092 = vpow2.f32 %v1716_v38  ;;  %v2124_v7 = vpack.c.bf16 %v4418_v8, %v4418_v8  ;;  %v5190_v4 = vld [vmem:[#allocation43_spill] sm:$0xff]  ;;  %v5191_v46 = vld [vmem:[#allocation38_spill] sm:$0xff] }
 0x502   : > { %2271 = vmatpush.bf16.xpose.msrb.mxu1 %v2262_v42  ;;  %v5189_v42 = vld [vmem:[#allocation29_spill] sm:$0xff]  ;;  %v1603_v61 = vsub.f32 %v5190_v4, %v4372_v12  ;;  %v2123_v38 = vpack.c.bf16 %v4380_v60, %v4380_v60  ;;  %v1602_v29 = vsub.f32 %v5191_v46, %v4340_v19  ;;  %v1442_v46 = vpop.permute.xlu0 %1441 }
 0x506   : > { %3026 = vset.pattern.permute.xlu1 %v4155_v28  ;;  %v1692_v28 = vmul.f32 1.442695, %v1605_v9  ;;  %v4429_v63 = vpop.eup %3090 }
 0x507   : > { %3022 = vset.pattern.permute.xlu2 %v3901_v15  ;;  %v2249_v15 = vunpack.c.l.b16 %v2124_v7  ;;  %v4434_v51 = vpop.eup %3092  ;;  %v2122_v9 = vpack.c.bf16 %v4429_v63, %v4429_v63 }
 0x508   : > { %v2133_v12 = vpack.c.bf16 %v4434_v51, %v4434_v51 }
 0x509   : > { %v1406_v48 = vpop.permute.xlu2 %1405  ;;  %v2260_v54 = vpack.c.b16 %v2250_v55, %v2249_v15  ;;  %v2247_v60 = vunpack.c.l.b16 %v2122_v9  ;;  %v5192_v15 = vld [vmem:[#allocation28_spill] sm:$0xff] }
 0x50a   : > { %v1616_v52 = vsub.f32 %v5189_v42, %v1406_v48  ;;  %2272 = vmatpush.bf16.xpose.msrb.mxu1 %v2261_v13  ;;  %v1688_v13 = vmul.f32 1.442695, %v1603_v61  ;;  %v2248_v48 = vunpack.c.l.b16 %v2123_v38  ;;  %v1600_v4 = vsub.f32 %v5192_v15, %v4325_v18 }
 0x50c   : > { %v1714_v11 = vmul.f32 1.442695, %v1616_v52  ;;  %v1686_v52 = vmul.f32 1.442695, %v1602_v29 }
 0x50e   : > { %3094 = vpow2.f32 %v1714_v11  ;;  %1520 = vperm.xlu1 %3026, %v4161_v10   ;;  %v2259_v11 = vpack.c.b16 %v2248_v48, %v2247_v60 }
 0x50f   : > { %3096 = vpow2.f32 %v1692_v28  ;;  %1496 = vperm.xlu2 %3022, %v4161_v10   ;;  %v4450_v28 = vunpack.c.l.b16 %v2133_v12  ;;  %v1682_v12 = vmul.f32 1.442695, %v1600_v4 }
 0x510   : > { %3098 = vpow2.f32 %v1688_v13 }
 0x511   : > { %3100 = vpow2.f32 %v1686_v52 }
 0x512   : > { %2273 = vmatpush.bf16.xpose.msrb.mxu1 %v2260_v54  ;;  %v5193_v54 = vld [vmem:[#allocation40_spill] sm:$0xff] }
 0x514   : > { %v3095_v62 = vpop.eup %3094 }
 0x515   : > { %v4444_v42 = vpop.eup %3096  ;;  %1844 = vadd.xlane.f32.xlu0 %v3095_v62  ;;  %v2132_v7 = vpack.c.bf16 %v3095_v62, %v3095_v62  ;;  %v5194_v62 = vld [vmem:[#allocation53_spill] sm:$0xff] }
 0x516   : > { %3030 = vset.pattern.permute.xlu1 %v3904_v17  ;;  %v2121_v55 = vpack.c.bf16 %v4444_v42, %v4444_v42  ;;  %v4461_v13 = vpop.eup %3098  ;;  %v1622_v48 = vsub.f32 %v5194_v62, %v1442_v46 }
 0x517   : > { %3025 = vset.pattern.permute.xlu2 %v4131_v2  ;;  %v4448_v19 = vunpack.c.l.b16 %v2132_v7  ;;  %v2120_v2 = vpack.c.bf16 %v4365_v16, %v4365_v16  ;;  %v4465_v52 = vpop.eup %3100  ;;  %v5195_v7 = vld [vmem:[#allocation22_spill] sm:$0xff]  ;;  %v4470_v16 = vpop.permute.xlu1 %1399 }
 0x518   : > { %v2246_v9 = vunpack.c.l.b16 %v2121_v55  ;;  %v1599_v60 = vsub.f32 %v5195_v7, %v4298_v36  ;;  %v2119_v55 = vpack.c.bf16 %v4461_v13, %v4461_v13  ;;  %v1726_v15 = vmul.f32 1.442695, %v1622_v48 }
 0x519   : > { %v1424_v61 = vpop.permute.xlu2 %1423  ;;  %v2245_v18 = vunpack.c.l.b16 %v2120_v2  ;;  %v2118_v4 = vpack.c.bf16 %v4465_v52, %v4465_v52 }
 0x51a   : > { %v1619_v38 = vsub.f32 %v5193_v54, %v1424_v61  ;;  %2274 = vmatpush.bf16.xpose.msrb.mxu1 %v2259_v11  ;;  %v1680_v61 = vmul.f32 1.442695, %v1599_v60  ;;  %v2114_v60 = vpack.c.bf16 %v4289_v22, %v4289_v22 }
 0x51b   : > { %v2258_v11 = vpack.c.b16 %v2246_v9, %v2245_v18  ;;  %v2243_v36 = vunpack.c.l.b16 %v2118_v4  ;;  %v2117_v9 = vpack.c.bf16 %v4333_v6, %v4333_v6 }
 0x51c   : > { %v1720_v29 = vmul.f32 1.442695, %v1619_v38  ;;  %v2244_v38 = vunpack.c.l.b16 %v2119_v55  ;;  %v5196_v55 = vsub.f32 %v4106_v56, %v4113_v20  ;;  %v2239_v4 = vunpack.c.l.b16 %v2114_v60 }
 0x51d   : > { %v2242_v48 = vunpack.c.l.b16 %v2117_v9 }
 0x51e   : > { %3102 = vpow2.f32 %v1720_v29  ;;  %1538 = vperm.xlu1 %3030, %v4161_v10   ;;  %v2257_v29 = vpack.c.b16 %v2244_v38, %v2243_v36  ;;  %v4511_v36 = vld [vmem:[%s3508_s5 + $0x4] sm:$0xf] }
 0x51f   : > { %1514 = vperm.xlu2 %3025, %v4161_v10   ;;  %3104 = vpow2.f32 %v1682_v12  ;;  %v4483_v46 = vpop.permute.xlu1 %1417 }
 0x520   : > { %3106 = vpow2.f32 %v1726_v15  ;;  %v1192_v15 = vmul.f32 1.442695, %v5196_v55 }
 0x521   : > { %3108 = vpow2.f32 %v1680_v61 }
 0x522   : > { %2275 = vmatpush.bf16.xpose.msrb.mxu1 %v2258_v11  ;;  %3110 = vpow2.f32 %v1192_v15 }
 0x524   : > { %v4476_v54 = vpop.eup %3102 }
 0x525   : > { %1850 = vadd.xlane.f32.xlu0 %v4476_v54  ;;  %v4480_v2 = vpop.eup %3104 }
 0x526   : > { %3032 = vset.pattern.permute.xlu1 %v4203_v41  ;;  %v2116_v12 = vpack.c.bf16 %v4480_v2, %v4480_v2  ;;  %v4489_v62 = vpop.eup %3106 }
 0x527   : > { %3027 = vset.pattern.permute.xlu2 %v4146_v5  ;;  %v4491_v41 = vpop.eup %3108  ;;  %v4496_v18 = vpop.permute.xlu1 %1429 }
 0x528   : > { %v2241_v5 = vunpack.c.l.b16 %v2116_v12  ;;  %v2115_v7 = vpack.c.bf16 %v4491_v41, %v4491_v41  ;;  %v4513_v22 = vpop.eup %3110  ;;  %v2410_v12 = vld [vmem:[#allocation4 + $0x10] sm:$0xff] }
 0x529   : > { %v4516_v20 = vpop.permute.xlu2 %1435 }
 0x52a   : > { %2276 = vmatpush.bf16.xpose.msrb.mxu1 %v2257_v29  ;;  %v2256_v6 = vpack.c.b16 %v2242_v48, %v2241_v5  ;;  %v2240_v11 = vunpack.c.l.b16 %v2115_v7  ;;  %v1503_v5 = vpop.permute.xlu0 %1502 }
 0x52c   : > { %v2255_v38 = vpack.c.b16 %v2240_v11, %v2239_v4 }
 0x52d   : > { %1856 = vadd.xlane.f32.xlu0 %v4489_v62 }
 0x52e   : > { %1580 = vperm.xlu1 %3032, %v4161_v10  }
 0x52f   : > { %1526 = vperm.xlu2 %3027, %v4161_v10  }
 0x530   : > { %v4507_v61 = vpop.permute.xlu1 %1447 }
 0x532   : > { %2277 = vmatpush.bf16.xpose.msrb.mxu1 %v2256_v6  ;;  %v4527_v55 = vpop.permute.xlu0 %1532 }
 0x536   : > { %3034 = vset.pattern.permute.xlu1 %v4170_v40  ;;  %v5197_v40 = vld [vmem:[#allocation64_spill] sm:$0xff] }
 0x537   : > { %3031 = vset.pattern.permute.xlu2 %v4194_v43  ;;  %v2414_v43 = vperm.slane %v4513_v22, 0 }
 0x539   : > { %v2422_v48 = vmul.f32 %v2414_v43, %v2410_v12  ;;  %v1454_v60 = vpop.permute.xlu2 %1453  ;;  %v5200_v12 = vld [vmem:[#allocation72_spill] sm:$0xff] }
 0x53a   : > { %2278 = vmatpush.bf16.xpose.msrb.mxu1 %v2255_v38  ;;  %v5198_v38 = vld [vmem:[#allocation77_spill] sm:$0xff] }
 0x53e   : > { %1550 = vperm.xlu1 %3034, %v4161_v10  }
 0x53f   : > { %1574 = vperm.xlu2 %3031, %v4161_v10  }
 0x540   : > { %v1460_v56 = vpop.permute.xlu1 %1459 }
 0x541   : > { %v1625_v29 = vsub.f32 %v5197_v40, %v1460_v56  ;;  %2279 = vmatmul.bf16.vlgmr.msrb.gmra.mxu1 %v4511_v36  ;;  %v1472_v40 = vpop.permute.xlu0 %1471 }
 0x543   : > { %v1732_v9 = vmul.f32 1.442695, %v1625_v29  ;;  %v5199_v29 = vld [vmem:[#allocation69_spill] sm:$0xff] }
 0x545   : > { %3112 = vpow2.f32 %v1732_v9 }
 0x546   : > { %3036 = vset.pattern.permute.xlu1 %v4185_v27 }
 0x547   : > { %3033 = vset.pattern.permute.xlu2 %v4182_v24  ;;  %v2219_v6 = vpop.f32.mrf.mxu0 }
 0x548   : > { %v2426_v7 = vadd.f32 %v2422_v48, %v2219_v6  ;;  %v1627_v48 = vsub.f32 %v5200_v12, %v1472_v40  ;;  %v5201_v6 = vld [vmem:[#allocation80_spill] sm:$0xff] }
 0x549   : > { %v1466_v4 = vpop.permute.xlu2 %1465 }
 0x54a   : > { %2430 = vst [vmem:[#allocation4 + $0x10] sm:$0xff] %v2426_v7  ;;  %v1626_v43 = vsub.f32 %v5199_v29, %v1466_v4 }
 0x54b   : > { %v4523_v11 = vpop.eup %3112 }
 0x54c   : > { %1862 = vadd.xlane.f32.xlu0 %v4523_v11  ;;  %v1734_v37 = vmul.f32 1.442695, %v1626_v43 }
 0x54e   : > { %1544 = vperm.xlu1 %3036, %v4161_v10  }
 0x54f   : > { %1562 = vperm.xlu2 %3033, %v4161_v10   ;;  %v2221_v15 = vpop.f32.mrf.mxu0 }
 0x550   : > { %v1478_v27 = vpop.permute.xlu1 %1477  ;;  %v1736_v15 = vmul.f32 1.442695, %v1627_v48 }
 0x551   : > { %v1628_v56 = vsub.f32 %v5198_v38, %v1478_v27  ;;  %v5202_v38 = vld [vmem:[#allocation61_spill] sm:$0xff] }
 0x553   : > { %v1738_v24 = vmul.f32 1.442695, %v1628_v56  ;;  %v1624_v56 = vsub.f32 %v5202_v38, %v1454_v60  ;;  %v5205_v60 = vld [vmem:[#allocation56_spill] sm:$0xff]  ;;  %v5206_v38 = vld [vmem:[#allocation30_spill] sm:$0xff] }
 0x555   : > { %3114 = vpow2.f32 %v1738_v24  ;;  %v1730_v40 = vmul.f32 1.442695, %v1624_v56 }
 0x557   : > { %3035 = vset.pattern.permute.xlu2 %v4197_v47  ;;  %v5203_v47 = vld [vmem:[#allocation26_spill] sm:$0xff] }
 0x559   : > { %v1484_v9 = vpop.permute.xlu2 %1483 }
 0x55a   : > { %v1629_v7 = vsub.f32 %v5201_v6, %v1484_v9 }
 0x55b   : > { %v3115_v17 = vpop.eup %3114 }
 0x55c   : > { %v1740_v26 = vmul.f32 1.442695, %v1629_v7  ;;  %1868 = vadd.xlane.f32.xlu0 %v3115_v17  ;;  %v2144_v24 = vpack.c.bf16 %v3115_v17, %v3115_v17  ;;  %v1623_v7 = vsub.f32 %v5205_v60, %v4507_v61 }
 0x55e   : > { %3116 = vpow2.f32 %v1740_v26  ;;  %v5204_v26 = vld [vmem:[#allocation31_spill] sm:$0xff] }
 0x55f   : > { %1556 = vperm.xlu2 %3035, %v4161_v10   ;;  %3118 = vpow2.f32 %v1734_v37  ;;  %v1632_v48 = vsub.f32 %v5204_v26, %v1503_v5  ;;  %v2314_v10 = vunpack.c.l.b16 %v2144_v24 }
 0x560   : > { %v1491_v27 = vpop.permute.xlu1 %1490  ;;  %3120 = vpow2.f32 %v1736_v15 }
 0x561   : > { %v1630_v4 = vsub.f32 %v5203_v47, %v1491_v27  ;;  %3122 = vpow2.f32 %v1730_v40  ;;  %v1746_v47 = vmul.f32 1.442695, %v1632_v48  ;;  %v5208_v48 = vld [vmem:[#allocation34_spill] sm:$0xff] }
 0x563   : > { %v1742_v12 = vmul.f32 1.442695, %v1630_v4  ;;  %v1728_v4 = vmul.f32 1.442695, %v1623_v7  ;;  %v2141_v7 = vpack.c.bf16 %v4523_v11, %v4523_v11 }
 0x564   : > { %v4538_v29 = vpop.eup %3116 }
 0x565   : > { %v2145_v43 = vpack.c.bf16 %v4538_v29, %v4538_v29  ;;  %v4542_v9 = vpop.eup %3118  ;;  %3124 = vpow2.f32 %v1742_v12 }
 0x566   : > { %v4545_v6 = vpop.eup %3120  ;;  %v2142_v27 = vpack.c.bf16 %v4542_v9, %v4542_v9 }
 0x567   : > { %v2315_v37 = vunpack.c.l.b16 %v2145_v43  ;;  %v2143_v5 = vpack.c.bf16 %v4545_v6, %v4545_v6  ;;  %v4554_v26 = vpop.eup %3122 }
 0x568   : > { %v2312_v43 = vunpack.c.l.b16 %v2142_v27 }
 0x569   : > { %v1497_v17 = vpop.permute.xlu2 %1496  ;;  %v2323_v15 = vpack.c.b16 %v2315_v37, %v2314_v10  ;;  %v2313_v61 = vunpack.c.l.b16 %v2143_v5  ;;  %v5207_v10 = vld [vmem:[#allocation48_spill] sm:$0xff] }
 0x56a   : > { %v1631_v56 = vsub.f32 %v5206_v38, %v1497_v17  ;;  %v1621_v12 = vsub.f32 %v5207_v10, %v4516_v20 }
 0x56b   : > { %2332 = vmatpush.bf16.xpose.msrb.mxu2 %v2323_v15  ;;  %v4556_v40 = vpop.eup %3124  ;;  %v2322_v17 = vpack.c.b16 %v2313_v61, %v2312_v43  ;;  %v5209_v15 = vld [vmem:[#allocation45_spill] sm:$0xff] }
 0x56c   : > { %v1744_v24 = vmul.f32 1.442695, %v1631_v56  ;;  %v1620_v27 = vsub.f32 %v5209_v15, %v4496_v18  ;;  %v2140_v56 = vpack.c.bf16 %v4554_v26, %v4554_v26  ;;  %v1724_v5 = vmul.f32 1.442695, %v1621_v12  ;;  %v5210_v15 = vld [vmem:[#allocation37_spill] sm:$0xff] }
 0x56e   : > { %3126 = vpow2.f32 %v1744_v24  ;;  %v2311_v24 = vunpack.c.l.b16 %v2141_v7  ;;  %v1722_v61 = vmul.f32 1.442695, %v1620_v27  ;;  %v2310_v18 = vunpack.c.l.b16 %v2140_v56 }
 0x56f   : > { %3128 = vpow2.f32 %v1746_v47  ;;  %v2146_v47 = vpack.c.bf16 %v4556_v40, %v4556_v40  ;;  %v1618_v27 = vsub.f32 %v5210_v15, %v4483_v46  ;;  %v5213_v46 = vld [vmem:[#allocation50_spill] sm:$0xff] }
 0x570   : > { %3130 = vpow2.f32 %v1728_v4  ;;  %v1509_v37 = vpop.permute.xlu1 %1508 }
 0x571   : > { %v1633_v60 = vsub.f32 %v5208_v48, %v1509_v37  ;;  %v4573_v10 = vunpack.c.l.b16 %v2146_v47  ;;  %v1718_v15 = vmul.f32 1.442695, %v1618_v27 }
 0x573   : > { %v1748_v38 = vmul.f32 1.442695, %v1633_v60  ;;  %2333 = vmatpush.bf16.xpose.msrb.mxu2 %v2322_v17  ;;  %v2321_v60 = vpack.c.b16 %v2311_v24, %v2310_v18 }
 0x574   : > { %v3127_v20 = vpop.eup %3126 }
 0x575   : > { %v4569_v4 = vpop.eup %3128  ;;  %3132 = vpow2.f32 %v1748_v38  ;;  %1874 = vadd.xlane.f32.xlu0 %v3127_v20  ;;  %v2147_v43 = vpack.c.bf16 %v3127_v20, %v3127_v20  ;;  %v5211_v38 = vld [vmem:[#allocation39_spill] sm:$0xff] }
 0x576   : > { %v4571_v11 = vpop.eup %3130  ;;  %3134 = vpow2.f32 %v1724_v5  ;;  %v2148_v17 = vpack.c.bf16 %v4569_v4, %v4569_v4 }
 0x577   : > { %v4575_v37 = vunpack.c.l.b16 %v2147_v43  ;;  %v2139_v12 = vpack.c.bf16 %v4571_v11, %v4571_v11  ;;  %3136 = vpow2.f32 %v1722_v61  ;;  %v1637_v61 = vsub.f32 %v5213_v46, %v4527_v55 }
 0x578   : > { %1780 = vadd.xlane.f32.xlu1 %v4352_v25  ;;  %v2138_v25 = vpack.c.bf16 %v4489_v62, %v4489_v62  ;;  %v4593_v43 = vunpack.c.l.b16 %v2148_v17  ;;  %v5214_v17 = vld [vmem:[#allocation42_spill] sm:$0xff] }
 0x579   : > { %v1515_v48 = vpop.permute.xlu2 %1514  ;;  %v2309_v24 = vunpack.c.l.b16 %v2139_v12  ;;  %v1756_v55 = vmul.f32 1.442695, %v1637_v61 }
 0x57a   : > { %v1634_v56 = vsub.f32 %v5211_v38, %v1515_v48 }
 0x57b   : > { %v4587_v47 = vpop.eup %3132  ;;  %2334 = vmatpush.bf16.xpose.msrb.mxu2 %v2321_v60  ;;  %v2308_v60 = vunpack.c.l.b16 %v2138_v25 }
 0x57c   : > { %5212 = vst [vmem:[#allocation85_spill] sm:$0xff] %v4587_v47  ;;  %v1750_v20 = vmul.f32 1.442695, %v1634_v56  ;;  %v2149_v5 = vpack.c.bf16 %v4587_v47, %v4587_v47  ;;  %v4595_v18 = vpop.eup %3134 }
 0x57d   : > { %v4601_v38 = vpop.eup %3136  ;;  %v2320_v7 = vpack.c.b16 %v2309_v24, %v2308_v60  ;;  %v2137_v47 = vpack.c.bf16 %v4595_v18, %v4595_v18  ;;  %v5215_v24 = vld [vmem:[#allocation25_spill] sm:$0xff] }
 0x57e   : > { %3138 = vpow2.f32 %v1750_v20  ;;  %v4599_v48 = vunpack.c.l.b16 %v2149_v5  ;;  %v2136_v25 = vpack.c.bf16 %v4601_v38, %v4601_v38  ;;  %v1615_v60 = vsub.f32 %v5215_v24, %v4470_v16 }
 0x57f   : > { %3140 = vpow2.f32 %v1718_v15  ;;  %v5216_v15 = vld [vmem:[#allocation23_spill] sm:$0xff] }
 0x580   : > { %v1521_v62 = vpop.permute.xlu1 %1520  ;;  %1786 = vadd.xlane.f32.xlu1 %v4336_v14  ;;  %v2378_v12 = vpack.c.b16 %v4599_v48, %v4593_v43  ;;  %v2307_v14 = vunpack.c.l.b16 %v2137_v47  ;;  %v2306_v5 = vunpack.c.l.b16 %v2136_v25  ;;  %v1712_v16 = vmul.f32 1.442695, %v1615_v60 }
 0x581   : > { %v1635_v56 = vsub.f32 %v5214_v17, %v1521_v62  ;;  %v1614_v62 = vsub.f32 %v5216_v15, %v4412_v23 }
 0x582   : > { %v2319_v61 = vpack.c.b16 %v2307_v14, %v2306_v5 }
 0x583   : > { %v1752_v27 = vmul.f32 1.442695, %v1635_v56  ;;  %2335 = vmatpush.bf16.xpose.msrb.mxu2 %v2320_v7  ;;  %v2135_v7 = vpack.c.bf16 %v4476_v54, %v4476_v54  ;;  %v1710_v54 = vmul.f32 1.442695, %v1614_v62  ;;  %v5218_v62 = vpack.c.b16 %v4450_v28, %v4448_v19 }
 0x584   : > { %v3139_v20 = vpop.eup %3138 }
 0x585   : > { %3142 = vpow2.f32 %v1752_v27  ;;  %1880 = vadd.xlane.f32.xlu0 %v3139_v20  ;;  %v4611_v46 = vpop.eup %3140  ;;  %v2150_v17 = vpack.c.bf16 %v3139_v20, %v3139_v20 }
 0x586   : > { %3144 = vpow2.f32 %v1756_v55  ;;  %v2134_v56 = vpack.c.bf16 %v4611_v46, %v4611_v46 }
 0x587   : > { %v4630_v27 = vunpack.c.l.b16 %v2150_v17  ;;  %3146 = vpow2.f32 %v1712_v16 }
 0x588   : > { %1776 = vadd.xlane.f32.xlu2 %v4361_v59  ;;  %1792 = vadd.xlane.f32.xlu1 %v4310_v34  ;;  %v2305_v59 = vunpack.c.l.b16 %v2135_v7  ;;  %v2304_v25 = vunpack.c.l.b16 %v2134_v56  ;;  %3148 = vpow2.f32 %v1710_v54  ;;  %v5217_v7 = vld [vmem:[#allocation79_spill] sm:$0xff] }
 0x589   : > { %v4638_v14 = vpop.permute.xlu2 %1526 }
 0x58a   : > { %v2318_v5 = vpack.c.b16 %v2305_v59, %v2304_v25  ;;  %v5219_v59 = vld [vmem:[#allocation82_spill] sm:$0xff] }
 0x58b   : > { %v4621_v47 = vpop.eup %3142  ;;  %2336 = vmatpush.bf16.xpose.msrb.mxu2 %v2319_v61 }
 0x58c   : > { %v4625_v55 = vpop.eup %3144  ;;  %v2151_v34 = vpack.c.bf16 %v4621_v47, %v4621_v47 }
 0x58d   : > { %1886 = vadd.xlane.f32.xlu0 %v4625_v55  ;;  %v4640_v24 = vpop.eup %3146 }
 0x58e   : > { %v4632_v23 = vunpack.c.l.b16 %v2151_v34  ;;  %v4642_v60 = vpop.eup %3148  ;;  %v1569_v34 = vpop.permute.xlu0 %1568 }
 0x58f   : > { %v2130_v17 = vpack.c.bf16 %v4642_v60, %v4642_v60 }
 0x590   : > { %1782 = vadd.xlane.f32.xlu2 %v4348_v49  ;;  %1798 = vadd.xlane.f32.xlu1 %v4294_v32  ;;  %v2379_v20 = vpack.c.b16 %v4632_v23, %v4630_v27  ;;  %v4644_v61 = vpop.permute.xlu1 %1538  ;;  %v2131_v32 = vpack.c.bf16 %v4640_v24, %v4640_v24 }
 0x592   : > { %v2301_v16 = vunpack.c.l.b16 %v2131_v32  ;;  %v4663_v32 = vld [vmem:[%s3508_s5 + $0x8] sm:$0xf] }
 0x593   : > { %2337 = vmatpush.bf16.xpose.msrb.mxu2 %v2318_v5  ;;  %v5220_v5 = vld [vmem:[#allocation74_spill] sm:$0xff] }
 0x594   : > { %v1643_v19 = vsub.f32 %v5220_v5, %v1569_v34 }
 0x598   : > { %1788 = vadd.xlane.f32.xlu2 %v4321_v3  ;;  %1804 = vadd.xlane.f32.xlu1 %v4272_v31  ;;  %v2300_v3 = vunpack.c.l.b16 %v2130_v17 }
 0x599   : > { %v1575_v49 = vpop.permute.xlu2 %1574 }
 0x59a   : > { %v1644_v15 = vsub.f32 %v5217_v7, %v1575_v49  ;;  %v2316_v25 = vpack.c.b16 %v2301_v16, %v2300_v3  ;;  %v1768_v49 = vmul.f32 1.442695, %v1643_v19 }
 0x59b   : > { %2338 = vmatpush.bf16.xpose.msrb.mxu2 %v5218_v62 }
 0x59c   : > { %v1770_v56 = vmul.f32 1.442695, %v1644_v15 }
 0x59e   : > { %3150 = vpow2.f32 %v1770_v56 }
 0x5a0   : > { %1794 = vadd.xlane.f32.xlu2 %v4306_v58  ;;  %v1581_v31 = vpop.permute.xlu1 %1580  ;;  %1810 = vadd.xlane.f32.xlu1 %v4491_v41  ;;  %v5221_v41 = vld [vmem:[#allocation71_spill] sm:$0xff] }
 0x5a1   : > { %v1645_v54 = vsub.f32 %v5219_v59, %v1581_v31  ;;  %v5222_v59 = vld [vmem:[#allocation63_spill] sm:$0xff] }
 0x5a3   : > { %v1772_v28 = vmul.f32 1.442695, %v1645_v54  ;;  %2339 = vmatpush.bf16.xpose.msrb.mxu2 %v2316_v25 }
 0x5a4   : > { %v4660_v7 = vpop.eup %3150 }
 0x5a5   : > { %3152 = vpow2.f32 %v1772_v28  ;;  %v2160_v62 = vpack.c.bf16 %v4660_v7, %v4660_v7 }
 0x5a6   : > { %3154 = vpow2.f32 %v1768_v49  ;;  %v2407_v49 = vrot.slane %v4513_v22, 1 }
 0x5a7   : > { %v2375_v34 = vunpack.c.l.b16 %v2160_v62 }
 0x5a8   : > { %1800 = vadd.xlane.f32.xlu2 %v4284_v45  ;;  %1816 = vadd.xlane.f32.xlu1 %v4465_v52 }
 0x5a9   : > { %v1563_v58 = vpop.permute.xlu2 %1562 }
 0x5aa   : > { %v1642_v15 = vsub.f32 %v5221_v41, %v1563_v58  ;;  %2340 = vmatmul.bf16.vlgmr.msrb.gmra.mxu2 %v4663_v32 }
 0x5ab   : > { %v4671_v17 = vpop.eup %3152 }
 0x5ac   : > { %v1766_v56 = vmul.f32 1.442695, %v1642_v15  ;;  %v2161_v16 = vpack.c.bf16 %v4671_v17, %v4671_v17  ;;  %v3155_v3 = vpop.eup %3154 }
 0x5ad   : > { %v2159_v5 = vpack.c.bf16 %v3155_v3, %v3155_v3 }
 0x5ae   : > { %3156 = vpow2.f32 %v1766_v56  ;;  %v2376_v45 = vunpack.c.l.b16 %v2161_v16  ;;  %v2415_v56 = vperm.slane %v2407_v49, 0  ;;  %v5224_v16 = vld [vmem:[#allocation66_spill] sm:$0xff] }
 0x5af   : > { %v2374_v41 = vunpack.c.l.b16 %v2159_v5 }
 0x5b0   : > { %1806 = vadd.xlane.f32.xlu2 %v4278_v0  ;;  %v1551_v52 = vpop.permute.xlu1 %1550  ;;  %1822 = vadd.xlane.f32.xlu1 %v4444_v42  ;;  %v2384_v31 = vpack.c.b16 %v2376_v45, %v2375_v34  ;;  %v5223_v0 = vld [vmem:[#allocation55_spill] sm:$0xff] }
 0x5b1   : > { %v1640_v54 = vsub.f32 %v5222_v59, %v1551_v52  ;;  %v1638_v42 = vsub.f32 %v5223_v0, %v4644_v61  ;;  %v2411_v45 = vld [vmem:[#allocation4] sm:$0xff] }
 0x5b2   : > { %2393 = vmatpush.bf16.xpose.msrb.mxu3 %v2384_v31 }
 0x5b3   : > { %v1762_v25 = vmul.f32 1.442695, %v1640_v54  ;;  %v1758_v59 = vmul.f32 1.442695, %v1638_v42  ;;  %v2423_v54 = vmul.f32 %v2415_v56, %v2411_v45 }
 0x5b4   : > { %v4678_v19 = vpop.eup %3156 }
 0x5b5   : > { %3158 = vpow2.f32 %v1762_v25  ;;  %v2158_v28 = vpack.c.bf16 %v4678_v19, %v4678_v19 }
 0x5b7   : > { %v2373_v58 = vunpack.c.l.b16 %v2158_v28  ;;  %v5226_v28 = vld [vmem:[#allocation58_spill] sm:$0xff] }
 0x5b8   : > { %1812 = vadd.xlane.f32.xlu2 %v4480_v2  ;;  %1828 = vadd.xlane.f32.xlu1 %v4418_v8  ;;  %v5225_v8 = vld [vmem:[#allocation47_spill] sm:$0xff] }
 0x5b9   : > { %v1557_v15 = vpop.permute.xlu2 %1556  ;;  %v2383_v62 = vpack.c.b16 %v2374_v41, %v2373_v58  ;;  %v1636_v5 = vsub.f32 %v5225_v8, %v4638_v14  ;;  %v463_v8 = vld [vmem:[%s3508_s5 + $0xc] sm:$0xf] }
 0x5ba   : > { %v1641_v34 = vsub.f32 %v5224_v16, %v1557_v15 }
 0x5bb   : > { %v3159_v52 = vpop.eup %3158  ;;  %2394 = vmatpush.bf16.xpose.msrb.mxu3 %v2383_v62  ;;  %v1754_v42 = vmul.f32 1.442695, %v1636_v5  ;;  %v2438_v5 = vunpack.c.l.bf16 %v463_v8 }
 0x5bc   : > { %v1764_v31 = vmul.f32 1.442695, %v1641_v34  ;;  %1892 = vadd.xlane.f32.xlu0 %v3159_v52  ;;  %v2156_v41 = vpack.c.bf16 %v3159_v52, %v3159_v52 }
 0x5be   : > { %3160 = vpow2.f32 %v1764_v31  ;;  %v2280_v25 = vpop.f32.mrf.mxu1 }
 0x5bf   : > { %v2427_v2 = vadd.f32 %v2423_v54, %v2280_v25  ;;  %3162 = vpow2.f32 %v1758_v59  ;;  %v2153_v59 = vpack.c.bf16 %v4625_v55, %v4625_v55 }
 0x5c0   : > { %1818 = vadd.xlane.f32.xlu2 %v4461_v13  ;;  %v1545_v61 = vpop.permute.xlu1 %1544  ;;  %1834 = vadd.xlane.f32.xlu1 %v4405_v53  ;;  %v2371_v13 = vunpack.c.l.b16 %v2156_v41  ;;  %v2436_v53 = vunpack.c.l.bf16 %v4511_v36 }
 0x5c1   : > { %2431 = vst [vmem:[#allocation4] sm:$0xff] %v2427_v2  ;;  %v1639_v49 = vsub.f32 %v5226_v28, %v1545_v61  ;;  %v2368_v25 = vunpack.c.l.b16 %v2153_v59  ;;  %v5233_v59 = vld [vmem:[#allocation93_spill] sm:$0xff] }
 0x5c3   : > { %v1760_v58 = vmul.f32 1.442695, %v1639_v49 }
 0x5c4   : > { %v4693_v0 = vpop.eup %3160  ;;  %1898 = vadd.xlane.f32.xlu0 %v3155_v3 }
 0x5c5   : > { %3164 = vpow2.f32 %v1760_v58  ;;  %v2157_v15 = vpack.c.bf16 %v4693_v0, %v4693_v0  ;;  %v4697_v62 = vpop.eup %3162 }
 0x5c6   : > { %v2282_v14 = vpop.f32.mrf.mxu1  ;;  %3166 = vpow2.f32 %v1754_v42  ;;  %v2154_v3 = vpack.c.bf16 %v4697_v62, %v4697_v62  ;;  %v5229_v42 = vld [vmem:[#allocation90_spill] sm:$0xff] }
 0x5c7   : > { %v2372_v56 = vunpack.c.l.b16 %v2157_v15 }
 0x5c8   : > { %1824 = vadd.xlane.f32.xlu2 %v4429_v63  ;;  %1840 = vadd.xlane.f32.xlu1 %v4642_v60  ;;  %v2369_v36 = vunpack.c.l.b16 %v2154_v3 }
 0x5c9   : > { %v2382_v16 = vpack.c.b16 %v2372_v56, %v2371_v13  ;;  %v5230_v56 = vld [vmem:[#allocation85_spill] sm:$0xff] }
 0x5cb   : > { %v4704_v34 = vpop.eup %3164  ;;  %2395 = vmatpush.bf16.xpose.msrb.mxu3 %v2382_v16 }
 0x5cc   : > { %v2155_v45 = vpack.c.bf16 %v4704_v34, %v4704_v34  ;;  %2441 = vadd.xlane.f32.xlu0 %v2436_v53  ;;  %v4708_v52 = vpop.eup %3166 }
 0x5cd   : > { %v2152_v60 = vpack.c.bf16 %v4708_v52, %v4708_v52 }
 0x5ce   : > { %v2370_v31 = vunpack.c.l.b16 %v2155_v45  ;;  %v5231_v45 = vld [vmem:[#allocation91_spill] sm:$0xff] }
 0x5cf   : > { %v2367_v54 = vunpack.c.l.b16 %v2152_v60 }
 0x5d0   : > { %1830 = vadd.xlane.f32.xlu2 %v4415_v21  ;;  %1846 = vadd.xlane.f32.xlu1 %v4434_v51  ;;  %v2381_v63 = vpack.c.b16 %v2370_v31, %v2369_v36 }
 0x5d1   : > { %v2380_v2 = vpack.c.b16 %v2368_v25, %v2367_v54 }
 0x5d3   : > { %2396 = vmatpush.bf16.xpose.msrb.mxu3 %v2381_v63  ;;  %v5232_v63 = vld [vmem:[#allocation92_spill] sm:$0xff] }
 0x5d4   : > { %2445 = vadd.xlane.f32.xlu0 %v2438_v5 }
 0x5d8   : > { %1836 = vadd.xlane.f32.xlu2 %v4398_v35  ;;  %1852 = vadd.xlane.f32.xlu1 %v4601_v38  ;;  %v1779_v35 = vpop.xlane.xlu0 %1778 }
 0x5d9   : > { %v1969_v48 = vperm.slane %v1779_v35, %v3852_v44 }
 0x5db   : > { %2397 = vmatpush.bf16.xpose.msrb.mxu3 %v2380_v2 }
 0x5e0   : > { %1842 = vadd.xlane.f32.xlu2 %v4640_v24  ;;  %1858 = vadd.xlane.f32.xlu1 %v4571_v11  ;;  %v1785_v51 = vpop.xlane.xlu0 %1784  ;;  %v5227_v11 = vpack.c.b16 %v4575_v37, %v4573_v10 }
 0x5e1   : > { %v1975_v23 = vperm.slane %v1785_v51, %v3894_v30 }
 0x5e3   : > { %2398 = vmatpush.bf16.xpose.msrb.mxu3 %v2379_v20 }
 0x5e8   : > { %1848 = vadd.xlane.f32.xlu2 %v4611_v46  ;;  %1864 = vadd.xlane.f32.xlu1 %v4542_v9  ;;  %v1791_v9 = vpop.xlane.xlu0 %1790 }
 0x5e9   : > { %v1981_v41 = vperm.slane %v1791_v9, %v3951_v57  ;;  %v5237_v9 = vld [vmem:[#allocation96_spill] sm:$0xff] }
 0x5eb   : > { %2399 = vmatpush.bf16.xpose.msrb.mxu3 %v2378_v12  ;;  %v1781_v21 = vpop.xlane.xlu1 %1780  ;;  %v5228_v12 = vld [vmem:[#allocation88_spill] sm:$0xff] }
 0x5f0   : > { %1854 = vadd.xlane.f32.xlu2 %v4595_v18  ;;  %1870 = vadd.xlane.f32.xlu1 %v4538_v29  ;;  %v1971_v29 = vperm.slane %v1781_v21, %v5228_v12  ;;  %v5235_v21 = vld [vmem:[#allocation94_spill] sm:$0xff] }
 0x5f3   : > { %2400 = vmatpush.bf16.xpose.msrb.mxu3 %v5227_v11  ;;  %v1787_v38 = vpop.xlane.xlu1 %1786  ;;  %v5236_v11 = vld [vmem:[#allocation95_spill] sm:$0xff] }
 0x5f4   : > { %v1977_v20 = vperm.slane %v1787_v38, %v3917_v50 }
 0x5f8   : > { %1860 = vadd.xlane.f32.xlu2 %v4554_v26  ;;  %1876 = vadd.xlane.f32.xlu1 %v4569_v4  ;;  %v1797_v26 = vpop.xlane.xlu0 %1796 }
 0x5f9   : > { %v1987_v60 = vperm.slane %v1797_v26, %v5232_v63  ;;  %v2408_v26 = vrot.slane %v4513_v22, 2 }
 0x5fa   : > { %2401 = vmatmul.bf16.vlgmr.msrb.gmra.mxu3 %v463_v8 }
 0x5fb   : > { %v1777_v46 = vpop.xlane.xlu2 %1776  ;;  %v1793_v43 = vpop.xlane.xlu1 %1792 }
 0x5fc   : > { %v1968_v18 = vperm.slane %v1777_v46, %v3849_v39  ;;  %v1983_v15 = vperm.slane %v1793_v43, %v5229_v42 }
 0x5fe   : > { %v1970_v55 = vsel %vm1032_vm3, %v1969_v48, %v1968_v18 }
 0x5ff   : > { %v1972_v10 = vsel %vm1036_vm4, %v1971_v29, %v1970_v55  ;;  %v5239_v55 = vld [vmem:[#allocation84_spill] sm:$0xff] }
 0x600   : > { %1866 = vadd.xlane.f32.xlu2 %v4545_v6  ;;  %1882 = vadd.xlane.f32.xlu1 %v4621_v47  ;;  %v1803_v47 = vpop.xlane.xlu0 %1802 }
 0x601   : > { %v1993_v38 = vperm.slane %v1803_v47, %v5236_v11 }
 0x603   : > { %v1783_v4 = vpop.xlane.xlu2 %1782  ;;  %v1799_v37 = vpop.xlane.xlu1 %1798 }
 0x604   : > { %v1973_v27 = vperm.slane %v1783_v4, %v3875_v1  ;;  %v1989_v54 = vperm.slane %v1799_v37, %v5233_v59 }
 0x606   : > { %v1974_v24 = vsel %vm1040_vm5, %v1973_v27, %v1972_v10  ;;  %v2416_v27 = vperm.slane %v2408_v26, 0 }
 0x607   : > { %v1976_v61 = vsel %vm1044_vm6, %v1975_v23, %v1974_v24  ;;  %v2412_v23 = vld [vmem:[#allocation4 + $0x18] sm:$0xff] }
 0x608   : > { %1872 = vadd.xlane.f32.xlu2 %v4556_v40  ;;  %1888 = vadd.xlane.f32.xlu1 %v4697_v62  ;;  %v1978_v6 = vsel %vm1048_vm7, %v1977_v20, %v1976_v61  ;;  %v1809_v62 = vpop.xlane.xlu0 %1808 }
 0x609   : > { %v1999_v3 = vperm.slane %v1809_v62, %v3849_v39 }
 0x60b   : > { %v1789_v28 = vpop.xlane.xlu2 %1788  ;;  %v1805_v49 = vpop.xlane.xlu1 %1804 }
 0x60c   : > { %v1979_v58 = vperm.slane %v1789_v28, %v3931_v33  ;;  %v1995_v46 = vperm.slane %v1805_v49, %v5237_v9 }
 0x60e   : > { %v1980_v14 = vsel %vm1052_vm8, %v1979_v58, %v1978_v6  ;;  %v2424_v6 = vmul.f32 %v2416_v27, %v2412_v23 }
 0x60f   : > { %v1982_v13 = vsel %vm1056_vm9, %v1981_v41, %v1980_v14 }
 0x610   : > { %1878 = vadd.xlane.f32.xlu2 %v5230_v56  ;;  %1894 = vadd.xlane.f32.xlu1 %v4693_v0  ;;  %v1984_v40 = vsel %vm1060_vm10, %v1983_v15, %v1982_v13  ;;  %v1815_v18 = vpop.xlane.xlu0 %1814 }
 0x611   : > { %v2004_v47 = vperm.slane %v1815_v18, %v3875_v1 }
 0x613   : > { %v1795_v53 = vpop.xlane.xlu2 %1794  ;;  %v1811_v16 = vpop.xlane.xlu1 %1810 }
 0x614   : > { %v1985_v36 = vperm.slane %v1795_v53, %v5231_v45  ;;  %v2000_v31 = vperm.slane %v1811_v16, %v3852_v44 }
 0x616   : > { %v1986_v25 = vsel %vm1064_vm11, %v1985_v36, %v1984_v40  ;;  %v2001_v2 = vsel %vm1032_vm3, %v2000_v31, %v1999_v3  ;;  %v2437_v40 = vunpack.c.l.bf16 %v4663_v32 }
 0x617   : > { %v1988_v0 = vsel %vm1068_vm12, %v1987_v60, %v1986_v25 }
 0x618   : > { %1884 = vadd.xlane.f32.xlu2 %v4708_v52  ;;  %1900 = vadd.xlane.f32.xlu1 %v4660_v7  ;;  %v1990_v8 = vsel %vm5234_vm13, %v1989_v54, %v1988_v0  ;;  %v1821_v37 = vpop.xlane.xlu0 %1820 }
 0x619   : > { %v2010_v53 = vperm.slane %v1821_v37, %v3931_v33 }
 0x61b   : > { %v1801_v5 = vpop.xlane.xlu2 %1800  ;;  %v1817_v35 = vpop.xlane.xlu1 %1816 }
 0x61c   : > { %v1991_v51 = vperm.slane %v1801_v5, %v5235_v21  ;;  %v2006_v49 = vperm.slane %v1817_v35, %v3894_v30 }
 0x61e   : > { %v1992_v43 = vsel %vm5238_vm14, %v1991_v51, %v1990_v8 }
 0x61f   : > { %v1994_v48 = vsel %vm1080_vm15, %v1993_v38, %v1992_v43 }
 0x620   : > { %1890 = vadd.xlane.f32.xlu2 %v4704_v34  ;;  %1902 = vadd.xlane.f32.xlu1 %v4671_v17  ;;  %v1996_v7 = vsel %vm1084_vm0, %v1995_v46, %v1994_v48  ;;  %v3168_v34 = vld [vmem:[%s3508_s5] sm:$0xf] }
 0x621   : > { %v2435_v61 = vunpack.c.l.bf16 %v3168_v34 }
 0x623   : > { %v1807_v52 = vpop.xlane.xlu2 %1806  ;;  %v1823_v29 = vpop.xlane.xlu1 %1822 }
 0x624   : > { %v1997_v10 = vperm.slane %v1807_v52, %v5239_v55  ;;  %v2012_v3 = vperm.slane %v1823_v29, %v3951_v57 }
 0x626   : > { %v1998_v4 = vsel %vm1088_vm1, %v1997_v10, %v1996_v7 }
 0x628   : > { %1896 = vadd.xlane.f32.xlu2 %v4678_v19  ;;  %v1827_v19 = vpop.xlane.xlu0 %1826 }
 0x629   : > { %v2016_v32 = vperm.slane %v1827_v19, %v5231_v45 }
 0x62b   : > { %v1813_v20 = vpop.xlane.xlu2 %1812  ;;  %v1829_v24 = vpop.xlane.xlu1 %1828 }
 0x62c   : > { %v2002_v17 = vperm.slane %v1813_v20, %v5228_v12  ;;  %v2018_v8 = vperm.slane %v1829_v24, %v5232_v63 }
 0x62d   : > { %v2341_v28 = vpop.f32.mrf.mxu2 }
 0x62e   : > { %v2003_v58 = vsel %vm1036_vm4, %v2002_v17, %v2001_v2  ;;  %v2428_v41 = vadd.f32 %v2424_v6, %v2341_v28 }
 0x62f   : > { %v2005_v15 = vsel %vm1040_vm5, %v2004_v47, %v2003_v58 }
 0x630   : > { %2432 = vst [vmem:[#allocation4 + $0x18] sm:$0xff] %v2428_v41  ;;  %v2007_v14 = vsel %vm1044_vm6, %v2006_v49, %v2005_v15  ;;  %2439 = vadd.xlane.f32.xlu2 %v2435_v61  ;;  %v1833_v60 = vpop.xlane.xlu0 %1832 }
 0x631   : > { %v2022_v18 = vperm.slane %v1833_v60, %v5235_v21 }
 0x633   : > { %v1819_v13 = vpop.xlane.xlu2 %1818  ;;  %v1835_v56 = vpop.xlane.xlu1 %1834 }
 0x634   : > { %v2008_v62 = vperm.slane %v1819_v13, %v3917_v50  ;;  %v2024_v7 = vperm.slane %v1835_v56, %v5236_v11 }
 0x635   : > { %v2343_v16 = vpop.f32.mrf.mxu2 }
 0x636   : > { %v2009_v36 = vsel %vm1048_vm7, %v2008_v62, %v2007_v14 }
 0x637   : > { %v2011_v31 = vsel %vm1052_vm8, %v2010_v53, %v2009_v36 }
 0x638   : > { %v2013_v54 = vsel %vm1056_vm9, %v2012_v3, %v2011_v31  ;;  %2443 = vadd.xlane.f32.xlu2 %v2437_v40  ;;  %v1839_v51 = vpop.xlane.xlu0 %1838 }
 0x639   : > { %v2028_v20 = vperm.slane %v1839_v51, %v5239_v55 }
 0x63b   : > { %v1825_v25 = vpop.xlane.xlu2 %1824  ;;  %v1841_v2 = vpop.xlane.xlu1 %1840 }
 0x63c   : > { %v2014_v0 = vperm.slane %v1825_v25, %v5229_v42  ;;  %v2030_v28 = vperm.slane %v1841_v2, %v3849_v39 }
 0x63e   : > { %v2015_v5 = vsel %vm1060_vm10, %v2014_v0, %v2013_v54 }
 0x63f   : > { %v2017_v35 = vsel %vm1064_vm11, %v2016_v32, %v2015_v5 }
 0x640   : > { %v2019_v38 = vsel %vm1068_vm12, %v2018_v8, %v2017_v35  ;;  %v1845_v10 = vpop.xlane.xlu0 %1844 }
 0x641   : > { %v2033_v58 = vperm.slane %v1845_v10, %v5228_v12 }
 0x643   : > { %v1831_v46 = vpop.xlane.xlu2 %1830  ;;  %v1847_v43 = vpop.xlane.xlu1 %1846 }
 0x644   : > { %v2020_v48 = vperm.slane %v1831_v46, %v5233_v59  ;;  %v2035_v41 = vperm.slane %v1847_v43, %v3875_v1 }
 0x646   : > { %v2021_v52 = vsel %vm5234_vm13, %v2020_v48, %v2019_v38 }
 0x647   : > { %v2023_v29 = vsel %vm5238_vm14, %v2022_v18, %v2021_v52 }
 0x648   : > { %v2025_v26 = vsel %vm1080_vm15, %v2024_v7, %v2023_v29  ;;  %v1851_v61 = vpop.xlane.xlu0 %1850 }
 0x649   : > { %v2039_v53 = vperm.slane %v1851_v61, %v3917_v50 }
 0x64b   : > { %v1837_v37 = vpop.xlane.xlu2 %1836  ;;  %v1853_v27 = vpop.xlane.xlu1 %1852 }
 0x64c   : > { %v2026_v23 = vperm.slane %v1837_v37, %v5237_v9  ;;  %v2041_v54 = vperm.slane %v1853_v27, %v3931_v33  ;;  %v2409_v37 = vrot.slane %v4513_v22, 3 }
 0x64e   : > { %v2027_v24 = vsel %vm1084_vm0, %v2026_v23, %v2025_v26 }
 0x64f   : > { %v2029_v34 = vsel %vm1088_vm1, %v2028_v20, %v2027_v24 }
 0x650   : > { %v2092_v17 = vsel %vm1183_vm2, %v2029_v34, %v1998_v4  ;;  %v1857_v13 = vpop.xlane.xlu0 %1856 }
 0x651   : > { %v2045_v0 = vperm.slane %v1857_v13, %v5229_v42 }
 0x653   : > { %v1843_v6 = vpop.xlane.xlu2 %1842  ;;  %v1859_v47 = vpop.xlane.xlu1 %1858 }
 0x654   : > { %v2031_v49 = vperm.slane %v1843_v6, %v3852_v44  ;;  %v2047_v51 = vperm.slane %v1859_v47, %v5231_v45  ;;  %v2417_v6 = vperm.slane %v2409_v37, 0 }
 0x656   : > { %v2032_v15 = vsel %vm1032_vm3, %v2031_v49, %v2030_v28  ;;  %v2413_v28 = vld [vmem:[#allocation4 + $0x8] sm:$0xff] }
 0x657   : > { %v2034_v19 = vsel %vm1036_vm4, %v2033_v58, %v2032_v15 }
 0x658   : > { %v2036_v14 = vsel %vm1040_vm5, %v2035_v41, %v2034_v19  ;;  %v1863_v16 = vpop.xlane.xlu0 %1862  ;;  %v2425_v41 = vmul.f32 %v2417_v6, %v2413_v28 }
 0x659   : > { %v2051_v48 = vperm.slane %v1863_v16, %v5233_v59 }
 0x65b   : > { %v1849_v56 = vpop.xlane.xlu2 %1848  ;;  %v1865_v40 = vpop.xlane.xlu1 %1864 }
 0x65c   : > { %v2037_v4 = vperm.slane %v1849_v56, %v3894_v30  ;;  %v2053_v52 = vperm.slane %v1865_v40, %v5235_v21 }
 0x65e   : > { %v2038_v62 = vsel %vm1044_vm6, %v2037_v4, %v2036_v14 }
 0x65f   : > { %v2040_v31 = vsel %vm1048_vm7, %v2039_v53, %v2038_v62 }
 0x660   : > { %v2042_v25 = vsel %vm1052_vm8, %v2041_v54, %v2040_v31  ;;  %v1869_v32 = vpop.xlane.xlu0 %1868 }
 0x661   : > { %v2057_v27 = vperm.slane %v1869_v32, %v5237_v9 }
 0x663   : > { %v1855_v3 = vpop.xlane.xlu2 %1854  ;;  %v1871_v36 = vpop.xlane.xlu1 %1870 }
 0x664   : > { %v2043_v60 = vperm.slane %v1855_v3, %v3951_v57  ;;  %v2059_v20 = vperm.slane %v1871_v36, %v5239_v55 }
 0x666   : > { %v2044_v2 = vsel %vm1056_vm9, %v2043_v60, %v2042_v25 }
 0x667   : > { %v2046_v8 = vsel %vm1060_vm10, %v2045_v0, %v2044_v2 }
 0x668   : > { %v2048_v46 = vsel %vm1064_vm11, %v2047_v51, %v2046_v8  ;;  %v1875_v18 = vpop.xlane.xlu0 %1874 }
 0x669   : > { %v2062_v56 = vperm.slane %v1875_v18, %v3852_v44 }
 0x66b   : > { %v1861_v5 = vpop.xlane.xlu2 %1860  ;;  %v1877_v35 = vpop.xlane.xlu1 %1876 }
 0x66c   : > { %v2049_v38 = vperm.slane %v1861_v5, %v5232_v63 }
 0x66e   : > { %v2050_v43 = vsel %vm1068_vm12, %v2049_v38, %v2048_v46 }
 0x66f   : > { %v2052_v7 = vsel %vm5234_vm13, %v2051_v48, %v2050_v43  ;;  %vm5240_vm13 = vcmask 1042434  }
 0x670   : > { %v2054_v23 = vsel %vm5238_vm14, %v2053_v52, %v2052_v7  ;;  %v1881_v49 = vpop.xlane.xlu0 %1880 }
 0x671   : > { %v2068_v60 = vperm.slane %v1881_v49, %v3894_v30 }
 0x673   : > { %v1867_v29 = vpop.xlane.xlu2 %1866  ;;  %v1883_v26 = vpop.xlane.xlu1 %1882 }
 0x674   : > { %v2055_v10 = vperm.slane %v1867_v29, %v5236_v11  ;;  %v2070_v0 = vperm.slane %v1883_v26, %v3917_v50  ;;  %v1774_v29 = vld [vmem:[#allocation3] sm:$0xf] }
 0x676   : > { %v2056_v24 = vsel %vm1080_vm15, %v2055_v10, %v2054_v23 }
 0x677   : > { %v2058_v34 = vsel %vm1084_vm0, %v2057_v27, %v2056_v24  ;;  %v1775_v27 = vmul.f32 %v4513_v22, %v1774_v29  ;;  %v2434_v22 = vld [vmem:[#allocation5] sm:$0xf] }
 0x678   : > { %v2060_v61 = vsel %vm1088_vm1, %v2059_v20, %v2058_v34  ;;  %v1887_v4 = vpop.xlane.xlu0 %1886 }
 0x679   : > { %v2093_v47 = vsel %vm5240_vm13, %v2060_v61, %v2092_v17  ;;  %v2064_v17 = vperm.slane %v1877_v35, %v5228_v12  ;;  %v2074_v12 = vperm.slane %v1887_v4, %v3951_v57 }
 0x67b   : > { %v1873_v58 = vpop.xlane.xlu2 %1872  ;;  %v1889_v19 = vpop.xlane.xlu1 %1888 }
 0x67c   : > { %v2061_v13 = vperm.slane %v1873_v58, %v3849_v39  ;;  %v2076_v30 = vperm.slane %v1889_v19, %v5229_v42 }
 0x67d   : > { %v2402_v15 = vpop.f32.mrf.mxu3 }
 0x67e   : > { %v2429_v14 = vadd.f32 %v2425_v41, %v2402_v15  ;;  %v2063_v62 = vsel %vm1032_vm3, %v2062_v56, %v2061_v13  ;;  %vm5241_vm3 = vcmask 786112  }
 0x67f   : > { %v2065_v3 = vsel %vm1036_vm4, %v2064_v17, %v2063_v62  ;;  %vm5242_vm4 = vmmov %vm5238_vm14 }
 0x680   : > { %2433 = vst [vmem:[#allocation4 + $0x8] sm:$0xff] %v2429_v14  ;;  %v1893_v25 = vpop.xlane.xlu0 %1892 }
 0x681   : > { %v2080_v50 = vperm.slane %v1893_v25, %v5232_v63 }
 0x683   : > { %v1879_v40 = vpop.xlane.xlu2 %1878  ;;  %v1895_v36 = vpop.xlane.xlu1 %1894 }
 0x684   : > { %v2066_v53 = vperm.slane %v1879_v40, %v3875_v1  ;;  %v2082_v48 = vperm.slane %v1895_v36, %v5233_v59 }
 0x685   : > { %v2404_v16 = vpop.f32.mrf.mxu3 }
 0x686   : > { %v2067_v31 = vsel %vm1040_vm5, %v2066_v53, %v2065_v3  ;;  %vm5243_vm5 = vcmask 1043459  }
 0x687   : > { %v2069_v44 = vsel %vm1044_vm6, %v2068_v60, %v2067_v31  ;;  %vm5244_vm6 = vmmov %vm5240_vm13 }
 0x688   : > { %v2071_v1 = vsel %vm1048_vm7, %v2070_v0, %v2069_v44  ;;  %v1899_v38 = vpop.xlane.xlu0 %1898  ;;  %vm2460_vm7 = vcmask 60416  }
 0x689   : > { %v2086_v52 = vperm.slane %v1899_v38, %v5236_v11 }
 0x68b   : > { %v1885_v54 = vpop.xlane.xlu2 %1884  ;;  %v1901_v8 = vpop.xlane.xlu1 %1900 }
 0x68c   : > { %v2072_v2 = vperm.slane %v1885_v54, %v3931_v33 }
 0x68e   : > { %v2073_v32 = vsel %vm1052_vm8, %v2072_v2, %v2071_v1  ;;  %vm5245_vm8 = vmmov %vm5243_vm5 }
 0x68f   : > { %v2075_v5 = vsel %vm1056_vm9, %v2074_v12, %v2073_v32 }
 0x690   : > { %v2077_v46 = vsel %vm1060_vm10, %v2076_v30, %v2075_v5  ;;  %v2442_v26 = vpop.xlane.xlu0 %2441 }
 0x691   : > { %v2452_v34 = vperm.slane %v2442_v26, %v3849_v39 }
 0x693   : > { %v1891_v35 = vpop.xlane.xlu2 %1890  ;;  %v1903_v18 = vpop.xlane.xlu1 %1902 }
 0x694   : > { %v2078_v51 = vperm.slane %v1891_v35, %v5231_v45  ;;  %v2088_v45 = vperm.slane %v1901_v8, %v5237_v9  ;;  %v2090_v63 = vperm.slane %v1903_v18, %v5239_v55 }
 0x696   : > { %v2079_v33 = vsel %vm1064_vm11, %v2078_v51, %v2077_v46 }
 0x697   : > { %v2081_v43 = vsel %vm1068_vm12, %v2080_v50, %v2079_v33 }
 0x698   : > { %v2083_v42 = vsel %vm5241_vm3, %v2082_v48, %v2081_v43  ;;  %v2446_v9 = vpop.xlane.xlu0 %2445 }
 0x699   : > { %v2454_v55 = vperm.slane %v2446_v9, %v3849_v39 }
 0x69b   : > { %v1897_v57 = vpop.xlane.xlu2 %1896 }
 0x69c   : > { %v2084_v7 = vperm.slane %v1897_v57, %v5235_v21 }
 0x69e   : > { %v2085_v10 = vsel %vm5242_vm4, %v2084_v7, %v2083_v42 }
 0x69f   : > { %v2087_v37 = vsel %vm1080_vm15, %v2086_v52, %v2085_v10 }
 0x6a0   : > { %v2089_v59 = vsel %vm1084_vm0, %v2088_v45, %v2087_v37 }
 0x6a1   : > { %v2091_v21 = vsel %vm1088_vm1, %v2090_v63, %v2089_v59 }
 0x6a2   : > { %v2094_v11 = vsel %vm5243_vm5, %v2091_v21, %v2093_v47 }
 0x6a3   : > { %v2096_v23 = vadd.f32 %v2094_v11, %v1775_v27  ;;  %v2440_v20 = vpop.xlane.xlu2 %2439 }
 0x6a4   : > { %v2451_v24 = vperm.slane %v2440_v20, %v3849_v39 }
 0x6a5   : > { %2097 = vst [vmem:[#allocation3] sm:$0xf] %v2096_v23 }
 0x6a6   : > { %v2455_v28 = vsel %vm1183_vm2, %v2452_v34, %v2451_v24 }
 0x6ab   : > { %v2444_v61 = vpop.xlane.xlu2 %2443 }
 0x6ac   : > { %v2453_v6 = vperm.slane %v2444_v61, %v3849_v39 }
 0x6ae   : > { %v2456_v49 = vsel %vm5244_vm6, %v2453_v6, %v2455_v28  ;;  %2466 = sbr.rel (%p2795_p7) target bundleno = 1855 (0x73f), region = 163 }
 0x6af   : > { %v2457_v47 = vsel %vm5245_vm8, %v2454_v55, %v2456_v49 }
 0x6b0   : > { %v2459_v58 = vadd.f32 %v2457_v47, %v2434_v22 }
 0x6b2   : > { %2461 = vst.msk [vmem:[#allocation5] sm:$0xf] %vm2460_vm7, %v2459_v58 }
 0x6b3   : > { %v5247_v41 = vld [vmem:[#allocation89_spill] sm:$0xff]  ;;  %v2467_v56 = vld [vmem:[#allocation3] sm:$0xf]  ;;  %v2470_v2 = vld [vmem:[#allocation4] sm:$0xff] }
 0x6b4   : > { %3170 = vset.pattern.permute.xlu1 %v5247_v41  ;;  %3169 = vset.pattern.permute.xlu0 %v5247_v41  ;;  %3171 = vrcp.f32 %v2467_v56  ;;  %v2471_v31 = vld [vmem:[#allocation4 + $0x18] sm:$0xff]  ;;  %v2469_v60 = vld [vmem:[#allocation4 + $0x10] sm:$0xff]  ;;  %v2472_v44 = vld [vmem:[#allocation4 + $0x8] sm:$0xff] }
 0x6b9   : > { %v2489_v15 = vld [vmem:[#allocation5] sm:$0xf] }
 0x6ba   : > { %v2504_v19 = vperm.slane %v2489_v15, 2  ;;  %v2490_v39 = vperm.slane %v2489_v15, 0  ;;  %v2511_v14 = vperm.slane %v2489_v15, 3  ;;  %v2497_v13 = vperm.slane %v2489_v15, 1  ;;  %v3172_v40 = vpop.eup %3171 }
 0x6bb   : > { %v2475_v4 = vrot.slane %v3172_v40, 2  ;;  %v2476_v62 = vrot.slane %v3172_v40, 3  ;;  %v2474_v53 = vrot.slane %v3172_v40, 1  ;;  %v2477_v36 = vperm.slane %v3172_v40, 0 }
 0x6bc   : > { %2509 = vperm.xlu1 %3170, %v2504_v19   ;;  %2495 = vperm.xlu0 %3169, %v2490_v39  }
 0x6bd   : > { %v2479_v3 = vperm.slane %v2475_v4, 0  ;;  %v2480_v54 = vperm.slane %v2476_v62, 0  ;;  %v2478_v25 = vperm.slane %v2474_v53, 0  ;;  %v2485_v1 = vmul.f32 %v2477_v36, %v2469_v60 }
 0x6bf   : > { %v2487_v0 = vmul.f32 %v2479_v3, %v2471_v31  ;;  %v2488_v8 = vmul.f32 %v2480_v54, %v2472_v44  ;;  %v2486_v5 = vmul.f32 %v2478_v25, %v2470_v2 }
 0x6c4   : > { %2516 = vperm.xlu1 %3170, %v2511_v14   ;;  %2502 = vperm.xlu0 %3169, %v2497_v13  }
 0x72e   : > { %v2510_v16 = vpop.permute.xlu1 %2509  ;;  %v2496_v17 = vpop.permute.xlu0 %2495 }
 0x72f   : > { %v2520_v32 = vmul.f32 1e-06, %v2510_v16  ;;  %v2518_v12 = vmul.f32 1e-06, %v2496_v17 }
 0x731   : > { %v2524_v46 = vadd.f32 %v2520_v32, %v2487_v0  ;;  %v2522_v33 = vadd.f32 %v2518_v12, %v2485_v1 }
 0x736   : > { %v2517_v35 = vpop.permute.xlu1 %2516  ;;  %v2503_v30 = vpop.permute.xlu0 %2502 }
 0x737   : > { %v2521_v51 = vmul.f32 1e-06, %v2517_v35  ;;  %v2519_v38 = vmul.f32 1e-06, %v2503_v30 }
 0x739   : > { %v2525_v50 = vadd.f32 %v2521_v51, %v2488_v8  ;;  %v2523_v43 = vadd.f32 %v2519_v38, %v2486_v5 }
 0x73b   : > { %v2813_v48 = vpack.c.bf16 %v2525_v50, %v2524_v46  ;;  %v2808_v57 = vpack.c.bf16 %v2523_v43, %v2522_v33 }
 0x73d   : > { %2815 = vst [vmem:[%s3510_s6 + $0x8] sm:$0xff] %v2813_v48  }
 0x73e   : > { %2809 = vst [vmem:[%s3510_s6] sm:$0xff] %v2808_v57  }
 0x73f PF: > { %2540 = sbr.rel (!%p3466_p2) target bundleno = 1871 (0x74f), region = 167  ;;  %s5248_s16 = sld [smem:[#allocation13_spill]] (%p3466_p2) }
 0x740   : > { %s5249_s2 = sld [smem:[#allocation14_spill]] (%p3466_p2) }
 0x741   : > { %s5250_s18 = sld [smem:[#allocation12_spill]] (%p3466_p2) }
 0x742   : > { %s5251_s21 = sld [smem:[#allocation99_spill]] (%p3466_p2) }
 0x744   : > { %v2568_v52 = vld [vmem:[%s3510_s6 + $0x8] sm:$0xf]  ;;  %v2570_v42 = vld [vmem:[%s3510_s6 + $0xc] sm:$0xf] }
 0x745   : > { %s2804_s19 = sshll.u32 %s5248_s16, 3  ;;  %v2564_v18 = vld [vmem:[%s3510_s6] sm:$0xf]  ;;  %v2566_v7 = vld [vmem:[%s3510_s6 + $0x4] sm:$0xf] }
 0x746   : > { %s2799_s20 = sshll.u32 %s5249_s2, 4 }
 0x747   : > { %s2543_s30 = sadd.s32 %s5250_s18, %s2804_s19 }
 0x748   : > { %s2545_s22 = sadd.s32 %s2799_s20, %s2543_s30 }
 0x749   : > { %s2800_s29 = sshll.u32 %s2545_s22, 2 }
 0x74a   : > { %s2547_s7 = scalar_lea.vmem %s5251_s21, %s2800_s29 }
 0x74b   : > { %2565 = vst [vmem:[%s2547_s7] sm:$0xf] %v2564_v18 }
 0x74c   : > { %2567 = vst [vmem:[%s2547_s7 + $0x8] sm:$0xf] %v2566_v7 }
 0x74d   : > { %2569 = vst [vmem:[%s2547_s7 + $0x10] sm:$0xf] %v2568_v52 }
 0x74e   : > { %2571 = vst [vmem:[%s2547_s7 + $0x18] sm:$0xf] %v2570_v42 }
 0x74f PF: > { %s13_s26 = sadd.s32 1, %s3291_s26   ;;  %s5253_s18 = sld [smem:[#allocation15_spill]] }
 0x750   : > { %p4904_p8 = scmp.ge.s32.totalorder %s13_s26, 18   ;;  %s5254_s22 = sld [smem:[#allocation16_spill]] }
 0x751   : > { %s5255_s8 = sld [smem:[#allocation17_spill]]  ;;  %s5258_s12 = smov %s3239_s13 }
 0x752   : > { %s5256_s9 = sld [smem:[#allocation18_spill]]  ;;  %s5259_s13 = smov %s3471_s14 }
 0x753   : > { %s5257_s10 = sld [smem:[#allocation19_spill]]  ;;  %s5260_s14 = smov %s3247_s15 }
 0x754   : > { %s5261_s15 = smov %s3458_s11  ;;  %s5262_s16 = smov %s3255_s17 }
 0x755   : > { %s5263_s17 = smov %s3455_s3  ;;  %s5264_s19 = smov %s3279_s23 }
 0x756   : > { %s5265_s20 = smov %s3283_s24  ;;  %s5266_s21 = smov %s3287_s25 }
 0x757   : > { %s5267_s23 = smov %s5255_s8  ;;  %12 = sbr.rel (!%p4904_p8) target bundleno = 12 (0xc), region = 255 }
 0x758   : > { %s5268_s24 = smov %s5256_s9 }
 0x759   : > { %s5269_s25 = smov %s5257_s10 }

// kernel: single_axial_attention.5
= control target key start
LH: loop header
LB: loop body
LE: loop exit
PB: predicated region body
PF: predicated region fallthrough
CT: control target
= control target key end

     0   :  { %s597_s12 = smov 0   ;;  %s599_s13 = smov 0   ;;  %s674_s0 = inlined_call_operand.vmem [shape: bf16[2,8,2048], index: 0, kind: input, shape index: {}]   ;;  %s675_s1 = inlined_call_operand.vmem [shape: bf16[8,8], index: 1, kind: input, shape index: {}]   ;;  %s676_s2 = inlined_call_operand.vmem [shape: f32[8,1], index: 2, kind: input, shape index: {}]   ;;  %s677_s3 = inlined_call_operand.vmem [shape: f32[2,8,2048], index: 3, kind: output, shape index: {}]  }
   0x1   :  { %s601_s14 = smov 0   ;;  %s603_s15 = smov 0  }
   0x2   :  { %s605_s16 = smov 0  }
   0x3 LB: > { %s22_s17 = sadd.s32 1, %s566_s14  ;;  %s25_s18 = sadd.s32 1, %s570_s15  ;;  %s574_s16 = sphi %s605_s16, %s13_s16   ;;  %s570_s15 = sphi %s603_s15, %s681_s15   ;;  %s566_s14 = sphi %s601_s14, %s680_s14   ;;  %s562_s13 = sphi %s599_s13, %s679_s13   ;;  %s558_s12 = sphi %s597_s12, %s678_s12  }
   0x4   : > { %p23_p0 = scmp.ge.s32.totalorder %s22_s17, 2  ;;  %p477_p1 = scmp.ge.s32.totalorder %s574_s16, 1 }
   0x5   : > { %p158_p2 = scmp.lt.s32.totalorder %s574_s16, 5 }
   0x6   : > { %s683_s17 = smov (%p23_p0, %s22_s17), 0  ;;  %s685_s18 = smov (!%p23_p0, %s25_s18), %s570_s15 }
   0x7   : > { %p159_p3 = pnand %p477_p1, %p158_p2  ;;  %p27_p4 = scmp.ge.s32.totalorder %s685_s18, 2 }
   0x8   : > { %s478_s19 = sshll.u32 (!%p159_p3), %s558_s12, 3  ;;  %p191_p5 = scmp.lt.s32.totalorder (!%p159_p3), %s562_s13, 1 }
   0x9   : > { %s687_s18 = smov (%p27_p4, %s685_s18), 0  ;;  %162 = sbr.rel (%p159_p3) target bundleno = 185 (0xb9), region = 32 }
   0xa   : > { %p193_p6 = scmp.lt.s32.totalorder (!%p159_p3), %s478_s19, 15 }
   0xe   : > { %s689_s13 = smov (!%p191_p5, %s562_s13), 1  ;;  %v576_v0 = vmov 0   ;;  %v216_v1 = vld [vmem:[%s676_s2] sm:$0xff]  ;;  %s691_s19 = smov (!%p193_p6, %s478_s19), 15  ;;  %vm246_vm0 = vcmask 1043456   ;;  %vm242_vm1 = vcmask 64512  }
   0xf   : > { %535 = vset.pattern.permute.xlu0 %v576_v0  ;;  %s479_s22 = sshll.u32 %s689_s13, 4  ;;  %v211_v26 = vld [vmem:[%s675_s1] sm:$0xf] }
  0x10   : > { %219 = vperm.xlu0 %535, %v216_v1   ;;  %s630_s23 = sadd.s32 %s479_s22, %s691_s19 }
  0x11   : > { %s480_s24 = sshll.u32 %s630_s23, 2  ;;  %s483_s30 = sshll.u32 %s630_s23, 3 }
  0x12   : > { %s198_s27 = scalar_lea.vmem %s674_s0, %s480_s24  ;;  %s208_s6 = scalar_lea.vmem %s677_s3, %s483_s30 }
  0x13   : > { %v212_v2 = vld [vmem:[%s198_s27] sm:$0xff]  ;;  %v213_v3 = vld [vmem:[%s198_s27 + $0x8] sm:$0xff]  ;;  %v215_v4 = vld [vmem:[%s198_s27 + $0x18] sm:$0xff] }
  0x14   : > { %v226_v5 = vunpack.c.l.b16 %v212_v2  ;;  %v227_v6 = vunpack.c.h.b16 %v212_v2  ;;  %v228_v7 = vunpack.c.l.b16 %v213_v3  ;;  %v229_v8 = vunpack.c.h.b16 %v213_v3  ;;  %v214_v9 = vld [vmem:[%s198_s27 + $0x10] sm:$0xff] }
  0x15   : > { %v232_v10 = vunpack.c.l.b16 %v215_v4  ;;  %v233_v11 = vunpack.c.h.b16 %v215_v4  ;;  %v230_v12 = vunpack.c.l.b16 %v214_v9  ;;  %v231_v13 = vunpack.c.h.b16 %v214_v9 }
  0x16   : > { %v234_v14 = vpack.c.b16 %v226_v5, %v226_v5  ;;  %v235_v15 = vpack.c.b16 %v227_v6, %v227_v6  ;;  %v236_v16 = vpack.c.b16 %v228_v7, %v228_v7  ;;  %v237_v17 = vpack.c.b16 %v229_v8, %v229_v8 }
  0x17   : > { %v240_v18 = vpack.c.b16 %v232_v10, %v232_v10  ;;  %v241_v19 = vpack.c.b16 %v233_v11, %v233_v11  ;;  %v238_v20 = vpack.c.b16 %v230_v12, %v230_v12  ;;  %v239_v21 = vpack.c.b16 %v231_v13, %v231_v13 }
  0x18   : > { %v248_v22 = vsel %vm246_vm0, %v234_v14, 0  ;;  %v251_v23 = vsel %vm246_vm0, %v235_v15, 0  ;;  %v254_v24 = vsel %vm246_vm0, %v236_v16, 0  ;;  %v257_v25 = vsel %vm246_vm0, %v237_v17, 0 }
  0x19   : > { %278 = vmatpush.bf16.msra.mxu0 %v248_v22  ;;  %291 = vmatpush.bf16.msra.mxu1 %v251_v23  ;;  %v266_v27 = vsel %vm246_vm0, %v240_v18, 0  ;;  %v269_v28 = vsel %vm246_vm0, %v241_v19, 0  ;;  %v260_v29 = vsel %vm246_vm0, %v238_v20, 0  ;;  %v263_v30 = vsel %vm246_vm0, %v239_v21, 0 }
  0x1a   : > { %304 = vmatpush.bf16.msra.mxu2 %v254_v24  ;;  %317 = vmatpush.bf16.msra.mxu3 %v257_v25 }
  0x1c   : > { %484 = vmatmul.msk.bf16.vlgmr.msra.gmra.mxu0 %vm242_vm1, %v211_v26  ;;  %485 = vmatmul.msk.bf16.vlgmr.msra.gmra.mxu1 %vm242_vm1, %v211_v26 }
  0x1d   : > { %486 = vmatmul.msk.bf16.vlgmr.msra.gmra.mxu2 %vm242_vm1, %v211_v26  ;;  %487 = vmatmul.msk.bf16.vlgmr.msra.gmra.mxu3 %vm242_vm1, %v211_v26 }
  0x1e   : > { %356 = vmatpush.bf16.msrb.mxu2 %v266_v27  ;;  %369 = vmatpush.bf16.msrb.mxu3 %v269_v28 }
  0x1f   : > { %330 = vmatpush.bf16.msrb.mxu0 %v260_v29  ;;  %343 = vmatpush.bf16.msrb.mxu1 %v263_v30 }
  0x2c   : > { %488 = vmatmul.msk.bf16.vlgmr.msrb.gmra.mxu0 %vm242_vm1, %v211_v26  ;;  %489 = vmatmul.msk.bf16.vlgmr.msrb.gmra.mxu1 %vm242_vm1, %v211_v26 }
  0x2d   : > { %490 = vmatmul.msk.bf16.vlgmr.msrb.gmra.mxu2 %vm242_vm1, %v211_v26  ;;  %491 = vmatmul.msk.bf16.vlgmr.msrb.gmra.mxu3 %vm242_vm1, %v211_v26 }
  0x82   : > { %v220_v31 = vpop.permute.xlu0 %219 }
  0x99   : > { %v280_v32 = vpop.f32.mrf.mxu0  ;;  %v293_v33 = vpop.f32.mrf.mxu1 }
  0x9a   : > { %v281_v34 = vadd.f32 %v280_v32, %v220_v31  ;;  %v294_v35 = vadd.f32 %v293_v33, %v220_v31 }
  0x9c   : > { %375 = vst [vmem:[%s208_s6] sm:$0xff] %v281_v34 }
  0x9d   : > { %376 = vst [vmem:[%s208_s6 + $0x8] sm:$0xff] %v294_v35 }
  0xa0   : > { %v306_v36 = vpop.f32.mrf.mxu2  ;;  %v319_v37 = vpop.f32.mrf.mxu3 }
  0xa1   : > { %v307_v38 = vadd.f32 %v306_v36, %v220_v31  ;;  %v320_v39 = vadd.f32 %v319_v37, %v220_v31  ;;  %v282_v40 = vpop.f32.mrf.mxu0  ;;  %v295_v41 = vpop.f32.mrf.mxu1 }
  0xa3   : > { %377 = vst [vmem:[%s208_s6 + $0x10] sm:$0xff] %v307_v38 }
  0xa4   : > { %378 = vst [vmem:[%s208_s6 + $0x18] sm:$0xff] %v320_v39 }
  0xa8   : > { %v308_v42 = vpop.f32.mrf.mxu2  ;;  %v321_v43 = vpop.f32.mrf.mxu3 }
  0xa9   : > { %v332_v44 = vpop.f32.mrf.mxu0  ;;  %v345_v45 = vpop.f32.mrf.mxu1 }
  0xaa   : > { %v333_v46 = vadd.f32 %v332_v44, %v220_v31  ;;  %v346_v47 = vadd.f32 %v345_v45, %v220_v31 }
  0xac   : > { %379 = vst [vmem:[%s208_s6 + $0x20] sm:$0xff] %v333_v46 }
  0xad   : > { %380 = vst [vmem:[%s208_s6 + $0x28] sm:$0xff] %v346_v47 }
  0xb0   : > { %v358_v48 = vpop.f32.mrf.mxu2  ;;  %v371_v49 = vpop.f32.mrf.mxu3 }
  0xb1   : > { %v359_v50 = vadd.f32 %v358_v48, %v220_v31  ;;  %v372_v51 = vadd.f32 %v371_v49, %v220_v31  ;;  %v334_v52 = vpop.f32.mrf.mxu0  ;;  %v347_v53 = vpop.f32.mrf.mxu1 }
  0xb3   : > { %381 = vst [vmem:[%s208_s6 + $0x30] sm:$0xff] %v359_v50 }
  0xb4   : > { %382 = vst [vmem:[%s208_s6 + $0x38] sm:$0xff] %v372_v51 }
  0xb8   : > { %v360_v54 = vpop.f32.mrf.mxu2  ;;  %v373_v55 = vpop.f32.mrf.mxu3 }
  0xb9 PF: > { %s13_s16 = sadd.s32 1, %s574_s16   ;;  %s678_s12 = smov %s566_s14 }
  0xba   : > { %p10_p7 = scmp.ge.s32.totalorder %s13_s16, 6   ;;  %s679_s13 = smov %s570_s15 }
  0xbb   : > { %s680_s14 = smov %s683_s17  ;;  %s681_s15 = smov %s687_s18 }
  0xbc   :  { %12 = sbr.rel (!%p10_p7) target bundleno = 3 (0x3), region = 62 }

</bundles_post_ra>
